<compile_context>
chip_gen: v6e
topology: v6e:2x2x1
jax: 0.10.0
libtpu: 0.0.40
codegen_flags: <defaults>
</compile_context>

<pallas_src>
import functools
import math

import jax
import jax.numpy as jnp
from jax import lax
from jax.experimental import pallas as pl
from jax.experimental.pallas import tpu as pltpu


# ------------------------------ fused kernel ------------------------------- #

def _fused_kernel(x_ref, qry_ref, lr_ref,
                  qkv_w_ref, qry_w_ref,
                  proj_w_ref, proj_b_ref,
                  qproj_w_ref, qproj_b_ref,
                  lproj_w_ref, lproj_b_ref,
                  x_out_ref, qry_out_ref, lr_out_ref,
                  qkv_s, x_acc, q_acc,
                  *, num_heads, n_x):
    f32 = jnp.float32
    C = x_ref.shape[-1]
    hd = C // num_heads
    scale = 1.0 / math.sqrt(hd)

    # Bias-free fused QKV projections, written straight into one joint scratch:
    # rows [0:n_x] = x tokens, rows [n_x:S] = query tokens; columns are
    # [q_all_heads | k_all_heads | v_all_heads] (matches the reference's
    # reshape(B,N,3,H,hd).permute layout).  Native-dtype MXU operands, f32
    # accumulation, result cast back to the module dtype (like nn.Linear).
    qkv_s[0:n_x, :] = jnp.dot(
        x_ref[...], qkv_w_ref[...], preferred_element_type=f32
    ).astype(qkv_s.dtype)
    qkv_s[n_x:, :] = jnp.dot(
        qry_ref[...], qry_w_ref[...], preferred_element_type=f32
    ).astype(qkv_s.dtype)

    nt_dims = (((1,), (1,)), ((), ()))   # q @ k.T without materializing k.T
    for h in range(num_heads):
        cq = slice(h * hd, (h + 1) * hd)
        ck = slice(C + h * hd, C + (h + 1) * hd)
        cv = slice(2 * C + h * hd, 2 * C + (h + 1) * hd)
        qh = qkv_s[:, cq] * scale        # 1/sqrt(hd) folded into q (S*hd elems)
        kh = qkv_s[:, ck]
        vh = qkv_s[:, cv]

        s = lax.dot_general(qh, kh, nt_dims, preferred_element_type=f32)  # (S,S)
        m = jnp.max(s, axis=-1, keepdims=True)
        p = jnp.exp(s - m)
        denom = jnp.sum(p, axis=-1, keepdims=True)
        o = jnp.dot(p.astype(vh.dtype), vh, preferred_element_type=f32)   # (S,hd)
        o = o * pl.reciprocal(denom, approx=True)    # EUP; deferred softmax norm

        # Fold the output projections into the head loop:
        #   attn @ W == sum_h attn[:, h*hd:(h+1)*hd] @ W[h*hd:(h+1)*hd, :]
        # -> no head-merge concat, only one head's output is ever live.
        rows = slice(h * hd, (h + 1) * hd)
        px = jnp.dot(o[:n_x].astype(proj_w_ref.dtype), proj_w_ref[rows, :],
                     preferred_element_type=f32)
        pq = jnp.dot(o[n_x:].astype(qproj_w_ref.dtype), qproj_w_ref[rows, :],
                     preferred_element_type=f32)
        if h == 0:
            x_acc[...] = px
            q_acc[...] = pq
        else:
            x_acc[...] += px
            q_acc[...] += pq

    x_out_ref[...] = (x_acc[...] + proj_b_ref[...]).astype(x_out_ref.dtype)
    qry_out_ref[...] = (q_acc[...] + qproj_b_ref[...]).astype(qry_out_ref.dtype)
    # low_res path: single lane-dense projection of the (pre-scrambled) input.
    lr_out_ref[...] = (jnp.dot(lr_ref[...], lproj_w_ref[...],
                               preferred_element_type=f32)
                       + lproj_b_ref[...]).astype(lr_out_ref.dtype)


# --------------------------- module forward pass ---------------------------- #

def dual_attention_multires(params, x, query, low_res, num_heads,
                            single_buffer_weights=True):
    """Bidirectional branch of DualAttentionMultiRes.forward (eval, no masks)."""
    B, N, C = x.shape
    _, Nq, Cq = query.shape
    _, Nl, Cl = low_res.shape
    assert C == Cq and C % num_heads == 0   # bidirectional => dim == query_dim

    # The reference applies low_res.transpose(1,2).reshape(B,Nl,Cl) to the
    # *unmodified* low_res input (pure element permutation). Do it on the input
    # (tiny XLA copy) so the kernel's low_res path is one lane-dense matmul.
    low_res_s = low_res.transpose(0, 2, 1).reshape(B, Nl, Cl)

    proj_b = params["proj_b"].reshape(1, C)
    qproj_b = params["query_proj_b"].reshape(1, Cq)
    lproj_b = params["low_res_proj_b"].reshape(1, Cl)

    # NOTE: low_res_linear(low_res) is computed but unused in the bidirectional
    # branch of the reference module; it does not affect outputs, so skipped.

    S = N + Nq
    hd = C // num_heads
    flops = B * (2 * N * C * 3 * C + 2 * Nq * Cq * 3 * Cq
                 + num_heads * (4 * S * S * hd)
                 + 2 * N * C * C + 2 * Nq * Cq * Cq + 2 * Nl * Cl * Cl)
    w_keys = ("qkv_w", "query_w", "proj_w", "proj_b",
              "query_proj_w", "query_proj_b", "low_res_proj_w", "low_res_proj_b")
    bytes_accessed = int(
        2 * (x.size * x.dtype.itemsize + query.size * query.dtype.itemsize
             + low_res.size * low_res.dtype.itemsize)
        + sum(params[k].size * params[k].dtype.itemsize for k in w_keys))

    kernel = functools.partial(_fused_kernel, num_heads=num_heads, n_x=N)

    def batch_block(shape):
        return pl.BlockSpec((None,) + shape, lambda b: (b, 0, 0))

    const0 = lambda b: (0, 0)

    # Constant-index weights: single-buffer to halve their VMEM footprint
    # (matters most on v7x, 64 MiB VMEM, at production C).
    if single_buffer_weights:
        pipe = pl.Buffered(1)
        w_spec = lambda shape: pl.BlockSpec(shape, const0, pipeline_mode=pipe)
    else:
        w_spec = lambda shape: pl.BlockSpec(shape, const0)

    x_out, q_out, l_out = pl.pallas_call(
        kernel,
        out_shape=(jax.ShapeDtypeStruct((B, N, C), x.dtype),
                   jax.ShapeDtypeStruct((B, Nq, Cq), query.dtype),
                   jax.ShapeDtypeStruct((B, Nl, Cl), low_res.dtype)),
        grid=(B,),
        in_specs=[
            batch_block((N, C)),        # x
            batch_block((Nq, Cq)),      # query
            batch_block((Nl, Cl)),      # low_res (pre-scrambled)
            w_spec((C, 3 * C)),         # qkv_w
            w_spec((Cq, 3 * Cq)),       # query_w
            w_spec((C, C)),             # proj_w
            w_spec((1, C)),             # proj_b
            w_spec((Cq, Cq)),           # query_proj_w
            w_spec((1, Cq)),            # query_proj_b
            w_spec((Cl, Cl)),           # low_res_proj_w
            w_spec((1, Cl)),            # low_res_proj_b
        ],
        out_specs=(batch_block((N, C)), batch_block((Nq, Cq)),
                   batch_block((Nl, Cl))),
        scratch_shapes=[
            pltpu.VMEM((S, 3 * C), x.dtype),     # joint QKV scratch (native dtype)
            pltpu.VMEM((N, C), jnp.float32),     # x-path projection accumulator
            pltpu.VMEM((Nq, Cq), jnp.float32),   # query-path projection accumulator
        ],
        compiler_params=pltpu.CompilerParams(
            dimension_semantics=("parallel",),
            vmem_limit_bytes=64 * 1024 * 1024),  # safe on v7x; raise on v5e/v6e
        cost_estimate=pl.CostEstimate(
            flops=flops,
            transcendentals=B * num_heads * S * S,
            bytes_accessed=bytes_accessed),
    )(x, query, low_res_s,
      params["qkv_w"], params["query_w"],
      params["proj_w"], proj_b,
      params["query_proj_w"], qproj_b,
      params["low_res_proj_w"], lproj_b)
    return x_out, q_out, l_out


# ------------------------------- parameters --------------------------------- #

def init_params(key, dim, query_dim, low_res_dim):
    """PyTorch-Linear-style uniform init.  Weights stored (in, out); a real
    PyTorch checkpoint (out, in) would need a transpose when porting."""
    ks = jax.random.split(key, 9)

    def u(k, shape, fan_in):
        bound = 1.0 / math.sqrt(fan_in)
        return jax.random.uniform(k, shape, jnp.float32, -bound, bound)

    return {
        # qkv_bias=False -> no bias for qkv / query_linear / low_res_linear
        "qkv_w": u(ks[0], (dim, 3 * dim), dim),
        "query_w": u(ks[1], (query_dim, 3 * query_dim), query_dim),
        "low_res_w": u(ks[2], (low_res_dim, 3 * low_res_dim), low_res_dim),  # unused (bidirectional)
        "proj_w": u(ks[3], (dim, dim), dim),
        "proj_b": u(ks[4], (dim,), dim),
        "query_proj_w": u(ks[5], (query_dim, query_dim), query_dim),
        "query_proj_b": u(ks[6], (query_dim,), query_dim),
        "low_res_proj_w": u(ks[7], (low_res_dim, low_res_dim), low_res_dim),
        "low_res_proj_b": u(ks[8], (low_res_dim,), low_res_dim),
    }


# ------------------------------ pure-JAX ref -------------------------------- #

def reference(params, x, query, low_res, num_heads):
    B, N, C = x.shape
    _, Nq, Cq = query.shape
    _, Nl, Cl = low_res.shape
    H, hd = num_heads, C // num_heads

    qkv = (x @ params["qkv_w"]).reshape(B, N, 3, H, hd).transpose(2, 0, 3, 1, 4)
    q, k, v = qkv[0], qkv[1], qkv[2]
    qqkv = (query @ params["query_w"]).reshape(B, Nq, 3, H, hd).transpose(2, 0, 3, 1, 4)
    qq, qk, qv = qqkv[0], qqkv[1], qqkv[2]
    qc = jnp.concatenate([q, qq], axis=2)
    kc = jnp.concatenate([k, qk], axis=2)
    vc = jnp.concatenate([v, qv], axis=2)
    s = jnp.einsum("bhqd,bhkd->bhqk", qc, kc) / math.sqrt(hd)
    p = jax.nn.softmax(s, axis=-1)
    o = jnp.einsum("bhqk,bhkd->bhqd", p, vc)
    x_o = o[:, :, :N, :].transpose(0, 2, 1, 3).reshape(B, N, C)
    q_o = o[:, :, N:, :].transpose(0, 2, 1, 3).reshape(B, Nq, Cq)
    l_o = low_res.transpose(0, 2, 1).reshape(B, Nl, Cl)
    x_o = x_o @ params["proj_w"] + params["proj_b"]
    l_o = l_o @ params["low_res_proj_w"] + params["low_res_proj_b"]
    q_o = q_o @ params["query_proj_w"] + params["query_proj_b"]
    return x_o, q_o, l_o


# ---------------------------------- main ------------------------------------ #

if __name__ == "__main__":
    B, N, Nq, Nl = 2, 16, 8, 16
    dim = query_dim = 32
    low_res_dim = 32
    num_heads = 4   # bidirectional => num_heads == query_heads, dim == query_dim

    key = jax.random.PRNGKey(0)
    kp, kx, kq, kl = jax.random.split(key, 4)
    params = init_params(kp, dim, query_dim, low_res_dim)
    x = jax.random.normal(kx, (B, N, dim), jnp.float32)
    query = jax.random.normal(kq, (B, Nq, query_dim), jnp.float32)
    low_res = jax.random.normal(kl, (B, Nl, low_res_dim), jnp.float32)

    # Prefer single-buffered constant weights; fall back to default double
    # buffering if this jax version does not support pipeline_mode on
    # pallas_call BlockSpecs (fallback is detected at compile time).
    try:
        run = jax.jit(functools.partial(dual_attention_multires,
                                        num_heads=num_heads,
                                        single_buffer_weights=True))
        outs = run(params, x, query, low_res)
        jax.block_until_ready(outs)
    except Exception:
        run = jax.jit(functools.partial(dual_attention_multires,
                                        num_heads=num_heads,
                                        single_buffer_weights=False))
        outs = run(params, x, query, low_res)
        jax.block_until_ready(outs)
    x_out, q_out, l_out = outs

    x_ref, q_ref, l_ref = reference(params, x, query, low_res, num_heads)
    # Tolerance 1e-3: the softmax denominator uses the EUP approximate
    # reciprocal (~1e-4 rel. err) and the output projection sums heads in a
    # different order than one big matmul; everything accumulates in f32.
    assert jnp.allclose(x_out, x_ref, rtol=1e-3, atol=1e-3)
    assert jnp.allclose(q_out, q_ref, rtol=1e-3, atol=1e-3)
    assert jnp.allclose(l_out, l_ref, rtol=1e-3, atol=1e-3)

    # TODO(synk): zero_init / non-bidirectional branches, attention masks and
    # dropout (training mode) are not exercised by the default constructor
    # and are not implemented here.

    print("KERNEL_OK")
</pallas_src>

<mosaic_0001>
module attributes {stable_mosaic.version = 11 : i64} {
  func.func @_fused_kernel(%arg0: i32, %arg1: memref<1x16x32xf32, #tpu.memory_space<vmem>>, %arg2: memref<1x8x32xf32, #tpu.memory_space<vmem>>, %arg3: memref<1x16x32xf32, #tpu.memory_space<vmem>>, %arg4: memref<32x96xf32, #tpu.memory_space<vmem>>, %arg5: memref<32x96xf32, #tpu.memory_space<vmem>>, %arg6: memref<32x32xf32, #tpu.memory_space<vmem>>, %arg7: memref<1x32xf32, #tpu.memory_space<vmem>>, %arg8: memref<32x32xf32, #tpu.memory_space<vmem>>, %arg9: memref<1x32xf32, #tpu.memory_space<vmem>>, %arg10: memref<32x32xf32, #tpu.memory_space<vmem>>, %arg11: memref<1x32xf32, #tpu.memory_space<vmem>>, %arg12: memref<1x16x32xf32, #tpu.memory_space<vmem>>, %arg13: memref<1x8x32xf32, #tpu.memory_space<vmem>>, %arg14: memref<1x16x32xf32, #tpu.memory_space<vmem>>, %arg15: memref<24x96xf32, #tpu.memory_space<vmem>>, %arg16: memref<16x32xf32, #tpu.memory_space<vmem>>, %arg17: memref<8x32xf32, #tpu.memory_space<vmem>>) attributes {dimension_semantics = [#tpu.dimension_semantics<parallel>], iteration_bounds = array<i64: 2>, scalar_prefetch = 0 : i64, scratch_operands = 3 : i64, tpu.core_type = #tpu.core_type<tc>, window_params = [{transform_indices = @transform_0, window_bounds = array<i64: 1, 16, 32>}, {transform_indices = @transform_1, window_bounds = array<i64: 1, 8, 32>}, {transform_indices = @transform_2, window_bounds = array<i64: 1, 16, 32>}, {pipeline_mode = #tpu.pipeline_mode<synchronous>, transform_indices = @transform_3, window_bounds = array<i64: 32, 96>}, {pipeline_mode = #tpu.pipeline_mode<synchronous>, transform_indices = @transform_4, window_bounds = array<i64: 32, 96>}, {pipeline_mode = #tpu.pipeline_mode<synchronous>, transform_indices = @transform_5, window_bounds = array<i64: 32, 32>}, {pipeline_mode = #tpu.pipeline_mode<synchronous>, transform_indices = @transform_6, window_bounds = array<i64: 1, 32>}, {pipeline_mode = #tpu.pipeline_mode<synchronous>, transform_indices = @transform_7, window_bounds = array<i64: 32, 32>}, {pipeline_mode = #tpu.pipeline_mode<synchronous>, transform_indices = @transform_8, window_bounds = array<i64: 1, 32>}, {pipeline_mode = #tpu.pipeline_mode<synchronous>, transform_indices = @transform_9, window_bounds = array<i64: 32, 32>}, {pipeline_mode = #tpu.pipeline_mode<synchronous>, transform_indices = @transform_10, window_bounds = array<i64: 1, 32>}, {transform_indices = @transform_11, window_bounds = array<i64: 1, 16, 32>}, {transform_indices = @transform_12, window_bounds = array<i64: 1, 8, 32>}, {transform_indices = @transform_13, window_bounds = array<i64: 1, 16, 32>}]} {
    %c0 = arith.constant 0 : index
    %c0_0 = arith.constant 0 : index
    %c0_1 = arith.constant 0 : index
    %0 = vector.load %arg1[%c0, %c0_0, %c0_1] : memref<1x16x32xf32, #tpu.memory_space<vmem>>, vector<1x16x32xf32>
    %1 = vector.shape_cast %0 : vector<1x16x32xf32> to vector<16x32xf32>
    %c0_2 = arith.constant 0 : index
    %c0_3 = arith.constant 0 : index
    %2 = vector.load %arg4[%c0_2, %c0_3] : memref<32x96xf32, #tpu.memory_space<vmem>>, vector<32x96xf32>
    %cst = arith.constant dense<0.000000e+00> : vector<16x96xf32>
    %3 = tpu.matmul %1, %2, %cst {dimension_numbers = #tpu.dot_dimension_numbers<[1], [0], [0], [1], [0, 0, 1, 1], [], []>} : vector<16x32xf32>, vector<32x96xf32>, vector<16x96xf32> -> vector<16x96xf32>
    %c0_4 = arith.constant 0 : index
    %c0_5 = arith.constant 0 : index
    %4 = vector.load %arg15[%c0_4, %c0_5] : memref<24x96xf32, #tpu.memory_space<vmem>>, vector<16x96xf32>
    tpu.vector_store %arg15[%c0_4, %c0_5], %3 {strides = array<i32>} : memref<24x96xf32, #tpu.memory_space<vmem>>, vector<16x96xf32>,
    %c0_6 = arith.constant 0 : index
    %c0_7 = arith.constant 0 : index
    %c0_8 = arith.constant 0 : index
    %5 = vector.load %arg2[%c0_6, %c0_7, %c0_8] : memref<1x8x32xf32, #tpu.memory_space<vmem>>, vector<1x8x32xf32>
    %6 = vector.shape_cast %5 : vector<1x8x32xf32> to vector<8x32xf32>
    %c0_9 = arith.constant 0 : index
    %c0_10 = arith.constant 0 : index
    %7 = vector.load %arg5[%c0_9, %c0_10] : memref<32x96xf32, #tpu.memory_space<vmem>>, vector<32x96xf32>
    %cst_11 = arith.constant dense<0.000000e+00> : vector<8x96xf32>
    %8 = tpu.matmul %6, %7, %cst_11 {dimension_numbers = #tpu.dot_dimension_numbers<[1], [0], [0], [1], [0, 0, 1, 1], [], []>} : vector<8x32xf32>, vector<32x96xf32>, vector<8x96xf32> -> vector<8x96xf32>
    %c16 = arith.constant 16 : index
    %c0_12 = arith.constant 0 : index
    %9 = vector.load %arg15[%c16, %c0_12] : memref<24x96xf32, #tpu.memory_space<vmem>>, vector<8x96xf32>
    tpu.vector_store %arg15[%c16, %c0_12], %8 {strides = array<i32>} : memref<24x96xf32, #tpu.memory_space<vmem>>, vector<8x96xf32>,
    %c0_13 = arith.constant 0 : index
    %c0_14 = arith.constant 0 : index
    %10 = vector.load %arg15[%c0_13, %c0_14] : memref<24x96xf32, #tpu.memory_space<vmem>>, vector<24x8xf32>
    %cst_15 = arith.constant 0.353553385 : f32
    %11 = vector.broadcast %cst_15 : f32 to vector<24x8xf32>
    %12 = arith.mulf %10, %11 : vector<24x8xf32>
    %c0_16 = arith.constant 0 : index
    %c32 = arith.constant 32 : index
    %13 = vector.load %arg15[%c0_16, %c32] : memref<24x96xf32, #tpu.memory_space<vmem>>, vector<24x8xf32>
    %c0_17 = arith.constant 0 : index
    %c64 = arith.constant 64 : index
    %14 = vector.load %arg15[%c0_17, %c64] : memref<24x96xf32, #tpu.memory_space<vmem>>, vector<24x8xf32>
    %cst_18 = arith.constant dense<0.000000e+00> : vector<24x24xf32>
    %15 = tpu.matmul %12, %13, %cst_18 {dimension_numbers = #tpu.dot_dimension_numbers<[1], [1], [0], [0], [0, 0, 1, 0], [], []>} : vector<24x8xf32>, vector<24x8xf32>, vector<24x24xf32> -> vector<24x24xf32>
    %cst_19 = arith.constant dense<0xFF800000> : vector<24xf32>
    %16 = vector.multi_reduction <maximumf>, %15, %cst_19 [1] : vector<24x24xf32> to vector<24xf32>
    %17 = vector.shape_cast %16 : vector<24xf32> to vector<24x1xf32>
    %18 = vector.broadcast %17 : vector<24x1xf32> to vector<24x24xf32>
    %19 = arith.subf %15, %18 : vector<24x24xf32>
    %20 = math.exp %19 : vector<24x24xf32>
    %cst_20 = arith.constant dense<0.000000e+00> : vector<24xf32>
    %21 = vector.multi_reduction <add>, %20, %cst_20 [1] : vector<24x24xf32> to vector<24xf32>
    %22 = vector.shape_cast %21 : vector<24xf32> to vector<24x1xf32>
    %cst_21 = arith.constant dense<0.000000e+00> : vector<24x8xf32>
    %23 = tpu.matmul %20, %14, %cst_21 {dimension_numbers = #tpu.dot_dimension_numbers<[1], [0], [0], [1], [0, 0, 1, 1], [], []>} : vector<24x24xf32>, vector<24x8xf32>, vector<24x8xf32> -> vector<24x8xf32>
    %24 = tpu.reciprocal %22 {approx = true} : vector<24x1xf32> -> vector<24x1xf32>
    %25 = vector.broadcast %24 : vector<24x1xf32> to vector<24x8xf32>
    %26 = arith.mulf %23, %25 : vector<24x8xf32>
    %27 = vector.extract_strided_slice %26 {offsets = [0, 0], sizes = [16, 8], strides = [1, 1]} : vector<24x8xf32> to vector<16x8xf32>
    %c0_22 = arith.constant 0 : index
    %c0_23 = arith.constant 0 : index
    %28 = vector.load %arg6[%c0_22, %c0_23] : memref<32x32xf32, #tpu.memory_space<vmem>>, vector<8x32xf32>
    %cst_24 = arith.constant dense<0.000000e+00> : vector<16x32xf32>
    %29 = tpu.matmul %27, %28, %cst_24 {dimension_numbers = #tpu.dot_dimension_numbers<[1], [0], [0], [1], [0, 0, 1, 1], [], []>} : vector<16x8xf32>, vector<8x32xf32>, vector<16x32xf32> -> vector<16x32xf32>
    %30 = vector.extract_strided_slice %26 {offsets = [16, 0], sizes = [8, 8], strides = [1, 1]} : vector<24x8xf32> to vector<8x8xf32>
    %c0_25 = arith.constant 0 : index
    %c0_26 = arith.constant 0 : index
    %31 = vector.load %arg8[%c0_25, %c0_26] : memref<32x32xf32, #tpu.memory_space<vmem>>, vector<8x32xf32>
    %cst_27 = arith.constant dense<0.000000e+00> : vector<8x32xf32>
    %32 = tpu.matmul %30, %31, %cst_27 {dimension_numbers = #tpu.dot_dimension_numbers<[1], [0], [0], [1], [0, 0, 1, 1], [], []>} : vector<8x8xf32>, vector<8x32xf32>, vector<8x32xf32> -> vector<8x32xf32>
    %c0_28 = arith.constant 0 : index
    %c0_29 = arith.constant 0 : index
    %33 = vector.load %arg16[%c0_28, %c0_29] : memref<16x32xf32, #tpu.memory_space<vmem>>, vector<16x32xf32>
    tpu.vector_store %arg16[%c0_28, %c0_29], %29 {strides = array<i32>} : memref<16x32xf32, #tpu.memory_space<vmem>>, vector<16x32xf32>,
    %c0_30 = arith.constant 0 : index
    %c0_31 = arith.constant 0 : index
    %34 = vector.load %arg17[%c0_30, %c0_31] : memref<8x32xf32, #tpu.memory_space<vmem>>, vector<8x32xf32>
    tpu.vector_store %arg17[%c0_30, %c0_31], %32 {strides = array<i32>} : memref<8x32xf32, #tpu.memory_space<vmem>>, vector<8x32xf32>,
    %c0_32 = arith.constant 0 : index
    %c8 = arith.constant 8 : index
    %35 = vector.load %arg15[%c0_32, %c8] : memref<24x96xf32, #tpu.memory_space<vmem>>, vector<24x8xf32>
    %cst_33 = arith.constant 0.353553385 : f32
    %36 = vector.broadcast %cst_33 : f32 to vector<24x8xf32>
    %37 = arith.mulf %35, %36 : vector<24x8xf32>
    %c0_34 = arith.constant 0 : index
    %c40 = arith.constant 40 : index
    %38 = vector.load %arg15[%c0_34, %c40] : memref<24x96xf32, #tpu.memory_space<vmem>>, vector<24x8xf32>
    %c0_35 = arith.constant 0 : index
    %c72 = arith.constant 72 : index
    %39 = vector.load %arg15[%c0_35, %c72] : memref<24x96xf32, #tpu.memory_space<vmem>>, vector<24x8xf32>
    %cst_36 = arith.constant dense<0.000000e+00> : vector<24x24xf32>
    %40 = tpu.matmul %37, %38, %cst_36 {dimension_numbers = #tpu.dot_dimension_numbers<[1], [1], [0], [0], [0, 0, 1, 0], [], []>} : vector<24x8xf32>, vector<24x8xf32>, vector<24x24xf32> -> vector<24x24xf32>
    %cst_37 = arith.constant dense<0xFF800000> : vector<24xf32>
    %41 = vector.multi_reduction <maximumf>, %40, %cst_37 [1] : vector<24x24xf32> to vector<24xf32>
    %42 = vector.shape_cast %41 : vector<24xf32> to vector<24x1xf32>
    %43 = vector.broadcast %42 : vector<24x1xf32> to vector<24x24xf32>
    %44 = arith.subf %40, %43 : vector<24x24xf32>
    %45 = math.exp %44 : vector<24x24xf32>
    %cst_38 = arith.constant dense<0.000000e+00> : vector<24xf32>
    %46 = vector.multi_reduction <add>, %45, %cst_38 [1] : vector<24x24xf32> to vector<24xf32>
    %47 = vector.shape_cast %46 : vector<24xf32> to vector<24x1xf32>
    %cst_39 = arith.constant dense<0.000000e+00> : vector<24x8xf32>
    %48 = tpu.matmul %45, %39, %cst_39 {dimension_numbers = #tpu.dot_dimension_numbers<[1], [0], [0], [1], [0, 0, 1, 1], [], []>} : vector<24x24xf32>, vector<24x8xf32>, vector<24x8xf32> -> vector<24x8xf32>
    %49 = tpu.reciprocal %47 {approx = true} : vector<24x1xf32> -> vector<24x1xf32>
    %50 = vector.broadcast %49 : vector<24x1xf32> to vector<24x8xf32>
    %51 = arith.mulf %48, %50 : vector<24x8xf32>
    %52 = vector.extract_strided_slice %51 {offsets = [0, 0], sizes = [16, 8], strides = [1, 1]} : vector<24x8xf32> to vector<16x8xf32>
    %c8_40 = arith.constant 8 : index
    %c0_41 = arith.constant 0 : index
    %53 = vector.load %arg6[%c8_40, %c0_41] : memref<32x32xf32, #tpu.memory_space<vmem>>, vector<8x32xf32>
    %cst_42 = arith.constant dense<0.000000e+00> : vector<16x32xf32>
    %54 = tpu.matmul %52, %53, %cst_42 {dimension_numbers = #tpu.dot_dimension_numbers<[1], [0], [0], [1], [0, 0, 1, 1], [], []>} : vector<16x8xf32>, vector<8x32xf32>, vector<16x32xf32> -> vector<16x32xf32>
    %55 = vector.extract_strided_slice %51 {offsets = [16, 0], sizes = [8, 8], strides = [1, 1]} : vector<24x8xf32> to vector<8x8xf32>
    %c8_43 = arith.constant 8 : index
    %c0_44 = arith.constant 0 : index
    %56 = vector.load %arg8[%c8_43, %c0_44] : memref<32x32xf32, #tpu.memory_space<vmem>>, vector<8x32xf32>
    %cst_45 = arith.constant dense<0.000000e+00> : vector<8x32xf32>
    %57 = tpu.matmul %55, %56, %cst_45 {dimension_numbers = #tpu.dot_dimension_numbers<[1], [0], [0], [1], [0, 0, 1, 1], [], []>} : vector<8x8xf32>, vector<8x32xf32>, vector<8x32xf32> -> vector<8x32xf32>
    %c0_46 = arith.constant 0 : index
    %c0_47 = arith.constant 0 : index
    %58 = vector.load %arg16[%c0_46, %c0_47] : memref<16x32xf32, #tpu.memory_space<vmem>>, vector<16x32xf32>
    %59 = arith.addf %58, %54 : vector<16x32xf32>
    %c0_48 = arith.constant 0 : index
    %c0_49 = arith.constant 0 : index
    %60 = vector.load %arg16[%c0_48, %c0_49] : memref<16x32xf32, #tpu.memory_space<vmem>>, vector<16x32xf32>
    tpu.vector_store %arg16[%c0_48, %c0_49], %59 {strides = array<i32>} : memref<16x32xf32, #tpu.memory_space<vmem>>, vector<16x32xf32>,
    %c0_50 = arith.constant 0 : index
    %c0_51 = arith.constant 0 : index
    %61 = vector.load %arg17[%c0_50, %c0_51] : memref<8x32xf32, #tpu.memory_space<vmem>>, vector<8x32xf32>
    %62 = arith.addf %61, %57 : vector<8x32xf32>
    %c0_52 = arith.constant 0 : index
    %c0_53 = arith.constant 0 : index
    %63 = vector.load %arg17[%c0_52, %c0_53] : memref<8x32xf32, #tpu.memory_space<vmem>>, vector<8x32xf32>
    tpu.vector_store %arg17[%c0_52, %c0_53], %62 {strides = array<i32>} : memref<8x32xf32, #tpu.memory_space<vmem>>, vector<8x32xf32>,
    %c0_54 = arith.constant 0 : index
    %c16_55 = arith.constant 16 : index
    %64 = vector.load %arg15[%c0_54, %c16_55] : memref<24x96xf32, #tpu.memory_space<vmem>>, vector<24x8xf32>
    %cst_56 = arith.constant 0.353553385 : f32
    %65 = vector.broadcast %cst_56 : f32 to vector<24x8xf32>
    %66 = arith.mulf %64, %65 : vector<24x8xf32>
    %c0_57 = arith.constant 0 : index
    %c48 = arith.constant 48 : index
    %67 = vector.load %arg15[%c0_57, %c48] : memref<24x96xf32, #tpu.memory_space<vmem>>, vector<24x8xf32>
    %c0_58 = arith.constant 0 : index
    %c80 = arith.constant 80 : index
    %68 = vector.load %arg15[%c0_58, %c80] : memref<24x96xf32, #tpu.memory_space<vmem>>, vector<24x8xf32>
    %cst_59 = arith.constant dense<0.000000e+00> : vector<24x24xf32>
    %69 = tpu.matmul %66, %67, %cst_59 {dimension_numbers = #tpu.dot_dimension_numbers<[1], [1], [0], [0], [0, 0, 1, 0], [], []>} : vector<24x8xf32>, vector<24x8xf32>, vector<24x24xf32> -> vector<24x24xf32>
    %cst_60 = arith.constant dense<0xFF800000> : vector<24xf32>
    %70 = vector.multi_reduction <maximumf>, %69, %cst_60 [1] : vector<24x24xf32> to vector<24xf32>
    %71 = vector.shape_cast %70 : vector<24xf32> to vector<24x1xf32>
    %72 = vector.broadcast %71 : vector<24x1xf32> to vector<24x24xf32>
    %73 = arith.subf %69, %72 : vector<24x24xf32>
    %74 = math.exp %73 : vector<24x24xf32>
    %cst_61 = arith.constant dense<0.000000e+00> : vector<24xf32>
    %75 = vector.multi_reduction <add>, %74, %cst_61 [1] : vector<24x24xf32> to vector<24xf32>
    %76 = vector.shape_cast %75 : vector<24xf32> to vector<24x1xf32>
    %cst_62 = arith.constant dense<0.000000e+00> : vector<24x8xf32>
    %77 = tpu.matmul %74, %68, %cst_62 {dimension_numbers = #tpu.dot_dimension_numbers<[1], [0], [0], [1], [0, 0, 1, 1], [], []>} : vector<24x24xf32>, vector<24x8xf32>, vector<24x8xf32> -> vector<24x8xf32>
    %78 = tpu.reciprocal %76 {approx = true} : vector<24x1xf32> -> vector<24x1xf32>
    %79 = vector.broadcast %78 : vector<24x1xf32> to vector<24x8xf32>
    %80 = arith.mulf %77, %79 : vector<24x8xf32>
    %81 = vector.extract_strided_slice %80 {offsets = [0, 0], sizes = [16, 8], strides = [1, 1]} : vector<24x8xf32> to vector<16x8xf32>
    %c16_63 = arith.constant 16 : index
    %c0_64 = arith.constant 0 : index
    %82 = vector.load %arg6[%c16_63, %c0_64] : memref<32x32xf32, #tpu.memory_space<vmem>>, vector<8x32xf32>
    %cst_65 = arith.constant dense<0.000000e+00> : vector<16x32xf32>
    %83 = tpu.matmul %81, %82, %cst_65 {dimension_numbers = #tpu.dot_dimension_numbers<[1], [0], [0], [1], [0, 0, 1, 1], [], []>} : vector<16x8xf32>, vector<8x32xf32>, vector<16x32xf32> -> vector<16x32xf32>
    %84 = vector.extract_strided_slice %80 {offsets = [16, 0], sizes = [8, 8], strides = [1, 1]} : vector<24x8xf32> to vector<8x8xf32>
    %c16_66 = arith.constant 16 : index
    %c0_67 = arith.constant 0 : index
    %85 = vector.load %arg8[%c16_66, %c0_67] : memref<32x32xf32, #tpu.memory_space<vmem>>, vector<8x32xf32>
    %cst_68 = arith.constant dense<0.000000e+00> : vector<8x32xf32>
    %86 = tpu.matmul %84, %85, %cst_68 {dimension_numbers = #tpu.dot_dimension_numbers<[1], [0], [0], [1], [0, 0, 1, 1], [], []>} : vector<8x8xf32>, vector<8x32xf32>, vector<8x32xf32> -> vector<8x32xf32>
    %c0_69 = arith.constant 0 : index
    %c0_70 = arith.constant 0 : index
    %87 = vector.load %arg16[%c0_69, %c0_70] : memref<16x32xf32, #tpu.memory_space<vmem>>, vector<16x32xf32>
    %88 = arith.addf %87, %83 : vector<16x32xf32>
    %c0_71 = arith.constant 0 : index
    %c0_72 = arith.constant 0 : index
    %89 = vector.load %arg16[%c0_71, %c0_72] : memref<16x32xf32, #tpu.memory_space<vmem>>, vector<16x32xf32>
    tpu.vector_store %arg16[%c0_71, %c0_72], %88 {strides = array<i32>} : memref<16x32xf32, #tpu.memory_space<vmem>>, vector<16x32xf32>,
    %c0_73 = arith.constant 0 : index
    %c0_74 = arith.constant 0 : index
    %90 = vector.load %arg17[%c0_73, %c0_74] : memref<8x32xf32, #tpu.memory_space<vmem>>, vector<8x32xf32>
    %91 = arith.addf %90, %86 : vector<8x32xf32>
    %c0_75 = arith.constant 0 : index
    %c0_76 = arith.constant 0 : index
    %92 = vector.load %arg17[%c0_75, %c0_76] : memref<8x32xf32, #tpu.memory_space<vmem>>, vector<8x32xf32>
    tpu.vector_store %arg17[%c0_75, %c0_76], %91 {strides = array<i32>} : memref<8x32xf32, #tpu.memory_space<vmem>>, vector<8x32xf32>,
    %c0_77 = arith.constant 0 : index
    %c24 = arith.constant 24 : index
    %93 = vector.load %arg15[%c0_77, %c24] : memref<24x96xf32, #tpu.memory_space<vmem>>, vector<24x8xf32>
    %cst_78 = arith.constant 0.353553385 : f32
    %94 = vector.broadcast %cst_78 : f32 to vector<24x8xf32>
    %95 = arith.mulf %93, %94 : vector<24x8xf32>
    %c0_79 = arith.constant 0 : index
    %c56 = arith.constant 56 : index
    %96 = vector.load %arg15[%c0_79, %c56] : memref<24x96xf32, #tpu.memory_space<vmem>>, vector<24x8xf32>
    %c0_80 = arith.constant 0 : index
    %c88 = arith.constant 88 : index
    %97 = vector.load %arg15[%c0_80, %c88] : memref<24x96xf32, #tpu.memory_space<vmem>>, vector<24x8xf32>
    %cst_81 = arith.constant dense<0.000000e+00> : vector<24x24xf32>
    %98 = tpu.matmul %95, %96, %cst_81 {dimension_numbers = #tpu.dot_dimension_numbers<[1], [1], [0], [0], [0, 0, 1, 0], [], []>} : vector<24x8xf32>, vector<24x8xf32>, vector<24x24xf32> -> vector<24x24xf32>
    %cst_82 = arith.constant dense<0xFF800000> : vector<24xf32>
    %99 = vector.multi_reduction <maximumf>, %98, %cst_82 [1] : vector<24x24xf32> to vector<24xf32>
    %100 = vector.shape_cast %99 : vector<24xf32> to vector<24x1xf32>
    %101 = vector.broadcast %100 : vector<24x1xf32> to vector<24x24xf32>
    %102 = arith.subf %98, %101 : vector<24x24xf32>
    %103 = math.exp %102 : vector<24x24xf32>
    %cst_83 = arith.constant dense<0.000000e+00> : vector<24xf32>
    %104 = vector.multi_reduction <add>, %103, %cst_83 [1] : vector<24x24xf32> to vector<24xf32>
    %105 = vector.shape_cast %104 : vector<24xf32> to vector<24x1xf32>
    %cst_84 = arith.constant dense<0.000000e+00> : vector<24x8xf32>
    %106 = tpu.matmul %103, %97, %cst_84 {dimension_numbers = #tpu.dot_dimension_numbers<[1], [0], [0], [1], [0, 0, 1, 1], [], []>} : vector<24x24xf32>, vector<24x8xf32>, vector<24x8xf32> -> vector<24x8xf32>
    %107 = tpu.reciprocal %105 {approx = true} : vector<24x1xf32> -> vector<24x1xf32>
    %108 = vector.broadcast %107 : vector<24x1xf32> to vector<24x8xf32>
    %109 = arith.mulf %106, %108 : vector<24x8xf32>
    %110 = vector.extract_strided_slice %109 {offsets = [0, 0], sizes = [16, 8], strides = [1, 1]} : vector<24x8xf32> to vector<16x8xf32>
    %c24_85 = arith.constant 24 : index
    %c0_86 = arith.constant 0 : index
    %111 = vector.load %arg6[%c24_85, %c0_86] : memref<32x32xf32, #tpu.memory_space<vmem>>, vector<8x32xf32>
    %cst_87 = arith.constant dense<0.000000e+00> : vector<16x32xf32>
    %112 = tpu.matmul %110, %111, %cst_87 {dimension_numbers = #tpu.dot_dimension_numbers<[1], [0], [0], [1], [0, 0, 1, 1], [], []>} : vector<16x8xf32>, vector<8x32xf32>, vector<16x32xf32> -> vector<16x32xf32>
    %113 = vector.extract_strided_slice %109 {offsets = [16, 0], sizes = [8, 8], strides = [1, 1]} : vector<24x8xf32> to vector<8x8xf32>
    %c24_88 = arith.constant 24 : index
    %c0_89 = arith.constant 0 : index
    %114 = vector.load %arg8[%c24_88, %c0_89] : memref<32x32xf32, #tpu.memory_space<vmem>>, vector<8x32xf32>
    %cst_90 = arith.constant dense<0.000000e+00> : vector<8x32xf32>
    %115 = tpu.matmul %113, %114, %cst_90 {dimension_numbers = #tpu.dot_dimension_numbers<[1], [0], [0], [1], [0, 0, 1, 1], [], []>} : vector<8x8xf32>, vector<8x32xf32>, vector<8x32xf32> -> vector<8x32xf32>
    %c0_91 = arith.constant 0 : index
    %c0_92 = arith.constant 0 : index
    %116 = vector.load %arg16[%c0_91, %c0_92] : memref<16x32xf32, #tpu.memory_space<vmem>>, vector<16x32xf32>
    %117 = arith.addf %116, %112 : vector<16x32xf32>
    %c0_93 = arith.constant 0 : index
    %c0_94 = arith.constant 0 : index
    %118 = vector.load %arg16[%c0_93, %c0_94] : memref<16x32xf32, #tpu.memory_space<vmem>>, vector<16x32xf32>
    tpu.vector_store %arg16[%c0_93, %c0_94], %117 {strides = array<i32>} : memref<16x32xf32, #tpu.memory_space<vmem>>, vector<16x32xf32>,
    %c0_95 = arith.constant 0 : index
    %c0_96 = arith.constant 0 : index
    %119 = vector.load %arg17[%c0_95, %c0_96] : memref<8x32xf32, #tpu.memory_space<vmem>>, vector<8x32xf32>
    %120 = arith.addf %119, %115 : vector<8x32xf32>
    %c0_97 = arith.constant 0 : index
    %c0_98 = arith.constant 0 : index
    %121 = vector.load %arg17[%c0_97, %c0_98] : memref<8x32xf32, #tpu.memory_space<vmem>>, vector<8x32xf32>
    tpu.vector_store %arg17[%c0_97, %c0_98], %120 {strides = array<i32>} : memref<8x32xf32, #tpu.memory_space<vmem>>, vector<8x32xf32>,
    %c0_99 = arith.constant 0 : index
    %c0_100 = arith.constant 0 : index
    %122 = vector.load %arg16[%c0_99, %c0_100] : memref<16x32xf32, #tpu.memory_space<vmem>>, vector<16x32xf32>
    %c0_101 = arith.constant 0 : index
    %c0_102 = arith.constant 0 : index
    %123 = vector.load %arg7[%c0_101, %c0_102] : memref<1x32xf32, #tpu.memory_space<vmem>>, vector<1x32xf32>
    %124 = vector.broadcast %123 : vector<1x32xf32> to vector<16x32xf32>
    %125 = arith.addf %122, %124 : vector<16x32xf32>
    %c0_103 = arith.constant 0 : index
    %c0_104 = arith.constant 0 : index
    %c0_105 = arith.constant 0 : index
    %126 = vector.load %arg12[%c0_103, %c0_104, %c0_105] : memref<1x16x32xf32, #tpu.memory_space<vmem>>, vector<1x16x32xf32>
    %127 = vector.shape_cast %126 : vector<1x16x32xf32> to vector<16x32xf32>
    %128 = vector.shape_cast %125 : vector<16x32xf32> to vector<1x16x32xf32>
    tpu.vector_store %arg12[%c0_103, %c0_104, %c0_105], %128 {strides = array<i32>} : memref<1x16x32xf32, #tpu.memory_space<vmem>>, vector<1x16x32xf32>,
    %c0_106 = arith.constant 0 : index
    %c0_107 = arith.constant 0 : index
    %129 = vector.load %arg17[%c0_106, %c0_107] : memref<8x32xf32, #tpu.memory_space<vmem>>, vector<8x32xf32>
    %c0_108 = arith.constant 0 : index
    %c0_109 = arith.constant 0 : index
    %130 = vector.load %arg9[%c0_108, %c0_109] : memref<1x32xf32, #tpu.memory_space<vmem>>, vector<1x32xf32>
    %131 = vector.broadcast %130 : vector<1x32xf32> to vector<8x32xf32>
    %132 = arith.addf %129, %131 : vector<8x32xf32>
    %c0_110 = arith.constant 0 : index
    %c0_111 = arith.constant 0 : index
    %c0_112 = arith.constant 0 : index
    %133 = vector.load %arg13[%c0_110, %c0_111, %c0_112] : memref<1x8x32xf32, #tpu.memory_space<vmem>>, vector<1x8x32xf32>
    %134 = vector.shape_cast %133 : vector<1x8x32xf32> to vector<8x32xf32>
    %135 = vector.shape_cast %132 : vector<8x32xf32> to vector<1x8x32xf32>
    tpu.vector_store %arg13[%c0_110, %c0_111, %c0_112], %135 {strides = array<i32>} : memref<1x8x32xf32, #tpu.memory_space<vmem>>, vector<1x8x32xf32>,
    %c0_113 = arith.constant 0 : index
    %c0_114 = arith.constant 0 : index
    %c0_115 = arith.constant 0 : index
    %136 = vector.load %arg3[%c0_113, %c0_114, %c0_115] : memref<1x16x32xf32, #tpu.memory_space<vmem>>, vector<1x16x32xf32>
    %137 = vector.shape_cast %136 : vector<1x16x32xf32> to vector<16x32xf32>
    %c0_116 = arith.constant 0 : index
    %c0_117 = arith.constant 0 : index
    %138 = vector.load %arg10[%c0_116, %c0_117] : memref<32x32xf32, #tpu.memory_space<vmem>>, vector<32x32xf32>
    %cst_118 = arith.constant dense<0.000000e+00> : vector<16x32xf32>
    %139 = tpu.matmul %137, %138, %cst_118 {dimension_numbers = #tpu.dot_dimension_numbers<[1], [0], [0], [1], [0, 0, 1, 1], [], []>} : vector<16x32xf32>, vector<32x32xf32>, vector<16x32xf32> -> vector<16x32xf32>
    %c0_119 = arith.constant 0 : index
    %c0_120 = arith.constant 0 : index
    %140 = vector.load %arg11[%c0_119, %c0_120] : memref<1x32xf32, #tpu.memory_space<vmem>>, vector<1x32xf32>
    %141 = vector.broadcast %140 : vector<1x32xf32> to vector<16x32xf32>
    %142 = arith.addf %139, %141 : vector<16x32xf32>
    %c0_121 = arith.constant 0 : index
    %c0_122 = arith.constant 0 : index
    %c0_123 = arith.constant 0 : index
    %143 = vector.load %arg14[%c0_121, %c0_122, %c0_123] : memref<1x16x32xf32, #tpu.memory_space<vmem>>, vector<1x16x32xf32>
    %144 = vector.shape_cast %143 : vector<1x16x32xf32> to vector<16x32xf32>
    %145 = vector.shape_cast %142 : vector<16x32xf32> to vector<1x16x32xf32>
    tpu.vector_store %arg14[%c0_121, %c0_122, %c0_123], %145 {strides = array<i32>} : memref<1x16x32xf32, #tpu.memory_space<vmem>>, vector<1x16x32xf32>,
    return
  }
  func.func @transform_0(%arg0: i32) -> (i32, i32, i32) {
    %c0_i32 = arith.constant 0 : i32
    %c0_i32_0 = arith.constant 0 : i32
    %c0_i32_1 = arith.constant 0 : i32
    return %arg0, %c0_i32, %c0_i32_0 : i32, i32, i32
  }
  func.func @transform_1(%arg0: i32) -> (i32, i32, i32) {
    %c0_i32 = arith.constant 0 : i32
    %c0_i32_0 = arith.constant 0 : i32
    %c0_i32_1 = arith.constant 0 : i32
    return %arg0, %c0_i32, %c0_i32_0 : i32, i32, i32
  }
  func.func @transform_2(%arg0: i32) -> (i32, i32, i32) {
    %c0_i32 = arith.constant 0 : i32
    %c0_i32_0 = arith.constant 0 : i32
    %c0_i32_1 = arith.constant 0 : i32
    return %arg0, %c0_i32, %c0_i32_0 : i32, i32, i32
  }
  func.func @transform_3(%arg0: i32) -> (i32, i32) {
    %c0_i32 = arith.constant 0 : i32
    %c0_i32_0 = arith.constant 0 : i32
    %c0_i32_1 = arith.constant 0 : i32
    return %c0_i32, %c0_i32_0 : i32, i32
  }
  func.func @transform_4(%arg0: i32) -> (i32, i32) {
    %c0_i32 = arith.constant 0 : i32
    %c0_i32_0 = arith.constant 0 : i32
    %c0_i32_1 = arith.constant 0 : i32
    return %c0_i32, %c0_i32_0 : i32, i32
  }
  func.func @transform_5(%arg0: i32) -> (i32, i32) {
    %c0_i32 = arith.constant 0 : i32
    %c0_i32_0 = arith.constant 0 : i32
    %c0_i32_1 = arith.constant 0 : i32
    return %c0_i32, %c0_i32_0 : i32, i32
  }
  func.func @transform_6(%arg0: i32) -> (i32, i32) {
    %c0_i32 = arith.constant 0 : i32
    %c0_i32_0 = arith.constant 0 : i32
    %c0_i32_1 = arith.constant 0 : i32
    return %c0_i32, %c0_i32_0 : i32, i32
  }
  func.func @transform_7(%arg0: i32) -> (i32, i32) {
    %c0_i32 = arith.constant 0 : i32
    %c0_i32_0 = arith.constant 0 : i32
    %c0_i32_1 = arith.constant 0 : i32
    return %c0_i32, %c0_i32_0 : i32, i32
  }
  func.func @transform_8(%arg0: i32) -> (i32, i32) {
    %c0_i32 = arith.constant 0 : i32
    %c0_i32_0 = arith.constant 0 : i32
    %c0_i32_1 = arith.constant 0 : i32
    return %c0_i32, %c0_i32_0 : i32, i32
  }
  func.func @transform_9(%arg0: i32) -> (i32, i32) {
    %c0_i32 = arith.constant 0 : i32
    %c0_i32_0 = arith.constant 0 : i32
    %c0_i32_1 = arith.constant 0 : i32
    return %c0_i32, %c0_i32_0 : i32, i32
  }
  func.func @transform_10(%arg0: i32) -> (i32, i32) {
    %c0_i32 = arith.constant 0 : i32
    %c0_i32_0 = arith.constant 0 : i32
    %c0_i32_1 = arith.constant 0 : i32
    return %c0_i32, %c0_i32_0 : i32, i32
  }
  func.func @transform_11(%arg0: i32) -> (i32, i32, i32) {
    %c0_i32 = arith.constant 0 : i32
    %c0_i32_0 = arith.constant 0 : i32
    %c0_i32_1 = arith.constant 0 : i32
    return %arg0, %c0_i32, %c0_i32_0 : i32, i32, i32
  }
  func.func @transform_12(%arg0: i32) -> (i32, i32, i32) {
    %c0_i32 = arith.constant 0 : i32
    %c0_i32_0 = arith.constant 0 : i32
    %c0_i32_1 = arith.constant 0 : i32
    return %arg0, %c0_i32, %c0_i32_0 : i32, i32, i32
  }
  func.func @transform_13(%arg0: i32) -> (i32, i32, i32) {
    %c0_i32 = arith.constant 0 : i32
    %c0_i32_0 = arith.constant 0 : i32
    %c0_i32_1 = arith.constant 0 : i32
    return %arg0, %c0_i32, %c0_i32_0 : i32, i32, i32
  }
}

module attributes {stable_mosaic.version = 11 : i64} {
  func.func @_fused_kernel(%arg0: i32, %arg1: memref<1x16x32xf32, #tpu.memory_space<vmem>>, %arg2: memref<1x8x32xf32, #tpu.memory_space<vmem>>, %arg3: memref<1x16x32xf32, #tpu.memory_space<vmem>>, %arg4: memref<32x96xf32, #tpu.memory_space<vmem>>, %arg5: memref<32x96xf32, #tpu.memory_space<vmem>>, %arg6: memref<32x32xf32, #tpu.memory_space<vmem>>, %arg7: memref<1x32xf32, #tpu.memory_space<vmem>>, %arg8: memref<32x32xf32, #tpu.memory_space<vmem>>, %arg9: memref<1x32xf32, #tpu.memory_space<vmem>>, %arg10: memref<32x32xf32, #tpu.memory_space<vmem>>, %arg11: memref<1x32xf32, #tpu.memory_space<vmem>>, %arg12: memref<1x16x32xf32, #tpu.memory_space<vmem>>, %arg13: memref<1x8x32xf32, #tpu.memory_space<vmem>>, %arg14: memref<1x16x32xf32, #tpu.memory_space<vmem>>, %arg15: memref<24x96xf32, #tpu.memory_space<vmem>>, %arg16: memref<16x32xf32, #tpu.memory_space<vmem>>, %arg17: memref<8x32xf32, #tpu.memory_space<vmem>>) attributes {dimension_semantics = [#tpu.dimension_semantics<parallel>], iteration_bounds = array<i64: 2>, scalar_prefetch = 0 : i64, scratch_operands = 3 : i64, tpu.core_type = #tpu.core_type<tc>, window_params = [{transform_indices = @transform_0, window_bounds = array<i64: 1, 16, 32>}, {transform_indices = @transform_1, window_bounds = array<i64: 1, 8, 32>}, {transform_indices = @transform_2, window_bounds = array<i64: 1, 16, 32>}, {pipeline_mode = #tpu.pipeline_mode<synchronous>, transform_indices = @transform_3, window_bounds = array<i64: 32, 96>}, {pipeline_mode = #tpu.pipeline_mode<synchronous>, transform_indices = @transform_4, window_bounds = array<i64: 32, 96>}, {pipeline_mode = #tpu.pipeline_mode<synchronous>, transform_indices = @transform_5, window_bounds = array<i64: 32, 32>}, {pipeline_mode = #tpu.pipeline_mode<synchronous>, transform_indices = @transform_6, window_bounds = array<i64: 1, 32>}, {pipeline_mode = #tpu.pipeline_mode<synchronous>, transform_indices = @transform_7, window_bounds = array<i64: 32, 32>}, {pipeline_mode = #tpu.pipeline_mode<synchronous>, transform_indices = @transform_8, window_bounds = array<i64: 1, 32>}, {pipeline_mode = #tpu.pipeline_mode<synchronous>, transform_indices = @transform_9, window_bounds = array<i64: 32, 32>}, {pipeline_mode = #tpu.pipeline_mode<synchronous>, transform_indices = @transform_10, window_bounds = array<i64: 1, 32>}, {transform_indices = @transform_11, window_bounds = array<i64: 1, 16, 32>}, {transform_indices = @transform_12, window_bounds = array<i64: 1, 8, 32>}, {transform_indices = @transform_13, window_bounds = array<i64: 1, 16, 32>}]} {
    %c0 = arith.constant 0 : index
    %c0_0 = arith.constant 0 : index
    %c0_1 = arith.constant 0 : index
    %0 = vector.load %arg1[%c0, %c0_0, %c0_1] : memref<1x16x32xf32, #tpu.memory_space<vmem>>, vector<1x16x32xf32>
    %1 = vector.shape_cast %0 : vector<1x16x32xf32> to vector<16x32xf32>
    %c0_2 = arith.constant 0 : index
    %c0_3 = arith.constant 0 : index
    %2 = vector.load %arg4[%c0_2, %c0_3] : memref<32x96xf32, #tpu.memory_space<vmem>>, vector<32x96xf32>
    %cst = arith.constant dense<0.000000e+00> : vector<16x96xf32>
    %3 = tpu.matmul %1, %2, %cst {dimension_numbers = #tpu.dot_dimension_numbers<[1], [0], [0], [1], [0, 0, 1, 1], [], []>} : vector<16x32xf32>, vector<32x96xf32>, vector<16x96xf32> -> vector<16x96xf32>
    %c0_4 = arith.constant 0 : index
    %c0_5 = arith.constant 0 : index
    %4 = vector.load %arg15[%c0_4, %c0_5] : memref<24x96xf32, #tpu.memory_space<vmem>>, vector<16x96xf32>
    tpu.vector_store %arg15[%c0_4, %c0_5], %3 {strides = array<i32>} : memref<24x96xf32, #tpu.memory_space<vmem>>, vector<16x96xf32>,
    %c0_6 = arith.constant 0 : index
    %c0_7 = arith.constant 0 : index
    %c0_8 = arith.constant 0 : index
    %5 = vector.load %arg2[%c0_6, %c0_7, %c0_8] : memref<1x8x32xf32, #tpu.memory_space<vmem>>, vector<1x8x32xf32>
    %6 = vector.shape_cast %5 : vector<1x8x32xf32> to vector<8x32xf32>
    %c0_9 = arith.constant 0 : index
    %c0_10 = arith.constant 0 : index
    %7 = vector.load %arg5[%c0_9, %c0_10] : memref<32x96xf32, #tpu.memory_space<vmem>>, vector<32x96xf32>
    %cst_11 = arith.constant dense<0.000000e+00> : vector<8x96xf32>
    %8 = tpu.matmul %6, %7, %cst_11 {dimension_numbers = #tpu.dot_dimension_numbers<[1], [0], [0], [1], [0, 0, 1, 1], [], []>} : vector<8x32xf32>, vector<32x96xf32>, vector<8x96xf32> -> vector<8x96xf32>
    %c16 = arith.constant 16 : index
    %c0_12 = arith.constant 0 : index
    %9 = vector.load %arg15[%c16, %c0_12] : memref<24x96xf32, #tpu.memory_space<vmem>>, vector<8x96xf32>
    tpu.vector_store %arg15[%c16, %c0_12], %8 {strides = array<i32>} : memref<24x96xf32, #tpu.memory_space<vmem>>, vector<8x96xf32>,
    %c0_13 = arith.constant 0 : index
    %c0_14 = arith.constant 0 : index
    %10 = vector.load %arg15[%c0_13, %c0_14] : memref<24x96xf32, #tpu.memory_space<vmem>>, vector<24x8xf32>
    %cst_15 = arith.constant 0.353553385 : f32
    %11 = vector.broadcast %cst_15 : f32 to vector<24x8xf32>
    %12 = arith.mulf %10, %11 : vector<24x8xf32>
    %c0_16 = arith.constant 0 : index
    %c32 = arith.constant 32 : index
    %13 = vector.load %arg15[%c0_16, %c32] : memref<24x96xf32, #tpu.memory_space<vmem>>, vector<24x8xf32>
    %c0_17 = arith.constant 0 : index
    %c64 = arith.constant 64 : index
    %14 = vector.load %arg15[%c0_17, %c64] : memref<24x96xf32, #tpu.memory_space<vmem>>, vector<24x8xf32>
    %cst_18 = arith.constant dense<0.000000e+00> : vector<24x24xf32>
    %15 = tpu.matmul %12, %13, %cst_18 {dimension_numbers = #tpu.dot_dimension_numbers<[1], [1], [0], [0], [0, 0, 1, 0], [], []>} : vector<24x8xf32>, vector<24x8xf32>, vector<24x24xf32> -> vector<24x24xf32>
    %cst_19 = arith.constant dense<0xFF800000> : vector<24xf32>
    %16 = vector.multi_reduction <maximumf>, %15, %cst_19 [1] : vector<24x24xf32> to vector<24xf32>
    %17 = vector.shape_cast %16 : vector<24xf32> to vector<24x1xf32>
    %18 = vector.broadcast %17 : vector<24x1xf32> to vector<24x24xf32>
    %19 = arith.subf %15, %18 : vector<24x24xf32>
    %20 = math.exp %19 : vector<24x24xf32>
    %cst_20 = arith.constant dense<0.000000e+00> : vector<24xf32>
    %21 = vector.multi_reduction <add>, %20, %cst_20 [1] : vector<24x24xf32> to vector<24xf32>
    %22 = vector.shape_cast %21 : vector<24xf32> to vector<24x1xf32>
    %cst_21 = arith.constant dense<0.000000e+00> : vector<24x8xf32>
    %23 = tpu.matmul %20, %14, %cst_21 {dimension_numbers = #tpu.dot_dimension_numbers<[1], [0], [0], [1], [0, 0, 1, 1], [], []>} : vector<24x24xf32>, vector<24x8xf32>, vector<24x8xf32> -> vector<24x8xf32>
    %24 = tpu.reciprocal %22 {approx = true} : vector<24x1xf32> -> vector<24x1xf32>
    %25 = vector.broadcast %24 : vector<24x1xf32> to vector<24x8xf32>
    %26 = arith.mulf %23, %25 : vector<24x8xf32>
    %27 = vector.extract_strided_slice %26 {offsets = [0, 0], sizes = [16, 8], strides = [1, 1]} : vector<24x8xf32> to vector<16x8xf32>
    %c0_22 = arith.constant 0 : index
    %c0_23 = arith.constant 0 : index
    %28 = vector.load %arg6[%c0_22, %c0_23] : memref<32x32xf32, #tpu.memory_space<vmem>>, vector<8x32xf32>
    %cst_24 = arith.constant dense<0.000000e+00> : vector<16x32xf32>
    %29 = tpu.matmul %27, %28, %cst_24 {dimension_numbers = #tpu.dot_dimension_numbers<[1], [0], [0], [1], [0, 0, 1, 1], [], []>} : vector<16x8xf32>, vector<8x32xf32>, vector<16x32xf32> -> vector<16x32xf32>
    %30 = vector.extract_strided_slice %26 {offsets = [16, 0], sizes = [8, 8], strides = [1, 1]} : vector<24x8xf32> to vector<8x8xf32>
    %c0_25 = arith.constant 0 : index
    %c0_26 = arith.constant 0 : index
    %31 = vector.load %arg8[%c0_25, %c0_26] : memref<32x32xf32, #tpu.memory_space<vmem>>, vector<8x32xf32>
    %cst_27 = arith.constant dense<0.000000e+00> : vector<8x32xf32>
    %32 = tpu.matmul %30, %31, %cst_27 {dimension_numbers = #tpu.dot_dimension_numbers<[1], [0], [0], [1], [0, 0, 1, 1], [], []>} : vector<8x8xf32>, vector<8x32xf32>, vector<8x32xf32> -> vector<8x32xf32>
    %c0_28 = arith.constant 0 : index
    %c0_29 = arith.constant 0 : index
    %33 = vector.load %arg16[%c0_28, %c0_29] : memref<16x32xf32, #tpu.memory_space<vmem>>, vector<16x32xf32>
    tpu.vector_store %arg16[%c0_28, %c0_29], %29 {strides = array<i32>} : memref<16x32xf32, #tpu.memory_space<vmem>>, vector<16x32xf32>,
    %c0_30 = arith.constant 0 : index
    %c0_31 = arith.constant 0 : index
    %34 = vector.load %arg17[%c0_30, %c0_31] : memref<8x32xf32, #tpu.memory_space<vmem>>, vector<8x32xf32>
    tpu.vector_store %arg17[%c0_30, %c0_31], %32 {strides = array<i32>} : memref<8x32xf32, #tpu.memory_space<vmem>>, vector<8x32xf32>,
    %c0_32 = arith.constant 0 : index
    %c8 = arith.constant 8 : index
    %35 = vector.load %arg15[%c0_32, %c8] : memref<24x96xf32, #tpu.memory_space<vmem>>, vector<24x8xf32>
    %cst_33 = arith.constant 0.353553385 : f32
    %36 = vector.broadcast %cst_33 : f32 to vector<24x8xf32>
    %37 = arith.mulf %35, %36 : vector<24x8xf32>
    %c0_34 = arith.constant 0 : index
    %c40 = arith.constant 40 : index
    %38 = vector.load %arg15[%c0_34, %c40] : memref<24x96xf32, #tpu.memory_space<vmem>>, vector<24x8xf32>
    %c0_35 = arith.constant 0 : index
    %c72 = arith.constant 72 : index
    %39 = vector.load %arg15[%c0_35, %c72] : memref<24x96xf32, #tpu.memory_space<vmem>>, vector<24x8xf32>
    %cst_36 = arith.constant dense<0.000000e+00> : vector<24x24xf32>
    %40 = tpu.matmul %37, %38, %cst_36 {dimension_numbers = #tpu.dot_dimension_numbers<[1], [1], [0], [0], [0, 0, 1, 0], [], []>} : vector<24x8xf32>, vector<24x8xf32>, vector<24x24xf32> -> vector<24x24xf32>
    %cst_37 = arith.constant dense<0xFF800000> : vector<24xf32>
    %41 = vector.multi_reduction <maximumf>, %40, %cst_37 [1] : vector<24x24xf32> to vector<24xf32>
    %42 = vector.shape_cast %41 : vector<24xf32> to vector<24x1xf32>
    %43 = vector.broadcast %42 : vector<24x1xf32> to vector<24x24xf32>
    %44 = arith.subf %40, %43 : vector<24x24xf32>
    %45 = math.exp %44 : vector<24x24xf32>
    %cst_38 = arith.constant dense<0.000000e+00> : vector<24xf32>
    %46 = vector.multi_reduction <add>, %45, %cst_38 [1] : vector<24x24xf32> to vector<24xf32>
    %47 = vector.shape_cast %46 : vector<24xf32> to vector<24x1xf32>
    %cst_39 = arith.constant dense<0.000000e+00> : vector<24x8xf32>
    %48 = tpu.matmul %45, %39, %cst_39 {dimension_numbers = #tpu.dot_dimension_numbers<[1], [0], [0], [1], [0, 0, 1, 1], [], []>} : vector<24x24xf32>, vector<24x8xf32>, vector<24x8xf32> -> vector<24x8xf32>
    %49 = tpu.reciprocal %47 {approx = true} : vector<24x1xf32> -> vector<24x1xf32>
    %50 = vector.broadcast %49 : vector<24x1xf32> to vector<24x8xf32>
    %51 = arith.mulf %48, %50 : vector<24x8xf32>
    %52 = vector.extract_strided_slice %51 {offsets = [0, 0], sizes = [16, 8], strides = [1, 1]} : vector<24x8xf32> to vector<16x8xf32>
    %c8_40 = arith.constant 8 : index
    %c0_41 = arith.constant 0 : index
    %53 = vector.load %arg6[%c8_40, %c0_41] : memref<32x32xf32, #tpu.memory_space<vmem>>, vector<8x32xf32>
    %cst_42 = arith.constant dense<0.000000e+00> : vector<16x32xf32>
    %54 = tpu.matmul %52, %53, %cst_42 {dimension_numbers = #tpu.dot_dimension_numbers<[1], [0], [0], [1], [0, 0, 1, 1], [], []>} : vector<16x8xf32>, vector<8x32xf32>, vector<16x32xf32> -> vector<16x32xf32>
    %55 = vector.extract_strided_slice %51 {offsets = [16, 0], sizes = [8, 8], strides = [1, 1]} : vector<24x8xf32> to vector<8x8xf32>
    %c8_43 = arith.constant 8 : index
    %c0_44 = arith.constant 0 : index
    %56 = vector.load %arg8[%c8_43, %c0_44] : memref<32x32xf32, #tpu.memory_space<vmem>>, vector<8x32xf32>
    %cst_45 = arith.constant dense<0.000000e+00> : vector<8x32xf32>
    %57 = tpu.matmul %55, %56, %cst_45 {dimension_numbers = #tpu.dot_dimension_numbers<[1], [0], [0], [1], [0, 0, 1, 1], [], []>} : vector<8x8xf32>, vector<8x32xf32>, vector<8x32xf32> -> vector<8x32xf32>
    %c0_46 = arith.constant 0 : index
    %c0_47 = arith.constant 0 : index
    %58 = vector.load %arg16[%c0_46, %c0_47] : memref<16x32xf32, #tpu.memory_space<vmem>>, vector<16x32xf32>
    %59 = arith.addf %58, %54 : vector<16x32xf32>
    %c0_48 = arith.constant 0 : index
    %c0_49 = arith.constant 0 : index
    %60 = vector.load %arg16[%c0_48, %c0_49] : memref<16x32xf32, #tpu.memory_space<vmem>>, vector<16x32xf32>
    tpu.vector_store %arg16[%c0_48, %c0_49], %59 {strides = array<i32>} : memref<16x32xf32, #tpu.memory_space<vmem>>, vector<16x32xf32>,
    %c0_50 = arith.constant 0 : index
    %c0_51 = arith.constant 0 : index
    %61 = vector.load %arg17[%c0_50, %c0_51] : memref<8x32xf32, #tpu.memory_space<vmem>>, vector<8x32xf32>
    %62 = arith.addf %61, %57 : vector<8x32xf32>
    %c0_52 = arith.constant 0 : index
    %c0_53 = arith.constant 0 : index
    %63 = vector.load %arg17[%c0_52, %c0_53] : memref<8x32xf32, #tpu.memory_space<vmem>>, vector<8x32xf32>
    tpu.vector_store %arg17[%c0_52, %c0_53], %62 {strides = array<i32>} : memref<8x32xf32, #tpu.memory_space<vmem>>, vector<8x32xf32>,
    %c0_54 = arith.constant 0 : index
    %c16_55 = arith.constant 16 : index
    %64 = vector.load %arg15[%c0_54, %c16_55] : memref<24x96xf32, #tpu.memory_space<vmem>>, vector<24x8xf32>
    %cst_56 = arith.constant 0.353553385 : f32
    %65 = vector.broadcast %cst_56 : f32 to vector<24x8xf32>
    %66 = arith.mulf %64, %65 : vector<24x8xf32>
    %c0_57 = arith.constant 0 : index
    %c48 = arith.constant 48 : index
    %67 = vector.load %arg15[%c0_57, %c48] : memref<24x96xf32, #tpu.memory_space<vmem>>, vector<24x8xf32>
    %c0_58 = arith.constant 0 : index
    %c80 = arith.constant 80 : index
    %68 = vector.load %arg15[%c0_58, %c80] : memref<24x96xf32, #tpu.memory_space<vmem>>, vector<24x8xf32>
    %cst_59 = arith.constant dense<0.000000e+00> : vector<24x24xf32>
    %69 = tpu.matmul %66, %67, %cst_59 {dimension_numbers = #tpu.dot_dimension_numbers<[1], [1], [0], [0], [0, 0, 1, 0], [], []>} : vector<24x8xf32>, vector<24x8xf32>, vector<24x24xf32> -> vector<24x24xf32>
    %cst_60 = arith.constant dense<0xFF800000> : vector<24xf32>
    %70 = vector.multi_reduction <maximumf>, %69, %cst_60 [1] : vector<24x24xf32> to vector<24xf32>
    %71 = vector.shape_cast %70 : vector<24xf32> to vector<24x1xf32>
    %72 = vector.broadcast %71 : vector<24x1xf32> to vector<24x24xf32>
    %73 = arith.subf %69, %72 : vector<24x24xf32>
    %74 = math.exp %73 : vector<24x24xf32>
    %cst_61 = arith.constant dense<0.000000e+00> : vector<24xf32>
    %75 = vector.multi_reduction <add>, %74, %cst_61 [1] : vector<24x24xf32> to vector<24xf32>
    %76 = vector.shape_cast %75 : vector<24xf32> to vector<24x1xf32>
    %cst_62 = arith.constant dense<0.000000e+00> : vector<24x8xf32>
    %77 = tpu.matmul %74, %68, %cst_62 {dimension_numbers = #tpu.dot_dimension_numbers<[1], [0], [0], [1], [0, 0, 1, 1], [], []>} : vector<24x24xf32>, vector<24x8xf32>, vector<24x8xf32> -> vector<24x8xf32>
    %78 = tpu.reciprocal %76 {approx = true} : vector<24x1xf32> -> vector<24x1xf32>
    %79 = vector.broadcast %78 : vector<24x1xf32> to vector<24x8xf32>
    %80 = arith.mulf %77, %79 : vector<24x8xf32>
    %81 = vector.extract_strided_slice %80 {offsets = [0, 0], sizes = [16, 8], strides = [1, 1]} : vector<24x8xf32> to vector<16x8xf32>
    %c16_63 = arith.constant 16 : index
    %c0_64 = arith.constant 0 : index
    %82 = vector.load %arg6[%c16_63, %c0_64] : memref<32x32xf32, #tpu.memory_space<vmem>>, vector<8x32xf32>
    %cst_65 = arith.constant dense<0.000000e+00> : vector<16x32xf32>
    %83 = tpu.matmul %81, %82, %cst_65 {dimension_numbers = #tpu.dot_dimension_numbers<[1], [0], [0], [1], [0, 0, 1, 1], [], []>} : vector<16x8xf32>, vector<8x32xf32>, vector<16x32xf32> -> vector<16x32xf32>
    %84 = vector.extract_strided_slice %80 {offsets = [16, 0], sizes = [8, 8], strides = [1, 1]} : vector<24x8xf32> to vector<8x8xf32>
    %c16_66 = arith.constant 16 : index
    %c0_67 = arith.constant 0 : index
    %85 = vector.load %arg8[%c16_66, %c0_67] : memref<32x32xf32, #tpu.memory_space<vmem>>, vector<8x32xf32>
    %cst_68 = arith.constant dense<0.000000e+00> : vector<8x32xf32>
    %86 = tpu.matmul %84, %85, %cst_68 {dimension_numbers = #tpu.dot_dimension_numbers<[1], [0], [0], [1], [0, 0, 1, 1], [], []>} : vector<8x8xf32>, vector<8x32xf32>, vector<8x32xf32> -> vector<8x32xf32>
    %c0_69 = arith.constant 0 : index
    %c0_70 = arith.constant 0 : index
    %87 = vector.load %arg16[%c0_69, %c0_70] : memref<16x32xf32, #tpu.memory_space<vmem>>, vector<16x32xf32>
    %88 = arith.addf %87, %83 : vector<16x32xf32>
    %c0_71 = arith.constant 0 : index
    %c0_72 = arith.constant 0 : index
    %89 = vector.load %arg16[%c0_71, %c0_72] : memref<16x32xf32, #tpu.memory_space<vmem>>, vector<16x32xf32>
    tpu.vector_store %arg16[%c0_71, %c0_72], %88 {strides = array<i32>} : memref<16x32xf32, #tpu.memory_space<vmem>>, vector<16x32xf32>,
    %c0_73 = arith.constant 0 : index
    %c0_74 = arith.constant 0 : index
    %90 = vector.load %arg17[%c0_73, %c0_74] : memref<8x32xf32, #tpu.memory_space<vmem>>, vector<8x32xf32>
    %91 = arith.addf %90, %86 : vector<8x32xf32>
    %c0_75 = arith.constant 0 : index
    %c0_76 = arith.constant 0 : index
    %92 = vector.load %arg17[%c0_75, %c0_76] : memref<8x32xf32, #tpu.memory_space<vmem>>, vector<8x32xf32>
    tpu.vector_store %arg17[%c0_75, %c0_76], %91 {strides = array<i32>} : memref<8x32xf32, #tpu.memory_space<vmem>>, vector<8x32xf32>,
    %c0_77 = arith.constant 0 : index
    %c24 = arith.constant 24 : index
    %93 = vector.load %arg15[%c0_77, %c24] : memref<24x96xf32, #tpu.memory_space<vmem>>, vector<24x8xf32>
    %cst_78 = arith.constant 0.353553385 : f32
    %94 = vector.broadcast %cst_78 : f32 to vector<24x8xf32>
    %95 = arith.mulf %93, %94 : vector<24x8xf32>
    %c0_79 = arith.constant 0 : index
    %c56 = arith.constant 56 : index
    %96 = vector.load %arg15[%c0_79, %c56] : memref<24x96xf32, #tpu.memory_space<vmem>>, vector<24x8xf32>
    %c0_80 = arith.constant 0 : index
    %c88 = arith.constant 88 : index
    %97 = vector.load %arg15[%c0_80, %c88] : memref<24x96xf32, #tpu.memory_space<vmem>>, vector<24x8xf32>
    %cst_81 = arith.constant dense<0.000000e+00> : vector<24x24xf32>
    %98 = tpu.matmul %95, %96, %cst_81 {dimension_numbers = #tpu.dot_dimension_numbers<[1], [1], [0], [0], [0, 0, 1, 0], [], []>} : vector<24x8xf32>, vector<24x8xf32>, vector<24x24xf32> -> vector<24x24xf32>
    %cst_82 = arith.constant dense<0xFF800000> : vector<24xf32>
    %99 = vector.multi_reduction <maximumf>, %98, %cst_82 [1] : vector<24x24xf32> to vector<24xf32>
    %100 = vector.shape_cast %99 : vector<24xf32> to vector<24x1xf32>
    %101 = vector.broadcast %100 : vector<24x1xf32> to vector<24x24xf32>
    %102 = arith.subf %98, %101 : vector<24x24xf32>
    %103 = math.exp %102 : vector<24x24xf32>
    %cst_83 = arith.constant dense<0.000000e+00> : vector<24xf32>
    %104 = vector.multi_reduction <add>, %103, %cst_83 [1] : vector<24x24xf32> to vector<24xf32>
    %105 = vector.shape_cast %104 : vector<24xf32> to vector<24x1xf32>
    %cst_84 = arith.constant dense<0.000000e+00> : vector<24x8xf32>
    %106 = tpu.matmul %103, %97, %cst_84 {dimension_numbers = #tpu.dot_dimension_numbers<[1], [0], [0], [1], [0, 0, 1, 1], [], []>} : vector<24x24xf32>, vector<24x8xf32>, vector<24x8xf32> -> vector<24x8xf32>
    %107 = tpu.reciprocal %105 {approx = true} : vector<24x1xf32> -> vector<24x1xf32>
    %108 = vector.broadcast %107 : vector<24x1xf32> to vector<24x8xf32>
    %109 = arith.mulf %106, %108 : vector<24x8xf32>
    %110 = vector.extract_strided_slice %109 {offsets = [0, 0], sizes = [16, 8], strides = [1, 1]} : vector<24x8xf32> to vector<16x8xf32>
    %c24_85 = arith.constant 24 : index
    %c0_86 = arith.constant 0 : index
    %111 = vector.load %arg6[%c24_85, %c0_86] : memref<32x32xf32, #tpu.memory_space<vmem>>, vector<8x32xf32>
    %cst_87 = arith.constant dense<0.000000e+00> : vector<16x32xf32>
    %112 = tpu.matmul %110, %111, %cst_87 {dimension_numbers = #tpu.dot_dimension_numbers<[1], [0], [0], [1], [0, 0, 1, 1], [], []>} : vector<16x8xf32>, vector<8x32xf32>, vector<16x32xf32> -> vector<16x32xf32>
    %113 = vector.extract_strided_slice %109 {offsets = [16, 0], sizes = [8, 8], strides = [1, 1]} : vector<24x8xf32> to vector<8x8xf32>
    %c24_88 = arith.constant 24 : index
    %c0_89 = arith.constant 0 : index
    %114 = vector.load %arg8[%c24_88, %c0_89] : memref<32x32xf32, #tpu.memory_space<vmem>>, vector<8x32xf32>
    %cst_90 = arith.constant dense<0.000000e+00> : vector<8x32xf32>
    %115 = tpu.matmul %113, %114, %cst_90 {dimension_numbers = #tpu.dot_dimension_numbers<[1], [0], [0], [1], [0, 0, 1, 1], [], []>} : vector<8x8xf32>, vector<8x32xf32>, vector<8x32xf32> -> vector<8x32xf32>
    %c0_91 = arith.constant 0 : index
    %c0_92 = arith.constant 0 : index
    %116 = vector.load %arg16[%c0_91, %c0_92] : memref<16x32xf32, #tpu.memory_space<vmem>>, vector<16x32xf32>
    %117 = arith.addf %116, %112 : vector<16x32xf32>
    %c0_93 = arith.constant 0 : index
    %c0_94 = arith.constant 0 : index
    %118 = vector.load %arg16[%c0_93, %c0_94] : memref<16x32xf32, #tpu.memory_space<vmem>>, vector<16x32xf32>
    tpu.vector_store %arg16[%c0_93, %c0_94], %117 {strides = array<i32>} : memref<16x32xf32, #tpu.memory_space<vmem>>, vector<16x32xf32>,
    %c0_95 = arith.constant 0 : index
    %c0_96 = arith.constant 0 : index
    %119 = vector.load %arg17[%c0_95, %c0_96] : memref<8x32xf32, #tpu.memory_space<vmem>>, vector<8x32xf32>
    %120 = arith.addf %119, %115 : vector<8x32xf32>
    %c0_97 = arith.constant 0 : index
    %c0_98 = arith.constant 0 : index
    %121 = vector.load %arg17[%c0_97, %c0_98] : memref<8x32xf32, #tpu.memory_space<vmem>>, vector<8x32xf32>
    tpu.vector_store %arg17[%c0_97, %c0_98], %120 {strides = array<i32>} : memref<8x32xf32, #tpu.memory_space<vmem>>, vector<8x32xf32>,
    %c0_99 = arith.constant 0 : index
    %c0_100 = arith.constant 0 : index
    %122 = vector.load %arg16[%c0_99, %c0_100] : memref<16x32xf32, #tpu.memory_space<vmem>>, vector<16x32xf32>
    %c0_101 = arith.constant 0 : index
    %c0_102 = arith.constant 0 : index
    %123 = vector.load %arg7[%c0_101, %c0_102] : memref<1x32xf32, #tpu.memory_space<vmem>>, vector<1x32xf32>
    %124 = vector.broadcast %123 : vector<1x32xf32> to vector<16x32xf32>
    %125 = arith.addf %122, %124 : vector<16x32xf32>
    %c0_103 = arith.constant 0 : index
    %c0_104 = arith.constant 0 : index
    %c0_105 = arith.constant 0 : index
    %126 = vector.load %arg12[%c0_103, %c0_104, %c0_105] : memref<1x16x32xf32, #tpu.memory_space<vmem>>, vector<1x16x32xf32>
    %127 = vector.shape_cast %126 : vector<1x16x32xf32> to vector<16x32xf32>
    %128 = vector.shape_cast %125 : vector<16x32xf32> to vector<1x16x32xf32>
    tpu.vector_store %arg12[%c0_103, %c0_104, %c0_105], %128 {strides = array<i32>} : memref<1x16x32xf32, #tpu.memory_space<vmem>>, vector<1x16x32xf32>,
    %c0_106 = arith.constant 0 : index
    %c0_107 = arith.constant 0 : index
    %129 = vector.load %arg17[%c0_106, %c0_107] : memref<8x32xf32, #tpu.memory_space<vmem>>, vector<8x32xf32>
    %c0_108 = arith.constant 0 : index
    %c0_109 = arith.constant 0 : index
    %130 = vector.load %arg9[%c0_108, %c0_109] : memref<1x32xf32, #tpu.memory_space<vmem>>, vector<1x32xf32>
    %131 = vector.broadcast %130 : vector<1x32xf32> to vector<8x32xf32>
    %132 = arith.addf %129, %131 : vector<8x32xf32>
    %c0_110 = arith.constant 0 : index
    %c0_111 = arith.constant 0 : index
    %c0_112 = arith.constant 0 : index
    %133 = vector.load %arg13[%c0_110, %c0_111, %c0_112] : memref<1x8x32xf32, #tpu.memory_space<vmem>>, vector<1x8x32xf32>
    %134 = vector.shape_cast %133 : vector<1x8x32xf32> to vector<8x32xf32>
    %135 = vector.shape_cast %132 : vector<8x32xf32> to vector<1x8x32xf32>
    tpu.vector_store %arg13[%c0_110, %c0_111, %c0_112], %135 {strides = array<i32>} : memref<1x8x32xf32, #tpu.memory_space<vmem>>, vector<1x8x32xf32>,
    %c0_113 = arith.constant 0 : index
    %c0_114 = arith.constant 0 : index
    %c0_115 = arith.constant 0 : index
    %136 = vector.load %arg3[%c0_113, %c0_114, %c0_115] : memref<1x16x32xf32, #tpu.memory_space<vmem>>, vector<1x16x32xf32>
    %137 = vector.shape_cast %136 : vector<1x16x32xf32> to vector<16x32xf32>
    %c0_116 = arith.constant 0 : index
    %c0_117 = arith.constant 0 : index
    %138 = vector.load %arg10[%c0_116, %c0_117] : memref<32x32xf32, #tpu.memory_space<vmem>>, vector<32x32xf32>
    %cst_118 = arith.constant dense<0.000000e+00> : vector<16x32xf32>
    %139 = tpu.matmul %137, %138, %cst_118 {dimension_numbers = #tpu.dot_dimension_numbers<[1], [0], [0], [1], [0, 0, 1, 1], [], []>} : vector<16x32xf32>, vector<32x32xf32>, vector<16x32xf32> -> vector<16x32xf32>
    %c0_119 = arith.constant 0 : index
    %c0_120 = arith.constant 0 : index
    %140 = vector.load %arg11[%c0_119, %c0_120] : memref<1x32xf32, #tpu.memory_space<vmem>>, vector<1x32xf32>
    %141 = vector.broadcast %140 : vector<1x32xf32> to vector<16x32xf32>
    %142 = arith.addf %139, %141 : vector<16x32xf32>
    %c0_121 = arith.constant 0 : index
    %c0_122 = arith.constant 0 : index
    %c0_123 = arith.constant 0 : index
    %143 = vector.load %arg14[%c0_121, %c0_122, %c0_123] : memref<1x16x32xf32, #tpu.memory_space<vmem>>, vector<1x16x32xf32>
    %144 = vector.shape_cast %143 : vector<1x16x32xf32> to vector<16x32xf32>
    %145 = vector.shape_cast %142 : vector<16x32xf32> to vector<1x16x32xf32>
    tpu.vector_store %arg14[%c0_121, %c0_122, %c0_123], %145 {strides = array<i32>} : memref<1x16x32xf32, #tpu.memory_space<vmem>>, vector<1x16x32xf32>,
    return
  }
  func.func @transform_0(%arg0: i32) -> (i32, i32, i32) {
    %c0_i32 = arith.constant 0 : i32
    %c0_i32_0 = arith.constant 0 : i32
    %c0_i32_1 = arith.constant 0 : i32
    return %arg0, %c0_i32, %c0_i32_0 : i32, i32, i32
  }
  func.func @transform_1(%arg0: i32) -> (i32, i32, i32) {
    %c0_i32 = arith.constant 0 : i32
    %c0_i32_0 = arith.constant 0 : i32
    %c0_i32_1 = arith.constant 0 : i32
    return %arg0, %c0_i32, %c0_i32_0 : i32, i32, i32
  }
  func.func @transform_2(%arg0: i32) -> (i32, i32, i32) {
    %c0_i32 = arith.constant 0 : i32
    %c0_i32_0 = arith.constant 0 : i32
    %c0_i32_1 = arith.constant 0 : i32
    return %arg0, %c0_i32, %c0_i32_0 : i32, i32, i32
  }
  func.func @transform_3(%arg0: i32) -> (i32, i32) {
    %c0_i32 = arith.constant 0 : i32
    %c0_i32_0 = arith.constant 0 : i32
    %c0_i32_1 = arith.constant 0 : i32
    return %c0_i32, %c0_i32_0 : i32, i32
  }
  func.func @transform_4(%arg0: i32) -> (i32, i32) {
    %c0_i32 = arith.constant 0 : i32
    %c0_i32_0 = arith.constant 0 : i32
    %c0_i32_1 = arith.constant 0 : i32
    return %c0_i32, %c0_i32_0 : i32, i32
  }
  func.func @transform_5(%arg0: i32) -> (i32, i32) {
    %c0_i32 = arith.constant 0 : i32
    %c0_i32_0 = arith.constant 0 : i32
    %c0_i32_1 = arith.constant 0 : i32
    return %c0_i32, %c0_i32_0 : i32, i32
  }
  func.func @transform_6(%arg0: i32) -> (i32, i32) {
    %c0_i32 = arith.constant 0 : i32
    %c0_i32_0 = arith.constant 0 : i32
    %c0_i32_1 = arith.constant 0 : i32
    return %c0_i32, %c0_i32_0 : i32, i32
  }
  func.func @transform_7(%arg0: i32) -> (i32, i32) {
    %c0_i32 = arith.constant 0 : i32
    %c0_i32_0 = arith.constant 0 : i32
    %c0_i32_1 = arith.constant 0 : i32
    return %c0_i32, %c0_i32_0 : i32, i32
  }
  func.func @transform_8(%arg0: i32) -> (i32, i32) {
    %c0_i32 = arith.constant 0 : i32
    %c0_i32_0 = arith.constant 0 : i32
    %c0_i32_1 = arith.constant 0 : i32
    return %c0_i32, %c0_i32_0 : i32, i32
  }
  func.func @transform_9(%arg0: i32) -> (i32, i32) {
    %c0_i32 = arith.constant 0 : i32
    %c0_i32_0 = arith.constant 0 : i32
    %c0_i32_1 = arith.constant 0 : i32
    return %c0_i32, %c0_i32_0 : i32, i32
  }
  func.func @transform_10(%arg0: i32) -> (i32, i32) {
    %c0_i32 = arith.constant 0 : i32
    %c0_i32_0 = arith.constant 0 : i32
    %c0_i32_1 = arith.constant 0 : i32
    return %c0_i32, %c0_i32_0 : i32, i32
  }
  func.func @transform_11(%arg0: i32) -> (i32, i32, i32) {
    %c0_i32 = arith.constant 0 : i32
    %c0_i32_0 = arith.constant 0 : i32
    %c0_i32_1 = arith.constant 0 : i32
    return %arg0, %c0_i32, %c0_i32_0 : i32, i32, i32
  }
  func.func @transform_12(%arg0: i32) -> (i32, i32, i32) {
    %c0_i32 = arith.constant 0 : i32
    %c0_i32_0 = arith.constant 0 : i32
    %c0_i32_1 = arith.constant 0 : i32
    return %arg0, %c0_i32, %c0_i32_0 : i32, i32, i32
  }
  func.func @transform_13(%arg0: i32) -> (i32, i32, i32) {
    %c0_i32 = arith.constant 0 : i32
    %c0_i32_0 = arith.constant 0 : i32
    %c0_i32_1 = arith.constant 0 : i32
    return %arg0, %c0_i32, %c0_i32_0 : i32, i32, i32
  }
}

</mosaic_0001>

<bundles_post_ra>
// kernel: dual_attention_multires.1
= control target key start
LH: loop header
LB: loop body
LE: loop exit
PB: predicated region body
PF: predicated region fallthrough
CT: control target
= control target key end

     0   :  { %s3908_s0 = inlined_call_operand.vmem [shape: f32[2,16,32], index: 0, kind: input, shape index: {}]   ;;  %s3909_s1 = inlined_call_operand.vmem [shape: f32[2,8,32], index: 1, kind: input, shape index: {}]   ;;  %s3910_s2 = inlined_call_operand.vmem [shape: f32[2,16,32], index: 2, kind: input, shape index: {}]   ;;  %s3911_s3 = inlined_call_operand.vmem [shape: f32[32,96], index: 3, kind: input, shape index: {}]   ;;  %s3912_s4 = inlined_call_operand.vmem [shape: f32[32,96], index: 4, kind: input, shape index: {}]   ;;  %s3913_s5 = inlined_call_operand.vmem [shape: f32[32,32], index: 5, kind: input, shape index: {}]   ;;  %s3914_s6 = inlined_call_operand.vmem [shape: f32[1,32], index: 6, kind: input, shape index: {}]   ;;  %s3915_s7 = inlined_call_operand.vmem [shape: f32[32,32], index: 7, kind: input, shape index: {}]   ;;  %s3916_s8 = inlined_call_operand.vmem [shape: f32[1,32], index: 8, kind: input, shape index: {}]   ;;  %s3917_s9 = inlined_call_operand.vmem [shape: f32[32,32], index: 9, kind: input, shape index: {}]   ;;  %s3918_s10 = inlined_call_operand.hbm [shape: f32[1,32], index: 10, kind: input, shape index: {}]   ;;  %s3919_s11 = inlined_call_operand.hbm [shape: f32[2,16,32], index: 11, kind: output, shape index: {0}]   ;;  %s3920_s12 = inlined_call_operand.hbm [shape: f32[2,8,32], index: 12, kind: output, shape index: {1}]   ;;  %s3921_s13 = inlined_call_operand.hbm [shape: f32[2,16,32], index: 13, kind: output, shape index: {2}]  }
   0x1   :  { %3928 = sst [smem:[#allocation19_spill]] %s3908_s0 }
   0x2   :  { %3929 = sst [smem:[#allocation20_spill]] %s3909_s1 }
   0x3   :  { %3930 = sst [smem:[#allocation21_spill]] %s3910_s2 }
   0x4   :  { %3931 = sst [smem:[#allocation22_spill]] %s3911_s3 }
   0x5   :  { %3932 = sst [smem:[#allocation23_spill]] %s3918_s10 }
   0x6   :  { %19 = vsyncpa [#allocation6], 0 }
   0x7   :  { %20 = vsyncpa [#allocation7], 0 }
   0x8   :  { %22 = vsyncpa [#allocation7 + $0x1], 0 }
   0x9   :  { %23 = vsyncpa [#allocation10], 0 }
   0xa   :  { %25 = vsyncpa [#allocation10 + $0x1], 0  ;;  %s3368_s25 = smov 0   ;;  %s3370_s26 = smov 0  }
   0xb   :  { %s3372_s27 = smov 0   ;;  %s3374_s28 = smov 0  }
   0xc LB: > { %3933 = sst [smem:[#allocation15_spill]] %s3273_s27  ;;  %s3389_s29 = sadd.s32 4294967295, %s3277_s28   ;;  %s3277_s28 = sphi %s3374_s28, %s3951_s28   ;;  %s3273_s27 = sphi %s3372_s27, %s3953_s27   ;;  %s3269_s26 = sphi %s3370_s26, %s3955_s26   ;;  %s3265_s25 = sphi %s3368_s25, %s3954_s25  }
   0xd   : > { %s3922_s30 = sadd.s32 4294967294, %s3277_s28   ;;  %s3393_s14 = sadd.s32 1, %s3277_s28  }
   0xe   : > { %3934 = sst [smem:[#allocation16_spill]] %s3393_s14  ;;  %s284_s15 = sadd.s32 1, %s3273_s27 }
   0xf   : > { %s281_s16 = ssub.s32 %s3277_s28, %s3393_s14  ;;  %p294_p0 = scmp.ne.s32.totalorder %s3273_s27, %s3269_s26 }
  0x10   : > { %p282_p1 = scmp.eq.s32.totalorder %s281_s16, 0  ;;  %p295_p2 = scmp.eq.s32.totalorder %s3389_s29, 1 }
  0x11   : > { %p300_p3 = scmp.ne.s32.totalorder %s3269_s26, %s3265_s25  ;;  %p301_p4 = scmp.eq.s32.totalorder %s3922_s30, 1 }
  0x12   : > { %s3406_s17 = scalar_select %p282_p1, %s3273_s27, %s284_s15  }
  0x13   : > { %p3408_p5 = por %p295_p2, %p294_p0  ;;  %p3412_p6 = por %p301_p4, %p300_p3 }
  0x14   : > { %3935 = sst [smem:[#allocation17_spill]] %s3406_s17  ;;  %p2647_p7 = scmp.ge.s32.totalorder %s3277_s28, 1 }
  0x15   : > { %s3937_s19 = scalar_select %p3412_p6, 1, 0 }
  0x16   : > { %p360_p8 = scmp.lt.s32.totalorder %s3277_s28, 3  ;;  %p3032_p9 = scmp.eq.s32.totalorder %s3389_s29, 0 }
  0x17   : > { %3938 = sst [smem:[#allocation18_spill]] %s3937_s19  ;;  %s3279_s21 = smov [#allocation5]  }
  0x18   : > { %p3419_p10 = pnand %p2647_p7, %p360_p8  ;;  %s394_s22 = sshll.u32 %s3279_s21, 4  ;;  %s395_s22 = int_to_ptr.vmem [resolvable:$true] %s394_s22 }
  0x19   : > { %s3142_s23 = scalar_lea.vmem %s395_s22, 16  ;;  %s3149_s24 = scalar_lea.vmem %s395_s22, 32 }
  0x1a   : > { %p3018_p11 = pneg %p3419_p10  ;;  %p3143_p0 = scmp.ne.s32.totalorder %s395_s22, %s3142_s23 }
  0x1b   : > { %p3150_p3 = scmp.lt.s32.totalorder %s395_s22, %s395_s22  ;;  %p3151_p4 = scmp.lt.s32.totalorder %s3149_s24, %s3142_s23 }
  0x1c   : > { %p3019_p12 = pnand %p3032_p9, %p3018_p11 }
  0x1d   : > { %p3152_p7 = por %p3151_p4, %p3150_p3 }
  0x1e   : > { %p3133_p13 = pneg %p3019_p12 }
  0x20   : > { %p3145_p1 = pnand %p3143_p0, %p3133_p13 }
  0x22   : > { %p3146_p2 = pneg %p3145_p1 }
  0x24   : > { %p3153_p8 = pnand %p3152_p7, %p3146_p2 }
  0x26   : > { %3156 = shalt.err (!%p3153_p8)
}
  0x27   : > { %s3940_s10 = sld [smem:[#allocation23_spill]] }
  0x29   : > { %430 = sbr.rel (%p3419_p10) target bundleno = 2176 (0x880), region = 64 }
  0x2d   : > { %3021 = dma.hbm_to_vmem [thread:$0]  (!%p3019_p12), %s3940_s10, 16, %s395_s22, [#allocation6]  }
  0x2e   : > { %3252 = dma.done.wait (%p3032_p9), [#allocation6], 16  }
  0x2f   : > { %3254 = vsyncadd (%p3032_p9), [#allocation6], 4294967280  ;;  %p493_p11 = scmp.lt.s32.totalorder %s3389_s29, 1  ;;  %v3280_v0 = vmov 0.0   ;;  %vm3281_vm0 = vmmov 0   ;;  %s3941_s3 = sld [smem:[#allocation22_spill]] }
  0x30   : > { %2826 = vmatprep.subr.mxu1 %v3280_v0  ;;  %2834 = vmatprep.mubr.msk.f32.mxu1 %vm3281_vm0, %v3280_v0  ;;  %v602_v2 = vld [vmem:[%s3912_s4 + $0x18] sm:$0xff]  ;;  %v601_v4 = vld [vmem:[%s3912_s4 + $0x10] sm:$0xff]  ;;  %v600_v6 = vld [vmem:[%s3912_s4 + $0x8] sm:$0xff]  ;;  %s3942_s0 = sld [smem:[#allocation19_spill]]  ;;  %vm513_vm1 = vcmask 261120   ;;  %vm595_vm2 = vcmask 785408  }
  0x31   : > { %s3441_s21 = scalar_select %p493_p11, %s3389_s29, 1  ;;  %2827 = vmatpush3.msra.mxu1 %v602_v2  ;;  %v599_v8 = vld [vmem:[%s3912_s4] sm:$0xff]  ;;  %vm692_vm3 = vcmask 64512   ;;  %vm788_vm4 = vcmask 195584  }
  0x32   : > { %2828 = vmatprep.subr.mxu1 %v3280_v0  ;;  %s3943_s1 = sld [smem:[#allocation20_spill]]  ;;  %s3285_s30 = smov 64  }
  0x33   : > { %s2726_s20 = sshll.u32 %s3441_s21, 4  ;;  %s2657_s10 = sshll.u32 %s3441_s21, 3  ;;  %2829 = vmatpush3.msra.mxu1 %v601_v4  ;;  %v920_v4 = vld [vmem:[%s3913_s5] sm:$0xff] }
  0x34   : > { %2830 = vmatprep.subr.mxu1 %v3280_v0  ;;  %s3286_s16 = smov 56   ;;  %s3287_s27 = smov 80  }
  0x35   : > { %v512_v1 = vld [vmem:[%s3941_s3 + $0x18] sm:$0xff]  ;;  %v511_v3 = vld [vmem:[%s3941_s3 + $0x10] sm:$0xff]  ;;  %v510_v5 = vld [vmem:[%s3941_s3 + $0x8] sm:$0xff]  ;;  %2831 = vmatpush3.msra.mxu1 %v600_v6  ;;  %s3288_s17 = smov 112   ;;  %s3289_s22 = smov 48  }
  0x36   : > { %2815 = vmatprep.subr.mxu0 %v512_v1  ;;  %s497_s14 = scalar_lea.vmem %s3942_s0, %s2726_s20  ;;  %v509_v7 = vld [vmem:[%s3941_s3] sm:$0xff]  ;;  %2832 = vmatprep.subr.mxu1 %v3280_v0  ;;  %s3290_s15 = smov 72  }
  0x37   : > { %2816 = vmatpush3.msra.mxu0 %v512_v1  ;;  %v507_v9 = vld [vmem:[%s497_s14] sm:$0xff]  ;;  %v508_v10 = vld [vmem:[%s497_s14 + $0x8] sm:$0xff]  ;;  %2833 = vmatpush3.msra.mxu1 %v599_v8  ;;  %s3283_s14 = smov 88   ;;  %s3944_s2 = sld [smem:[#allocation21_spill]] }
  0x38   : > { %2817 = vmatprep.subr.mxu0 %v511_v3  ;;  %s501_s19 = scalar_lea.vmem %s3943_s1, %s2657_s10  ;;  %2823 = vmatprep.mubr.msk.f32.mxu0 %vm513_vm1, %v507_v9  ;;  %s3282_s10 = smov 96  }
  0x39   : > { %2818 = vmatpush3.msra.mxu0 %v511_v3  ;;  %v598_v11 = vld [vmem:[%s501_s19] sm:$0xff]  ;;  %2852 = vmatprep.subr.mxu1 %v3280_v0  ;;  %s3284_s19 = smov 120   ;;  %s3927_s23 = sshll.u32 %s3389_s29, 8 }
  0x3a   : > { %2819 = vmatprep.subr.mxu0 %v510_v5  ;;  %2835 = vmatmul.mubr.msk.f32.vlgmr.msra.gmra.mxu1 %vm513_vm1, %v598_v11 }
  0x3b   : > { %2820 = vmatpush3.msra.mxu0 %v510_v5  ;;  %2858 = vmatprep.mubr.msk.f32.mxu1 %vm3281_vm0, %v3280_v0 }
  0x3c   : > { %2821 = vmatprep.subr.mxu0 %v509_v7 }
  0x3d   : > { %2822 = vmatpush3.msra.mxu0 %v509_v7 }
  0x3e   : > { %2824 = vmatmul.mubr.msk.f32.vlgmr.msra.gmra.mxu0 %vm513_vm1, %v508_v10  ;;  %2837 = vmatprep.subr.mxu0 %v3280_v0 }
  0x3f   : > { %2843 = vmatprep.mubr.msk.f32.mxu0 %vm3281_vm0, %v3280_v0 }
  0xfa   : > { %v672_v12 = vpop.f32.mrf.mxu1 }
  0xfb   : > { %676 = vst.msk [vmem:[#allocation2 + $0x10] sm:$0xff] %vm595_vm2, %v672_v12 }
  0xfc   : > { %v2836_v14 = vpop.f32.mrf.mxu1 }
  0xfe   : > { %v2825_v13 = vpop.f32.mrf.mxu0 }
  0xff   : > { %597 = vst.msk [vmem:[#allocation2 + $0x8] sm:$0xff] %vm595_vm2, %v2825_v13 }
 0x100   : > { %v586_v15 = vpop.f32.mrf.mxu0 }
 0x101   : > { %596 = vst.msk [vmem:[#allocation2] sm:$0xff] %vm595_vm2, %v586_v15 }
 0x102   : > { %v3489_v16 = vld [vmem:[#allocation2 + $0x10] sm:$0xff] }
 0x103   : > { %690 = vrot.lane.b32.xlu0 %v3489_v16, %s3282_s10  ;;  %v3509_v21 = vmul.f32 0.35355338, %v3489_v16 }
 0x106   : > { %v3494_v18 = vld [vmem:[#allocation2 + $0x8] sm:$0xff] }
 0x107   : > { %688 = vrot.lane.b32.xlu0 %v3494_v18, %s3282_s10  ;;  %v3505_v20 = vmul.f32 0.35355338, %v3494_v18 }
 0x108   : > { %v3492_v17 = vld [vmem:[#allocation2] sm:$0xff] }
 0x109   : > { %686 = vrot.lane.b32.xlu1 %v3492_v17, %s3282_s10  ;;  %v3501_v19 = vmul.f32 0.35355338, %v3492_v17  ;;  %s3292_s10 = smov 40  }
 0x10b   : > { %1099 = vrot.lane.b32.xlu0 %v3494_v18, %s3283_s14 }
 0x10d   : > { %1101 = vrot.lane.b32.xlu1 %v3489_v16, %s3283_s14 }
 0x10f   : > { %1088 = vrot.lane.b32.xlu0 %v3501_v19, %s3284_s19 }
 0x111   : > { %1097 = vrot.lane.b32.xlu1 %v3492_v17, %s3283_s14 }
 0x113   : > { %1092 = vrot.lane.b32.xlu0 %v3509_v21, %s3284_s19 }
 0x115   : > { %1090 = vrot.lane.b32.xlu1 %v3505_v20, %s3284_s19 }
 0x119   : > { %820 = vrot.lane.b32.xlu1 %v3489_v16, %s3285_s30 }
 0x175   : > { %v691_v22 = vpop.permute.xlu0 %690 }
 0x176   : > { %2838 = vmatpush3.xpose.msk.msra.mxu0 %vm692_vm3, %v691_v22 }
 0x177   : > { %2839 = vmatprep.subr.mxu0 %v3280_v0 }
 0x179   : > { %v689_v24 = vpop.permute.xlu0 %688 }
 0x17a   : > { %2840 = vmatpush3.xpose.msk.msra.mxu0 %vm692_vm3, %v689_v24 }
 0x17b   : > { %v687_v23 = vpop.permute.xlu1 %686  ;;  %2841 = vmatprep.subr.mxu0 %v3280_v0 }
 0x17d   : > { %v1100_v28 = vpop.permute.xlu0 %1099 }
 0x17e   : > { %2842 = vmatpush3.xpose.msk.msra.mxu0 %vm692_vm3, %v687_v23 }
 0x17f   : > { %v1102_v25 = vpop.permute.xlu1 %1101  ;;  %2877 = vmatprep.subr.mxu0 %v3280_v0 }
 0x181   : > { %2844 = vmatmul.mubr.msk.f32.vlgmr.msra.gmra.mxu0 %vm692_vm3, %v3501_v19  ;;  %v1089_v30 = vpop.permute.xlu0 %1088 }
 0x182   : > { %2878 = vmatpush3.xpose.msk.msra.mxu0 %vm692_vm3, %v1102_v25  ;;  %2846 = vmatprep.mubr.msk.f32.mxu0 %vm3281_vm0, %v3280_v0 }
 0x183   : > { %v1098_v26 = vpop.permute.xlu1 %1097  ;;  %2879 = vmatprep.subr.mxu0 %v3280_v0 }
 0x185   : > { %2847 = vmatmul.mubr.msk.f32.gmra.mxu0 %vm692_vm3, %v3505_v20  ;;  %v1093_v31 = vpop.permute.xlu0 %1092 }
 0x186   : > { %2880 = vmatpush3.xpose.msk.msra.mxu0 %vm692_vm3, %v1100_v28  ;;  %2849 = vmatprep.mubr.msk.f32.mxu0 %vm3281_vm0, %v3280_v0 }
 0x187   : > { %v1091_v27 = vpop.permute.xlu1 %1090  ;;  %2881 = vmatprep.subr.mxu0 %v3280_v0 }
 0x189   : > { %2850 = vmatmul.mubr.msk.f32.gmra.mxu0 %vm692_vm3, %v3509_v21 }
 0x18a   : > { %2882 = vmatpush3.xpose.msk.msra.mxu0 %vm692_vm3, %v1098_v26  ;;  %2883 = vmatprep.mubr.msk.f32.mxu0 %vm3281_vm0, %v3280_v0 }
 0x18b   : > { %v821_v29 = vpop.permute.xlu1 %820 }
 0x18c   : > { %2853 = vmatpush3.msra.mxu1 %v821_v29 }
 0x18d   : > { %2854 = vmatprep.subr.mxu1 %v3280_v0  ;;  %2884 = vmatmul.mubr.msk.f32.vlgmr.msra.gmra.mxu0 %vm692_vm3, %v1089_v30 }
 0x18e   : > { %2886 = vmatprep.mubr.msk.f32.mxu0 %vm3281_vm0, %v3280_v0 }
 0x191   : > { %2887 = vmatmul.mubr.msk.f32.gmra.mxu0 %vm692_vm3, %v1091_v27 }
 0x192   : > { %2889 = vmatprep.mubr.msk.f32.mxu0 %vm3281_vm0, %v3280_v0 }
 0x195   : > { %2890 = vmatmul.mubr.msk.f32.gmra.mxu0 %vm692_vm3, %v1093_v31 }
 0x241   : > { %v774_v32 = vpop.f32.mrf.mxu0 }
 0x242   : > { %v789_v33 = vsel %vm788_vm4, %v774_v32, -inf }
 0x243   : > { %790 = vmax.xlane.f32.xlu1 %v789_v33  ;;  %v2845_v34 = vpop.f32.mrf.mxu0 }
 0x245   : > { %v779_v35 = vpop.f32.mrf.mxu0 }
 0x246   : > { %v792_v36 = vsel %vm788_vm4, %v779_v35, -inf }
 0x247   : > { %793 = vmax.xlane.f32.xlu0 %v792_v36  ;;  %v2848_v37 = vpop.f32.mrf.mxu0  ;;  %v1002_v36 = vld [vmem:[%s3915_s7] sm:$0xff] }
 0x249   : > { %v784_v38 = vpop.f32.mrf.mxu0 }
 0x24a   : > { %v795_v39 = vsel %vm788_vm4, %v784_v38, -inf }
 0x24b   : > { %796 = vmax.xlane.f32.xlu0 %v795_v39  ;;  %v2851_v40 = vpop.f32.mrf.mxu0 }
 0x24d   : > { %v3549_v41 = vpop.f32.mrf.mxu0 }
 0x24e   : > { %v1195_v47 = vsel %vm788_vm4, %v3549_v41, -inf }
 0x24f   : > { %v2885_v42 = vpop.f32.mrf.mxu0 }
 0x251   : > { %v3551_v43 = vpop.f32.mrf.mxu0 }
 0x252   : > { %v1198_v49 = vsel %vm788_vm4, %v3551_v43, -inf }
 0x253   : > { %v2888_v44 = vpop.f32.mrf.mxu0 }
 0x254   : > { %816 = vrot.lane.b32.xlu1 %v3492_v17, %s3285_s30 }
 0x255   : > { %v3555_v45 = vpop.f32.mrf.mxu0 }
 0x256   : > { %v1201_v48 = vsel %vm788_vm4, %v3555_v45, -inf }
 0x257   : > { %v2891_v46 = vpop.f32.mrf.mxu0 }
 0x261   : > { %818 = vrot.lane.b32.xlu0 %v3494_v18, %s3285_s30  ;;  %s3761_s30 = sand.u32 1, %s3269_s26  }
 0x278   : > { %1196 = vmax.xlane.f32.xlu1 %v1195_v47 }
 0x27c   : > { %1202 = vmax.xlane.f32.xlu1 %v1201_v48 }
 0x280   : > { %1199 = vmax.xlane.f32.xlu0 %v1198_v49 }
 0x2cc   : > { %v791_v50 = vpop.xlane.xlu1 %790 }
 0x2cd   : > { %v798_v51 = vsub.f32 %v774_v32, %v791_v50 }
 0x2cf   : > { %v801_v52 = vmul.f32 1.442695, %v798_v51  ;;  %v1326_v51 = vld [vmem:[%s3913_s5 + $0x8] sm:$0xff] }
 0x2d0   : > { %v794_v53 = vpop.xlane.xlu0 %793  ;;  %v817_v60 = vpop.permute.xlu1 %816  ;;  %2907 = vmatprep.subr.mxu0 %v1326_v51 }
 0x2d1   : > { %3083 = vpow2.f32 %v801_v52  ;;  %v799_v54 = vsub.f32 %v779_v35, %v794_v53  ;;  %2908 = vmatpush3.msra.mxu0 %v1326_v51 }
 0x2d2   : > { %2912 = vmatprep.subr.mxu0 %v3280_v0 }
 0x2d3   : > { %v803_v55 = vmul.f32 1.442695, %v799_v54 }
 0x2d4   : > { %v797_v56 = vpop.xlane.xlu0 %796 }
 0x2d5   : > { %3085 = vpow2.f32 %v803_v55  ;;  %v800_v57 = vsub.f32 %v784_v38, %v797_v56 }
 0x2d7   : > { %v805_v58 = vmul.f32 1.442695, %v800_v57 }
 0x2d8   : > { %v819_v59 = vpop.permute.xlu0 %818 }
 0x2d9   : > { %3087 = vpow2.f32 %v805_v58  ;;  %2855 = vmatpush3.msra.mxu1 %v819_v59 }
 0x2da   : > { %2856 = vmatprep.subr.mxu1 %v3280_v0 }
 0x2db   : > { %2857 = vmatpush3.msra.mxu1 %v817_v60 }
 0x2dc   : > { %2867 = vmatprep.subr.mxu1 %v920_v4 }
 0x2de   : > { %v3084_v61 = vpop.eup %3083 }
 0x2df   : > { %2859 = vmatmul.mubr.msk.f32.vlgmr.msra.gmra.mxu1 %vm788_vm4, %v3084_v61  ;;  %v807_v62 = vsel %vm788_vm4, %v3084_v61, 0.0 }
 0x2e0   : > { %808 = vadd.xlane.f32.xlu1 %v807_v62  ;;  %2861 = vmatprep.mubr.msk.f32.mxu1 %vm3281_vm0, %v3280_v0 }
 0x2e1   : > { %2868 = vmatpush3.msra.mxu1 %v920_v4 }
 0x2e2   : > { %v3086_v63 = vpop.eup %3085  ;;  %2872 = vmatprep.subr.mxu1 %v3280_v0 }
 0x2e3   : > { %2862 = vmatmul.mubr.msk.f32.gmra.mxu1 %vm788_vm4, %v3086_v63  ;;  %v810_v1 = vsel %vm788_vm4, %v3086_v63, 0.0 }
 0x2e4   : > { %811 = vadd.xlane.f32.xlu0 %v810_v1  ;;  %2864 = vmatprep.mubr.msk.f32.mxu1 %vm3281_vm0, %v3280_v0 }
 0x2e6   : > { %v3088_v2 = vpop.eup %3087 }
 0x2e7   : > { %2865 = vmatmul.mubr.msk.f32.gmra.mxu1 %vm788_vm4, %v3088_v2  ;;  %v813_v3 = vsel %vm788_vm4, %v3088_v2, 0.0 }
 0x2e8   : > { %814 = vadd.xlane.f32.xlu0 %v813_v3 }
 0x2f1   : > { %1224 = vrot.lane.b32.xlu1 %v3494_v18, %s3286_s16 }
 0x2f5   : > { %1222 = vrot.lane.b32.xlu1 %v3492_v17, %s3286_s16 }
 0x2f9   : > { %1511 = vrot.lane.b32.xlu1 %v3494_v18, %s3287_s27 }
 0x2fd   : > { %1500 = vrot.lane.b32.xlu1 %v3501_v19, %s3288_s17 }
 0x2fe   : > { %1226 = vrot.lane.b32.xlu0 %v3489_v16, %s3286_s16  ;;  %s2652_s16 = sshll.u32 %s3761_s30, 4 }
 0x2ff   : > { %s478_s24 = scalar_lea.vmem [#allocation8], %s2652_s16 }
 0x301   : > { %1504 = vrot.lane.b32.xlu1 %v3509_v21, %s3288_s17  ;;  %v1197_v5 = vpop.xlane.xlu1 %1196 }
 0x302   : > { %1513 = vrot.lane.b32.xlu0 %v3489_v16, %s3287_s27  ;;  %v1204_v7 = vsub.f32 %v3549_v41, %v1197_v5 }
 0x304   : > { %v1207_v10 = vmul.f32 1.442695, %v1204_v7 }
 0x305   : > { %1638 = vrot.lane.b32.xlu1 %v3489_v16, %s3289_s22  ;;  %v1203_v9 = vpop.xlane.xlu1 %1202 }
 0x306   : > { %1509 = vrot.lane.b32.xlu0 %v3492_v17, %s3287_s27  ;;  %v1206_v11 = vsub.f32 %v3555_v45, %v1203_v9  ;;  %3089 = vpow2.f32 %v1207_v10  ;;  %s506_s27 = scalar_lea.vmem %s3944_s2, %s2726_s20  ;;  %s3783_s20 = scalar_lea.hbm %s3919_s11, %s3927_s23 }
 0x308   : > { %v1211_v13 = vmul.f32 1.442695, %v1206_v11 }
 0x309   : > { %1634 = vrot.lane.b32.xlu1 %v3492_v17, %s3289_s22  ;;  %v1200_v6 = vpop.xlane.xlu0 %1199 }
 0x30a   : > { %1502 = vrot.lane.b32.xlu0 %v3505_v20, %s3288_s17  ;;  %v1205_v8 = vsub.f32 %v3551_v43, %v1200_v6  ;;  %v1408_v6 = vld [vmem:[%s3915_s7 + $0x8] sm:$0xff]  ;;  %s3291_s17 = smov 104  }
 0x30c   : > { %v1209_v12 = vmul.f32 1.442695, %v1205_v8 }
 0x30e   : > { %1636 = vrot.lane.b32.xlu0 %v3494_v18, %s3289_s22  ;;  %3091 = vpow2.f32 %v1209_v12  ;;  %s3293_s22 = smov [#allocation8]  }
 0x30f   : > { %3093 = vpow2.f32 %v1211_v13  ;;  %s3161_s21 = sshll.u32 %s3293_s22, 4  ;;  %s3162_s21 = int_to_ptr.vmem [resolvable:$false] %s3161_s21 }
 0x310   : > { %s3163_s14 = scalar_lea.vmem %s3162_s21, 512 }
 0x313   : > { %v3090_v14 = vpop.eup %3089 }
 0x314   : > { %v1213_v22 = vsel %vm788_vm4, %v3090_v14, 0.0 }
 0x31b   : > { %v3092_v15 = vpop.eup %3091 }
 0x31c   : > { %v1216_v23 = vsel %vm788_vm4, %v3092_v15, 0.0  ;;  %v3094_v24 = vpop.eup %3093 }
 0x31d   : > { %v1219_v25 = vsel %vm788_vm4, %v3094_v24, 0.0 }
 0x32d   : > { %1214 = vadd.xlane.f32.xlu0 %v1213_v22  ;;  %1217 = vadd.xlane.f32.xlu1 %v1216_v23 }
 0x331   : > { %1220 = vadd.xlane.f32.xlu0 %v1219_v25 }
 0x33e   : > { %1925 = vrot.lane.b32.xlu1 %v3489_v16, %s3290_s15 }
 0x369   : > { %v809_v26 = vpop.xlane.xlu1 %808 }
 0x36a   : > { %3095 = vrcp.f32 %v809_v26 }
 0x36d   : > { %v812_v27 = vpop.xlane.xlu0 %811  ;;  %v1225_v40 = vpop.permute.xlu1 %1224 }
 0x36e   : > { %3097 = vrcp.f32 %v812_v27 }
 0x371   : > { %v815_v28 = vpop.xlane.xlu0 %814  ;;  %v1223_v44 = vpop.permute.xlu1 %1222 }
 0x372   : > { %3099 = vrcp.f32 %v815_v28 }
 0x375   : > { %v1227_v43 = vpop.permute.xlu0 %1226  ;;  %v1512_v46 = vpop.permute.xlu1 %1511 }
 0x377   : > { %v3096_v29 = vpop.eup %3095 }
 0x379   : > { %v1514_v45 = vpop.permute.xlu0 %1513  ;;  %v1501_v48 = vpop.permute.xlu1 %1500 }
 0x37b   : > { %v3098_v33 = vpop.eup %3097 }
 0x37d   : > { %v1510_v47 = vpop.permute.xlu0 %1509  ;;  %v1505_v50 = vpop.permute.xlu1 %1504 }
 0x37f   : > { %v3100_v38 = vpop.eup %3099 }
 0x381   : > { %v1503_v49 = vpop.permute.xlu0 %1502  ;;  %v1639_v52 = vpop.permute.xlu1 %1638 }
 0x385   : > { %v1637_v53 = vpop.permute.xlu0 %1636  ;;  %v1635_v54 = vpop.permute.xlu1 %1634 }
 0x39f   : > { %v900_v30 = vpop.f32.mrf.mxu1 }
 0x3a0   : > { %v917_v31 = vmul.f32 %v3096_v29, %v900_v30 }
 0x3a1   : > { %v2860_v32 = vpop.f32.mrf.mxu1 }
 0x3a2   : > { %2869 = vmatprep.mubr.msk.f32.mxu1 %vm692_vm3, %v917_v31 }
 0x3a3   : > { %v905_v34 = vpop.f32.mrf.mxu1 }
 0x3a4   : > { %v918_v35 = vmul.f32 %v3098_v33, %v905_v34 }
 0x3a5   : > { %v2863_v37 = vpop.f32.mrf.mxu1 }
 0x3a6   : > { %2870 = vmatmul.mubr.msk.f32.vlgmr.msra.gmra.mxu1 %vm692_vm3, %v918_v35 }
 0x3a7   : > { %v910_v39 = vpop.f32.mrf.mxu1  ;;  %2873 = vmatpush3.msra.mxu1 %v1002_v36  ;;  %2874 = vmatprep.mubr.msk.f32.mxu1 %vm3281_vm0, %v3280_v0 }
 0x3a8   : > { %v919_v41 = vmul.f32 %v3100_v38, %v910_v39  ;;  %2892 = vmatprep.subr.mxu1 %v3280_v0 }
 0x3a9   : > { %v2866_v42 = vpop.f32.mrf.mxu1 }
 0x3aa   : > { %2875 = vmatmul.mubr.msk.f32.vlgmr.msra.gmra.mxu1 %vm692_vm3, %v919_v41 }
 0x3ab   : > { %2893 = vmatpush3.msra.mxu1 %v1227_v43  ;;  %2898 = vmatprep.mubr.msk.f32.mxu1 %vm3281_vm0, %v3280_v0 }
 0x3ac   : > { %2894 = vmatprep.subr.mxu1 %v3280_v0 }
 0x3ad   : > { %2895 = vmatpush3.msra.mxu1 %v1225_v40 }
 0x3ae   : > { %2896 = vmatprep.subr.mxu1 %v3280_v0 }
 0x3af   : > { %2897 = vmatpush3.msra.mxu1 %v1223_v44 }
 0x3b0   : > { %2899 = vmatmul.mubr.msk.f32.vlgmr.msra.gmra.mxu1 %vm788_vm4, %v3090_v14  ;;  %2917 = vmatprep.subr.mxu1 %v3280_v0 }
 0x3b1   : > { %2918 = vmatpush3.xpose.msk.msra.mxu1 %vm692_vm3, %v1514_v45  ;;  %2901 = vmatprep.mubr.msk.f32.mxu1 %vm3281_vm0, %v3280_v0 }
 0x3b2   : > { %2919 = vmatprep.subr.mxu1 %v3280_v0 }
 0x3b4   : > { %2902 = vmatmul.mubr.msk.f32.gmra.mxu1 %vm788_vm4, %v3092_v15 }
 0x3b5   : > { %2920 = vmatpush3.xpose.msk.msra.mxu1 %vm692_vm3, %v1512_v46  ;;  %2904 = vmatprep.mubr.msk.f32.mxu1 %vm3281_vm0, %v3280_v0 }
 0x3b6   : > { %2921 = vmatprep.subr.mxu1 %v3280_v0  ;;  %v1215_v55 = vpop.xlane.xlu0 %1214  ;;  %v1218_v56 = vpop.xlane.xlu1 %1217 }
 0x3b7   : > { %3101 = vrcp.f32 %v1215_v55  ;;  %v1738_v55 = vld [vmem:[%s3913_s5 + $0x10] sm:$0xff] }
 0x3b8   : > { %2905 = vmatmul.mubr.msk.f32.gmra.mxu1 %vm788_vm4, %v3094_v24  ;;  %3103 = vrcp.f32 %v1218_v56 }
 0x3b9   : > { %2922 = vmatpush3.xpose.msk.msra.mxu1 %vm692_vm3, %v1510_v47  ;;  %2923 = vmatprep.mubr.msk.f32.mxu1 %vm3281_vm0, %v3280_v0 }
 0x3ba   : > { %v1221_v58 = vpop.xlane.xlu0 %1220  ;;  %v1926_v27 = vpop.permute.xlu1 %1925  ;;  %2947 = vmatprep.subr.mxu1 %v1738_v55 }
 0x3bb   : > { %3105 = vrcp.f32 %v1221_v58 }
 0x3bc   : > { %2924 = vmatmul.mubr.msk.f32.vlgmr.msra.gmra.mxu1 %vm692_vm3, %v1501_v48 }
 0x3bd   : > { %2926 = vmatprep.mubr.msk.f32.mxu1 %vm3281_vm0, %v3280_v0  ;;  %2948 = vmatpush3.msra.mxu1 %v1738_v55 }
 0x3be   : > { %2952 = vmatprep.subr.mxu1 %v3280_v0 }
 0x3c0   : > { %2927 = vmatmul.mubr.msk.f32.gmra.mxu1 %vm692_vm3, %v1503_v49 }
 0x3c1   : > { %2929 = vmatprep.mubr.msk.f32.mxu1 %vm3281_vm0, %v3280_v0 }
 0x3c4   : > { %2930 = vmatmul.mubr.msk.f32.gmra.mxu1 %vm692_vm3, %v1505_v50  ;;  %v3102_v62 = vpop.eup %3101 }
 0x3c5   : > { %v3104_v3 = vpop.eup %3103 }
 0x3c8   : > { %v3106_v8 = vpop.eup %3105 }
 0x466   : > { %v2871_v57 = vpop.f32.mrf.mxu1 }
 0x467   : > { %1077 = vst.msk [vmem:[#allocation3 + $0x8] sm:$0xff] %vm513_vm1, %v2871_v57 }
 0x468   : > { %v993_v59 = vpop.f32.mrf.mxu1 }
 0x469   : > { %1076 = vst.msk [vmem:[#allocation3] sm:$0xff] %vm513_vm1, %v993_v59 }
 0x46a   : > { %v1072_v60 = vpop.f32.mrf.mxu1 }
 0x46b   : > { %1078 = vst.msk [vmem:[#allocation4] sm:$0xff] %vm513_vm1, %v1072_v60 }
 0x46c   : > { %v2876_v61 = vpop.f32.mrf.mxu1 }
 0x46e   : > { %v1483_v46 = vld [vmem:[#allocation3 + $0x8] sm:$0xff] }
 0x470   : > { %v1306_v63 = vpop.f32.mrf.mxu1  ;;  %v1482_v49 = vld [vmem:[#allocation3] sm:$0xff] }
 0x471   : > { %v1323_v1 = vmul.f32 %v3102_v62, %v1306_v63 }
 0x472   : > { %v2900_v2 = vpop.f32.mrf.mxu1 }
 0x473   : > { %2909 = vmatprep.mubr.msk.f32.mxu0 %vm692_vm3, %v1323_v1 }
 0x474   : > { %v1311_v4 = vpop.f32.mrf.mxu1 }
 0x475   : > { %v1324_v5 = vmul.f32 %v3104_v3, %v1311_v4  ;;  %v1820_v3 = vld [vmem:[%s3915_s7 + $0x10] sm:$0xff] }
 0x476   : > { %v2903_v7 = vpop.f32.mrf.mxu1 }
 0x477   : > { %2910 = vmatmul.mubr.msk.f32.vlgmr.msra.gmra.mxu0 %vm692_vm3, %v1324_v5 }
 0x478   : > { %v1316_v9 = vpop.f32.mrf.mxu1  ;;  %2913 = vmatpush3.msra.mxu0 %v1408_v6  ;;  %2914 = vmatprep.mubr.msk.f32.mxu0 %vm3281_vm0, %v3280_v0 }
 0x479   : > { %v1325_v10 = vmul.f32 %v3106_v8, %v1316_v9  ;;  %2932 = vmatprep.subr.mxu0 %v3280_v0 }
 0x47a   : > { %v2906_v11 = vpop.f32.mrf.mxu1 }
 0x47b   : > { %2915 = vmatmul.mubr.msk.f32.vlgmr.msra.gmra.mxu0 %vm692_vm3, %v1325_v10 }
 0x47c   : > { %2933 = vmatpush3.msra.mxu0 %v1639_v52  ;;  %v1593_v12 = vpop.f32.mrf.mxu1  ;;  %2938 = vmatprep.mubr.msk.f32.mxu0 %vm3281_vm0, %v3280_v0  ;;  %v1488_v52 = vld [vmem:[#allocation4] sm:$0xff] }
 0x47d   : > { %2934 = vmatprep.subr.mxu0 %v3280_v0  ;;  %v1607_v13 = vsel %vm788_vm4, %v1593_v12, -inf }
 0x47e   : > { %2935 = vmatpush3.msra.mxu0 %v1637_v53  ;;  %1608 = vmax.xlane.f32.xlu0 %v1607_v13  ;;  %v2925_v14 = vpop.f32.mrf.mxu1 }
 0x47f   : > { %2936 = vmatprep.subr.mxu0 %v3280_v0 }
 0x480   : > { %2937 = vmatpush3.msra.mxu0 %v1635_v54  ;;  %v1598_v15 = vpop.f32.mrf.mxu1 }
 0x481   : > { %v1610_v22 = vsel %vm788_vm4, %v1598_v15, -inf  ;;  %2957 = vmatprep.subr.mxu0 %v3280_v0 }
 0x482   : > { %1611 = vmax.xlane.f32.xlu1 %v1610_v22  ;;  %v2928_v23 = vpop.f32.mrf.mxu1 }
 0x484   : > { %v1603_v24 = vpop.f32.mrf.mxu1 }
 0x485   : > { %v1613_v25 = vsel %vm788_vm4, %v1603_v24, -inf }
 0x486   : > { %1614 = vmax.xlane.f32.xlu0 %v1613_v25  ;;  %v2931_v26 = vpop.f32.mrf.mxu1 }
 0x493   : > { %1921 = vrot.lane.b32.xlu1 %v3492_v17, %s3290_s15 }
 0x497   : > { %1914 = vrot.lane.b32.xlu1 %v3505_v20, %s3291_s17 }
 0x49c   : > { %1923 = vrot.lane.b32.xlu0 %v3494_v18, %s3290_s15  ;;  %s2458_s15 = sshll.u32 %s478_s24, 4  ;;  %s3785_s15 = int_to_ptr.vmem [resolvable:$true] %s2458_s15 }
 0x49d   : > { %p3164_p13 = scmp.lt.s32.totalorder %s3785_s15, %s3162_s21 }
 0x4a0   : > { %1912 = vrot.lane.b32.xlu0 %v3501_v19, %s3291_s17 }
 0x4a4   : > { %1916 = vrot.lane.b32.xlu0 %v3509_v21, %s3291_s17  ;;  %s3157_s17 = scalar_lea.vmem %s3785_s15, 256 }
 0x4a5   : > { %p3158_p9 = scmp.ne.s32.totalorder %s3785_s15, %s3157_s17  ;;  %p3165_p0 = scmp.lt.s32.totalorder %s3163_s14, %s3157_s17 }
 0x4a7   : > { %p3159_p10 = pnand %p3158_p9, %p3408_p5  ;;  %p3166_p1 = por %p3165_p0, %p3164_p13 }
 0x4a9   : > { %p3160_p12 = pneg %p3159_p10 }
 0x4ab   : > { %p3167_p2 = pnand %p3166_p1, %p3160_p12 }
 0x507   : > { %v1609_v28 = vpop.xlane.xlu0 %1608 }
 0x508   : > { %v1616_v29 = vsub.f32 %v1593_v12, %v1609_v28 }
 0x50a   : > { %v1619_v30 = vmul.f32 1.442695, %v1616_v29 }
 0x50b   : > { %v1612_v31 = vpop.xlane.xlu1 %1611 }
 0x50c   : > { %3107 = vpow2.f32 %v1619_v30  ;;  %v1617_v32 = vsub.f32 %v1598_v15, %v1612_v31 }
 0x50e   : > { %v1621_v33 = vmul.f32 1.442695, %v1617_v32 }
 0x50f   : > { %v1615_v34 = vpop.xlane.xlu0 %1614  ;;  %v1922_v40 = vpop.permute.xlu1 %1921 }
 0x510   : > { %3109 = vpow2.f32 %v1621_v33  ;;  %v1618_v35 = vsub.f32 %v1603_v24, %v1615_v34 }
 0x512   : > { %v1623_v36 = vmul.f32 1.442695, %v1618_v35 }
 0x513   : > { %v1924_v37 = vpop.permute.xlu0 %1923  ;;  %v1915_v43 = vpop.permute.xlu1 %1914 }
 0x514   : > { %3111 = vpow2.f32 %v1623_v36 }
 0x517   : > { %v1913_v42 = vpop.permute.xlu0 %1912 }
 0x519   : > { %v3108_v20 = vpop.eup %3107 }
 0x51a   : > { %2939 = vmatmul.mubr.msk.f32.vlgmr.msra.gmra.mxu0 %vm788_vm4, %v3108_v20  ;;  %v1625_v19 = vsel %vm788_vm4, %v3108_v20, 0.0 }
 0x51b   : > { %2958 = vmatpush3.xpose.msk.msra.mxu0 %vm692_vm3, %v1926_v27  ;;  %1626 = vadd.xlane.f32.xlu1 %v1625_v19  ;;  %v1917_v44 = vpop.permute.xlu0 %1916 }
 0x51c   : > { %2941 = vmatprep.mubr.msk.f32.mxu0 %vm3281_vm0, %v3280_v0  ;;  %2959 = vmatprep.subr.mxu0 %v3280_v0 }
 0x51d   : > { %v3110_v21 = vpop.eup %3109 }
 0x51e   : > { %2942 = vmatmul.mubr.msk.f32.gmra.mxu0 %vm788_vm4, %v3110_v21  ;;  %v1628_v38 = vsel %vm788_vm4, %v3110_v21, 0.0 }
 0x51f   : > { %2960 = vmatpush3.xpose.msk.msra.mxu0 %vm692_vm3, %v1924_v37  ;;  %1629 = vadd.xlane.f32.xlu0 %v1628_v38 }
 0x520   : > { %2944 = vmatprep.mubr.msk.f32.mxu0 %vm3281_vm0, %v3280_v0  ;;  %2961 = vmatprep.subr.mxu0 %v3280_v0 }
 0x521   : > { %v3112_v39 = vpop.eup %3111 }
 0x522   : > { %2945 = vmatmul.mubr.msk.f32.gmra.mxu0 %vm788_vm4, %v3112_v39  ;;  %v1631_v41 = vsel %vm788_vm4, %v3112_v39, 0.0 }
 0x523   : > { %2962 = vmatpush3.xpose.msk.msra.mxu0 %vm692_vm3, %v1922_v40  ;;  %1632 = vadd.xlane.f32.xlu0 %v1631_v41 }
 0x524   : > { %2963 = vmatprep.mubr.msk.f32.mxu0 %vm3281_vm0, %v3280_v0 }
 0x526   : > { %2964 = vmatmul.mubr.msk.f32.vlgmr.msra.gmra.mxu0 %vm692_vm3, %v1913_v42 }
 0x527   : > { %2966 = vmatprep.mubr.msk.f32.mxu0 %vm3281_vm0, %v3280_v0 }
 0x52a   : > { %2967 = vmatmul.mubr.msk.f32.gmra.mxu0 %vm692_vm3, %v1915_v43 }
 0x52b   : > { %2969 = vmatprep.mubr.msk.f32.mxu0 %vm3281_vm0, %v3280_v0 }
 0x52e   : > { %2970 = vmatmul.mubr.msk.f32.gmra.mxu0 %vm692_vm3, %v1917_v44 }
 0x537   : > { %v2911_v45 = vpop.f32.mrf.mxu0 }
 0x538   : > { %v1485_v47 = vadd.f32 %v2911_v45, %v1483_v46  ;;  %v2150_v46 = vld [vmem:[%s3913_s5 + $0x18] sm:$0xff] }
 0x539   : > { %v1399_v48 = vpop.f32.mrf.mxu0  ;;  %2987 = vmatprep.subr.mxu0 %v2150_v46 }
 0x53a   : > { %1487 = vst.msk [vmem:[#allocation3 + $0x8] sm:$0xff] %vm513_vm1, %v1485_v47  ;;  %v1484_v50 = vadd.f32 %v1482_v49, %v1399_v48  ;;  %2988 = vmatpush3.msra.mxu0 %v2150_v46  ;;  %v2343_v47 = vld [vmem:[%s3917_s9 + $0x18] sm:$0xff]  ;;  %v2342_v48 = vld [vmem:[%s3917_s9 + $0x10] sm:$0xff]  ;;  %v2341_v49 = vld [vmem:[%s3917_s9 + $0x8] sm:$0xff] }
 0x53b   : > { %v1478_v51 = vpop.f32.mrf.mxu0  ;;  %2992 = vmatprep.subr.mxu0 %v3280_v0 }
 0x53c   : > { %1486 = vst.msk [vmem:[#allocation3] sm:$0xff] %vm513_vm1, %v1484_v50  ;;  %v1489_v53 = vadd.f32 %v1488_v52, %v1478_v51  ;;  %v2338_v50 = vld [vmem:[%s506_s27] sm:$0xff]  ;;  %v2339_v52 = vld [vmem:[%s506_s27 + $0x8] sm:$0xff]  ;;  %s3764_s27 = scalar_lea.vmem [#allocation11], %s2652_s16 }
 0x53d   : > { %v2916_v54 = vpop.f32.mrf.mxu0  ;;  %v2340_v51 = vld [vmem:[%s3917_s9] sm:$0xff] }
 0x53e   : > { %1490 = vst.msk [vmem:[#allocation4] sm:$0xff] %vm513_vm1, %v1489_v53 }
 0x541   : > { %v1895_v34 = vld [vmem:[#allocation3 + $0x8] sm:$0xff] }
 0x543   : > { %v1894_v20 = vld [vmem:[#allocation3] sm:$0xff] }
 0x545   : > { %v1900_v37 = vld [vmem:[#allocation4] sm:$0xff] }
 0x5a4   : > { %v1627_v56 = vpop.xlane.xlu1 %1626 }
 0x5a5   : > { %3113 = vrcp.f32 %v1627_v56 }
 0x5a8   : > { %v1630_v57 = vpop.xlane.xlu0 %1629 }
 0x5a9   : > { %3115 = vrcp.f32 %v1630_v57 }
 0x5ac   : > { %v1633_v58 = vpop.xlane.xlu0 %1632 }
 0x5ad   : > { %3117 = vrcp.f32 %v1633_v58 }
 0x5b2   : > { %v3114_v59 = vpop.eup %3113 }
 0x5b6   : > { %v3116_v63 = vpop.eup %3115 }
 0x5ba   : > { %v3118_v5 = vpop.eup %3117 }
 0x5da   : > { %v1718_v60 = vpop.f32.mrf.mxu0 }
 0x5db   : > { %v1735_v61 = vmul.f32 %v3114_v59, %v1718_v60 }
 0x5dc   : > { %v2940_v62 = vpop.f32.mrf.mxu0 }
 0x5dd   : > { %2949 = vmatprep.mubr.msk.f32.mxu1 %vm692_vm3, %v1735_v61 }
 0x5de   : > { %v1723_v1 = vpop.f32.mrf.mxu0 }
 0x5df   : > { %v1736_v2 = vmul.f32 %v3116_v63, %v1723_v1  ;;  %v2232_v63 = vld [vmem:[%s3915_s7 + $0x18] sm:$0xff] }
 0x5e0   : > { %v2943_v4 = vpop.f32.mrf.mxu0 }
 0x5e1   : > { %2950 = vmatmul.mubr.msk.f32.vlgmr.msra.gmra.mxu1 %vm692_vm3, %v1736_v2 }
 0x5e2   : > { %v1728_v6 = vpop.f32.mrf.mxu0  ;;  %2953 = vmatpush3.msra.mxu1 %v1820_v3  ;;  %2954 = vmatprep.mubr.msk.f32.mxu1 %vm3281_vm0, %v3280_v0 }
 0x5e3   : > { %v1737_v7 = vmul.f32 %v3118_v5, %v1728_v6  ;;  %2972 = vmatprep.subr.mxu1 %v3280_v0  ;;  %v2713_v6 = vld [vmem:[#allocation5] ss:$0 sm:$0xff] }
 0x5e4   : > { %v2946_v8 = vpop.f32.mrf.mxu0 }
 0x5e5   : > { %2955 = vmatmul.mubr.msk.f32.vlgmr.msra.gmra.mxu1 %vm692_vm3, %v1737_v7 }
 0x5e6   : > { %v2005_v9 = vpop.f32.mrf.mxu0  ;;  %2978 = vmatprep.mubr.msk.f32.mxu1 %vm3281_vm0, %v3280_v0 }
 0x5e7   : > { %v2019_v10 = vsel %vm788_vm4, %v2005_v9, -inf }
 0x5e8   : > { %2020 = vmax.xlane.f32.xlu1 %v2019_v10  ;;  %v2965_v11 = vpop.f32.mrf.mxu0 }
 0x5ea   : > { %v2010_v12 = vpop.f32.mrf.mxu0 }
 0x5eb   : > { %v2022_v13 = vsel %vm788_vm4, %v2010_v12, -inf }
 0x5ec   : > { %2023 = vmax.xlane.f32.xlu0 %v2022_v13  ;;  %v2968_v14 = vpop.f32.mrf.mxu0 }
 0x5ee   : > { %v2015_v15 = vpop.f32.mrf.mxu0 }
 0x5ef   : > { %v2025_v23 = vsel %vm788_vm4, %v2015_v15, -inf }
 0x5f0   : > { %v2971_v22 = vpop.f32.mrf.mxu0 }
 0x5f1   : > { %v2711_v22 = vld [vmem:[%s3914_s6] ss:$0 sm:$0xff] }
 0x5f9   : > { %2048 = vrot.lane.b32.xlu1 %v3494_v18, %s3292_s10 }
 0x602   : > { %2050 = vrot.lane.b32.xlu0 %v3489_v16, %s3292_s10 }
 0x61d   : > { %2026 = vmax.xlane.f32.xlu1 %v2025_v23 }
 0x62e   : > { %2046 = vrot.lane.b32.xlu1 %v3492_v17, %s3292_s10 }
 0x671   : > { %v2021_v24 = vpop.xlane.xlu1 %2020 }
 0x672   : > { %v2028_v25 = vsub.f32 %v2005_v9, %v2021_v24 }
 0x674   : > { %v2031_v26 = vmul.f32 1.442695, %v2028_v25 }
 0x675   : > { %v2024_v27 = vpop.xlane.xlu0 %2023  ;;  %v2049_v31 = vpop.permute.xlu1 %2048 }
 0x676   : > { %3119 = vpow2.f32 %v2031_v26  ;;  %v2029_v28 = vsub.f32 %v2010_v12, %v2024_v27 }
 0x678   : > { %v2033_v29 = vmul.f32 1.442695, %v2029_v28 }
 0x679   : > { %v2051_v30 = vpop.permute.xlu0 %2050 }
 0x67a   : > { %3121 = vpow2.f32 %v2033_v29  ;;  %2973 = vmatpush3.msra.mxu1 %v2051_v30 }
 0x67b   : > { %2974 = vmatprep.subr.mxu1 %v3280_v0 }
 0x67c   : > { %2975 = vmatpush3.msra.mxu1 %v2049_v31 }
 0x67d   : > { %2976 = vmatprep.subr.mxu1 %v3280_v0 }
 0x683   : > { %v3120_v16 = vpop.eup %3119 }
 0x684   : > { %v2037_v18 = vsel %vm788_vm4, %v3120_v16, 0.0 }
 0x685   : > { %2038 = vadd.xlane.f32.xlu0 %v2037_v18 }
 0x687   : > { %v3122_v17 = vpop.eup %3121 }
 0x688   : > { %v2040_v32 = vsel %vm788_vm4, %v3122_v17, 0.0 }
 0x689   : > { %2041 = vadd.xlane.f32.xlu1 %v2040_v32 }
 0x6a1   : > { %v2951_v33 = vpop.f32.mrf.mxu1 }
 0x6a2   : > { %v1897_v35 = vadd.f32 %v2951_v33, %v1895_v34 }
 0x6a3   : > { %v1811_v36 = vpop.f32.mrf.mxu1 }
 0x6a4   : > { %1899 = vst.msk [vmem:[#allocation3 + $0x8] sm:$0xff] %vm513_vm1, %v1897_v35  ;;  %v1896_v19 = vadd.f32 %v1894_v20, %v1811_v36 }
 0x6a5   : > { %v1890_v21 = vpop.f32.mrf.mxu1 }
 0x6a6   : > { %1898 = vst.msk [vmem:[#allocation3] sm:$0xff] %vm513_vm1, %v1896_v19  ;;  %v1901_v38 = vadd.f32 %v1900_v37, %v1890_v21  ;;  %v2027_v39 = vpop.xlane.xlu1 %2026 }
 0x6a7   : > { %v2030_v40 = vsub.f32 %v2015_v15, %v2027_v39  ;;  %v2956_v41 = vpop.f32.mrf.mxu1 }
 0x6a8   : > { %1902 = vst.msk [vmem:[#allocation4] sm:$0xff] %vm513_vm1, %v1901_v38 }
 0x6a9   : > { %v2035_v42 = vmul.f32 1.442695, %v2030_v40 }
 0x6aa   : > { %v2047_v43 = vpop.permute.xlu1 %2046 }
 0x6ab   : > { %3123 = vpow2.f32 %v2035_v42  ;;  %2977 = vmatpush3.msra.mxu1 %v2047_v43  ;;  %v2307_v11 = vld [vmem:[#allocation3 + $0x8] sm:$0xff] }
 0x6ac   : > { %2979 = vmatmul.mubr.msk.f32.vlgmr.msra.gmra.mxu1 %vm788_vm4, %v3120_v16  ;;  %2997 = vmatprep.subr.mxu1 %v2343_v47 }
 0x6ad   : > { %2981 = vmatprep.mubr.msk.f32.mxu1 %vm3281_vm0, %v3280_v0  ;;  %2998 = vmatpush3.msra.mxu1 %v2343_v47  ;;  %v2306_v14 = vld [vmem:[#allocation3] sm:$0xff] }
 0x6ae   : > { %2999 = vmatprep.subr.mxu1 %v2342_v48 }
 0x6af   : > { %3000 = vmatpush3.msra.mxu1 %v2342_v48  ;;  %v2312_v24 = vld [vmem:[#allocation4] sm:$0xff] }
 0x6b0   : > { %2982 = vmatmul.mubr.msk.f32.gmra.mxu1 %vm788_vm4, %v3122_v17  ;;  %3001 = vmatprep.subr.mxu1 %v2341_v49 }
 0x6b1   : > { %2984 = vmatprep.mubr.msk.f32.mxu1 %vm3281_vm0, %v3280_v0  ;;  %3002 = vmatpush3.msra.mxu1 %v2341_v49 }
 0x6b2   : > { %3003 = vmatprep.subr.mxu1 %v2340_v51 }
 0x6b3   : > { %3004 = vmatpush3.msra.mxu1 %v2340_v51 }
 0x6b8   : > { %v3124_v44 = vpop.eup %3123 }
 0x6b9   : > { %2985 = vmatmul.mubr.msk.f32.gmra.mxu1 %vm788_vm4, %v3124_v44  ;;  %v2043_v45 = vsel %vm788_vm4, %v3124_v44, 0.0 }
 0x6ba   : > { %2044 = vadd.xlane.f32.xlu0 %v2043_v45  ;;  %3005 = vmatprep.mubr.msk.f32.mxu1 %vm513_vm1, %v2338_v50 }
 0x6bd   : > { %3006 = vmatmul.mubr.msk.f32.vlgmr.msra.gmra.mxu1 %vm513_vm1, %v2339_v52 }
 0x70e   : > { %v2039_v53 = vpop.xlane.xlu0 %2038 }
 0x70f   : > { %3125 = vrcp.f32 %v2039_v53 }
 0x712   : > { %v2042_v54 = vpop.xlane.xlu1 %2041 }
 0x713   : > { %3127 = vrcp.f32 %v2042_v54 }
 0x71c   : > { %v3126_v56 = vpop.eup %3125 }
 0x720   : > { %v3128_v60 = vpop.eup %3127 }
 0x743   : > { %v2045_v55 = vpop.xlane.xlu0 %2044 }
 0x744   : > { %3129 = vrcp.f32 %v2045_v55 }
 0x751   : > { %v3130_v2 = vpop.eup %3129 }
 0x76c   : > { %v2130_v57 = vpop.f32.mrf.mxu1 }
 0x76d   : > { %v2147_v58 = vmul.f32 %v3126_v56, %v2130_v57 }
 0x76e   : > { %v2980_v59 = vpop.f32.mrf.mxu1 }
 0x76f   : > { %2989 = vmatprep.mubr.msk.f32.mxu0 %vm692_vm3, %v2147_v58 }
 0x770   : > { %v2135_v61 = vpop.f32.mrf.mxu1 }
 0x771   : > { %v2148_v62 = vmul.f32 %v3128_v60, %v2135_v61 }
 0x772   : > { %v2983_v1 = vpop.f32.mrf.mxu1 }
 0x773   : > { %2990 = vmatmul.mubr.msk.f32.vlgmr.msra.gmra.mxu0 %vm692_vm3, %v2148_v62 }
 0x774   : > { %2993 = vmatpush3.msra.mxu0 %v2232_v63  ;;  %2994 = vmatprep.mubr.msk.f32.mxu0 %vm3281_vm0, %v3280_v0 }
 0x779   : > { %v2140_v3 = vpop.f32.mrf.mxu1 }
 0x77a   : > { %v2149_v4 = vmul.f32 %v3130_v2, %v2140_v3 }
 0x77b   : > { %v2986_v5 = vpop.f32.mrf.mxu1 }
 0x77c   : > { %2995 = vmatmul.mubr.msk.f32.vlgmr.msra.gmra.mxu0 %vm692_vm3, %v2149_v4 }
 0x77d   : > { %v3007_v7 = vpop.f32.mrf.mxu1 }
 0x77e   : > { %v2429_v8 = vadd.f32 %v3007_v7, %v2713_v6 }
 0x77f   : > { %v2423_v9 = vpop.f32.mrf.mxu1 }
 0x780   : > { %2433 = vst.msk [vmem:[%s3764_s27 + $0x8] sm:$0xff] %vm513_vm1, %v2429_v8  ;;  %v2424_v0 = vadd.f32 %v2713_v6, %v2423_v9 }
 0x782   : > { %2432 = vst.msk [vmem:[%s3764_s27] sm:$0xff] %vm513_vm1, %v2424_v0 }
 0x833   : > { %v2991_v10 = vpop.f32.mrf.mxu0 }
 0x834   : > { %v2309_v12 = vadd.f32 %v2991_v10, %v2307_v11 }
 0x835   : > { %v2223_v13 = vpop.f32.mrf.mxu0 }
 0x836   : > { %2311 = vst.msk [vmem:[#allocation3 + $0x8] sm:$0xff] %vm513_vm1, %v2309_v12  ;;  %v2308_v15 = vadd.f32 %v2306_v14, %v2223_v13 }
 0x838   : > { %2310 = vst.msk [vmem:[#allocation3] sm:$0xff] %vm513_vm1, %v2308_v15 }
 0x83c   : > { %v2302_v23 = vpop.f32.mrf.mxu0 }
 0x83d   : > { %v2313_v25 = vadd.f32 %v2312_v24, %v2302_v23  ;;  %v2316_v26 = vld [vmem:[#allocation3 + $0x8] sm:$0xff] }
 0x83e   : > { %v2996_v27 = vpop.f32.mrf.mxu0  ;;  %v2325_v28 = vadd.f32 %v2711_v22, %v2316_v26 }
 0x83f   : > { %2314 = vst.msk [vmem:[#allocation4] sm:$0xff] %vm513_vm1, %v2313_v25  ;;  %v2315_v29 = vld [vmem:[#allocation3] sm:$0xff] }
 0x840   : > { %v2324_v30 = vadd.f32 %v2711_v22, %v2315_v29  ;;  %2327 = vst.msk [vmem:[%s478_s24 + $0x8] sm:$0xff] %vm513_vm1, %v2325_v28 }
 0x842   : > { %2326 = vst.msk [vmem:[%s478_s24] sm:$0xff] %vm513_vm1, %v2324_v30 }
 0x843   : > { %3170 = shalt.err (!%p3167_p2)
}
 0x844   : > { %s3171_s24 = scalar_lea.hbm %s3783_s20, 256  ;;  %s3175_s22 = scalar_lea.hbm %s3919_s11, 512 }
 0x845   : > { %p3172_p3 = scmp.ne.s32.totalorder %s3783_s20, %s3171_s24  ;;  %p3176_p8 = scmp.lt.s32.totalorder %s3783_s20, %s3919_s11 }
 0x846   : > { %p3177_p11 = scmp.lt.s32.totalorder %s3175_s22, %s3171_s24 }
 0x847   : > { %p3173_p4 = pnand %p3172_p3, %p3408_p5 }
 0x848   : > { %p3178_p9 = por %p3177_p11, %p3176_p8 }
 0x849   : > { %p3174_p7 = pneg %p3173_p4 }
 0x84b   : > { %p3179_p10 = pnand %p3178_p9, %p3174_p7 }
 0x84d   : > { %3182 = shalt.err (!%p3179_p10)
}
 0x84e   : > { %s3294_s17 = smov 128   ;;  %s3295_s23 = smov 8   ;;  %v2712_v31 = vld [vmem:[%s3916_s8] ss:$0 sm:$0xff]  ;;  %v2328_v16 = vld [vmem:[#allocation4] sm:$0xff] }
 0x84f   : > { %s3945_s10 = scalar_lea.sflag [#allocation7], %s3761_s30  ;;  %s2721_s21 = sshll.u32 %s3389_s29, 7  ;;  %v2336_v18 = vadd.f32 %v2712_v31, %v2328_v16 }
 0x850   : > { %3012 = dma.vmem_to_hbm [thread:$0]  (%p3408_p5), %s3785_s15, 256, %s3783_s20, %s3945_s10, %s3294_s17, %s3294_s17, %s3295_s23  }
 0x851   : > { %s3946_s14 = sshll.u32 %s3761_s30, 3  ;;  %s2487_s0 = sshll.u32 %s3764_s27, 4  ;;  %s3830_s0 = int_to_ptr.vmem [resolvable:$true] %s2487_s0 }
 0x852   : > { %s485_s24 = scalar_lea.vmem [#allocation9], %s3946_s14  ;;  %s3826_s3 = scalar_lea.hbm %s3920_s12, %s2721_s21 }
 0x853   : > { %s2474_s22 = sshll.u32 %s485_s24, 4  ;;  %s3947_s15 = sshll.u32 %s3389_s29, 8  ;;  %2337 = vst.msk [vmem:[%s485_s24] sm:$0xff] %vm513_vm1, %v2336_v18  ;;  %s3828_s22 = int_to_ptr.vmem [resolvable:$true] %s2474_s22 }
 0x854   : > { %s3837_s10 = scalar_lea.hbm %s3921_s13, %s3947_s15  ;;  %s3948_s27 = sand.u32 1, %s3389_s29  }
 0x855   : > { %s3842_s19 = scalar_lea.sflag [#allocation10], %s3948_s27  ;;  %s3183_s1 = scalar_lea.vmem %s3828_s22, 128 }
 0x856   : > { %p3184_p12 = scmp.ne.s32.totalorder %s3828_s22, %s3183_s1  ;;  %s3296_s2 = smov [#allocation9]  }
 0x857   : > { %s3187_s16 = sshll.u32 %s3296_s2, 4  ;;  %s3188_s16 = int_to_ptr.vmem [resolvable:$false] %s3187_s16 }
 0x858   : > { %p3185_p13 = pnand %p3184_p12, %p3408_p5  ;;  %s3189_s21 = scalar_lea.vmem %s3188_s16, 256 }
 0x859   : > { %p3190_p1 = scmp.lt.s32.totalorder %s3828_s22, %s3188_s16  ;;  %p3191_p2 = scmp.lt.s32.totalorder %s3189_s21, %s3183_s1 }
 0x85a   : > { %p3186_p0 = pneg %p3185_p13 }
 0x85b   : > { %p3192_p3 = por %p3191_p2, %p3190_p1 }
 0x85d   : > { %p3193_p4 = pnand %p3192_p3, %p3186_p0 }
 0x85f   : > { %3196 = shalt.err (!%p3193_p4)
}
 0x860   : > { %s3197_s29 = scalar_lea.hbm %s3826_s3, 128  ;;  %s3201_s15 = scalar_lea.hbm %s3920_s12, 256 }
 0x861   : > { %p3198_p7 = scmp.ne.s32.totalorder %s3826_s3, %s3197_s29  ;;  %p3202_p9 = scmp.lt.s32.totalorder %s3826_s3, %s3920_s12 }
 0x862   : > { %p3203_p10 = scmp.lt.s32.totalorder %s3201_s15, %s3197_s29 }
 0x863   : > { %p3199_p8 = pnand %p3198_p7, %p3408_p5 }
 0x864   : > { %p3204_p12 = por %p3203_p10, %p3202_p9 }
 0x865   : > { %p3200_p11 = pneg %p3199_p8 }
 0x867   : > { %p3205_p13 = pnand %p3204_p12, %p3200_p11 }
 0x869   : > { %3208 = shalt.err (!%p3205_p13)
}
 0x86a   : > { %3013 = dma.vmem_to_hbm [thread:$0]  (%p3408_p5), %s3828_s22, 128, %s3826_s3, %s3842_s19  }
 0x86b   : > { %s3209_s27 = scalar_lea.vmem %s3830_s0, 256  ;;  %s3297_s1 = smov [#allocation11]  }
 0x86c   : > { %p3210_p0 = scmp.ne.s32.totalorder %s3830_s0, %s3209_s27  ;;  %s3213_s2 = sshll.u32 %s3297_s1, 4  ;;  %s3214_s2 = int_to_ptr.vmem [resolvable:$false] %s3213_s2 }
 0x86d   : > { %s3215_s16 = scalar_lea.vmem %s3214_s2, 512  ;;  %p3216_p3 = scmp.lt.s32.totalorder %s3830_s0, %s3214_s2 }
 0x86e   : > { %p3211_p1 = pnand %p3210_p0, %p3408_p5  ;;  %p3217_p4 = scmp.lt.s32.totalorder %s3215_s16, %s3209_s27 }
 0x870   : > { %p3212_p2 = pneg %p3211_p1  ;;  %p3218_p7 = por %p3217_p4, %p3216_p3 }
 0x872   : > { %p3219_p8 = pnand %p3218_p7, %p3212_p2 }
 0x874   : > { %3222 = shalt.err (!%p3219_p8)
}
 0x875   : > { %s3223_s21 = scalar_lea.hbm %s3837_s10, 256  ;;  %s3227_s29 = scalar_lea.hbm %s3921_s13, 512 }
 0x876   : > { %p3224_p11 = scmp.ne.s32.totalorder %s3837_s10, %s3223_s21  ;;  %p3228_p12 = scmp.lt.s32.totalorder %s3837_s10, %s3921_s13 }
 0x877   : > { %p3229_p13 = scmp.lt.s32.totalorder %s3227_s29, %s3223_s21 }
 0x878   : > { %p3225_p9 = pnand %p3224_p11, %p3408_p5 }
 0x879   : > { %p3230_p0 = por %p3229_p13, %p3228_p12 }
 0x87a   : > { %p3226_p10 = pneg %p3225_p9 }
 0x87c   : > { %p3231_p1 = pnand %p3230_p0, %p3226_p10 }
 0x87e   : > { %3234 = shalt.err (!%p3231_p1)
}
 0x87f   : > { %3014 = dma.vmem_to_hbm [thread:$0]  (%p3408_p5), %s3830_s0, 256, %s3837_s10, %s3842_s19, %s3294_s17, %s3294_s17, %s3295_s23  }
 0x880 PF: > { %p3034_p2 = scmp.ge.s32.totalorder %s3277_s28, 2  ;;  %s2502_s20 = sand.u32 1, %s3265_s25  }
 0x881   : > { %s2503_s30 = scalar_lea.sflag [#allocation7], %s2502_s20 }
 0x882   : > { %p3023_p3 = pnand %p3034_p2, %p3412_p6 }
 0x884   : > { %p3024_p4 = pneg %p3023_p3 }
 0x886   : > { %3256 = dma.done.wait (%p3024_p4), %s2503_s30, 256  }
 0x887   : > { %3258 = vsyncadd (%p3024_p4), %s2503_s30, 4294967040  ;;  %s3950_s18 = sadd.s32 4294967294, %s3277_s28  }
 0x888   : > { %s2511_s27 = sand.u32 1, %s3950_s18  }
 0x889   : > { %s2512_s1 = scalar_lea.sflag [#allocation10], %s2511_s27 }
 0x88a   : > { %3260 = dma.done.wait (%p3024_p4), %s2512_s1, 384  }
 0x88b   : > { %3262 = vsyncadd (%p3024_p4), %s2512_s1, 4294966912  ;;  %s3951_s28 = sld [smem:[#allocation16_spill]]  ;;  %s3954_s25 = smov %s3269_s26 }
 0x88c   : > { %s3952_s0 = sld [smem:[#allocation15_spill]] }
 0x88d   : > { %s3953_s27 = sld [smem:[#allocation17_spill]] }
 0x891   : > { %p28_p5 = scmp.ge.s32.totalorder %s3951_s28, 4  }
 0x892   : > { %s3955_s26 = smov %s3952_s0 }
 0x893   :  { %30 = sbr.rel (!%p28_p5) target bundleno = 12 (0xc), region = 142 }
 0x898   :  { %2526 = vsyncpa [#allocation6], 1 }
 0x899   :  { %2528 = vsyncpa [#allocation6 + $0x1], 1 }
 0x89a   :  { %2529 = vsyncpa [#allocation7], 1 }
 0x89b   :  { %2531 = vsyncpa [#allocation7 + $0x1], 1 }
 0x89c   :  { %2532 = vsyncpa [#allocation10], 1 }
 0x89d   :  { %2534 = vsyncpa [#allocation10 + $0x1], 1 }

// kernel: dual_attention_multires.1
= control target key start
LH: loop header
LB: loop body
LE: loop exit
PB: predicated region body
PF: predicated region fallthrough
CT: control target
= control target key end

     0   :  { %s3908_s0 = inlined_call_operand.vmem [shape: f32[2,16,32], index: 0, kind: input, shape index: {}]   ;;  %s3909_s1 = inlined_call_operand.vmem [shape: f32[2,8,32], index: 1, kind: input, shape index: {}]   ;;  %s3910_s2 = inlined_call_operand.vmem [shape: f32[2,16,32], index: 2, kind: input, shape index: {}]   ;;  %s3911_s3 = inlined_call_operand.vmem [shape: f32[32,96], index: 3, kind: input, shape index: {}]   ;;  %s3912_s4 = inlined_call_operand.vmem [shape: f32[32,96], index: 4, kind: input, shape index: {}]   ;;  %s3913_s5 = inlined_call_operand.vmem [shape: f32[32,32], index: 5, kind: input, shape index: {}]   ;;  %s3914_s6 = inlined_call_operand.vmem [shape: f32[1,32], index: 6, kind: input, shape index: {}]   ;;  %s3915_s7 = inlined_call_operand.vmem [shape: f32[32,32], index: 7, kind: input, shape index: {}]   ;;  %s3916_s8 = inlined_call_operand.vmem [shape: f32[1,32], index: 8, kind: input, shape index: {}]   ;;  %s3917_s9 = inlined_call_operand.vmem [shape: f32[32,32], index: 9, kind: input, shape index: {}]   ;;  %s3918_s10 = inlined_call_operand.hbm [shape: f32[1,32], index: 10, kind: input, shape index: {}]   ;;  %s3919_s11 = inlined_call_operand.hbm [shape: f32[2,16,32], index: 11, kind: output, shape index: {0}]   ;;  %s3920_s12 = inlined_call_operand.hbm [shape: f32[2,8,32], index: 12, kind: output, shape index: {1}]   ;;  %s3921_s13 = inlined_call_operand.hbm [shape: f32[2,16,32], index: 13, kind: output, shape index: {2}]  }
   0x1   :  { %3928 = sst [smem:[#allocation19_spill]] %s3908_s0 }
   0x2   :  { %3929 = sst [smem:[#allocation20_spill]] %s3909_s1 }
   0x3   :  { %3930 = sst [smem:[#allocation21_spill]] %s3910_s2 }
   0x4   :  { %3931 = sst [smem:[#allocation22_spill]] %s3911_s3 }
   0x5   :  { %3932 = sst [smem:[#allocation23_spill]] %s3918_s10 }
   0x6   :  { %19 = vsyncpa [#allocation6], 0 }
   0x7   :  { %20 = vsyncpa [#allocation7], 0 }
   0x8   :  { %22 = vsyncpa [#allocation7 + $0x1], 0 }
   0x9   :  { %23 = vsyncpa [#allocation10], 0 }
   0xa   :  { %25 = vsyncpa [#allocation10 + $0x1], 0  ;;  %s3368_s25 = smov 0   ;;  %s3370_s26 = smov 0  }
   0xb   :  { %s3372_s27 = smov 0   ;;  %s3374_s28 = smov 0  }
   0xc LB: > { %3933 = sst [smem:[#allocation15_spill]] %s3273_s27  ;;  %s3389_s29 = sadd.s32 4294967295, %s3277_s28   ;;  %s3277_s28 = sphi %s3374_s28, %s3951_s28   ;;  %s3273_s27 = sphi %s3372_s27, %s3953_s27   ;;  %s3269_s26 = sphi %s3370_s26, %s3955_s26   ;;  %s3265_s25 = sphi %s3368_s25, %s3954_s25  }
   0xd   : > { %s3922_s30 = sadd.s32 4294967294, %s3277_s28   ;;  %s3393_s14 = sadd.s32 1, %s3277_s28  }
   0xe   : > { %3934 = sst [smem:[#allocation16_spill]] %s3393_s14  ;;  %s284_s15 = sadd.s32 1, %s3273_s27 }
   0xf   : > { %s281_s16 = ssub.s32 %s3277_s28, %s3393_s14  ;;  %p294_p0 = scmp.ne.s32.totalorder %s3273_s27, %s3269_s26 }
  0x10   : > { %p282_p1 = scmp.eq.s32.totalorder %s281_s16, 0  ;;  %p295_p2 = scmp.eq.s32.totalorder %s3389_s29, 1 }
  0x11   : > { %p300_p3 = scmp.ne.s32.totalorder %s3269_s26, %s3265_s25  ;;  %p301_p4 = scmp.eq.s32.totalorder %s3922_s30, 1 }
  0x12   : > { %s3406_s17 = scalar_select %p282_p1, %s3273_s27, %s284_s15  }
  0x13   : > { %p3408_p5 = por %p295_p2, %p294_p0  ;;  %p3412_p6 = por %p301_p4, %p300_p3 }
  0x14   : > { %3935 = sst [smem:[#allocation17_spill]] %s3406_s17  ;;  %p2647_p7 = scmp.ge.s32.totalorder %s3277_s28, 1 }
  0x15   : > { %s3937_s19 = scalar_select %p3412_p6, 1, 0 }
  0x16   : > { %p360_p8 = scmp.lt.s32.totalorder %s3277_s28, 3  ;;  %p3032_p9 = scmp.eq.s32.totalorder %s3389_s29, 0 }
  0x17   : > { %3938 = sst [smem:[#allocation18_spill]] %s3937_s19  ;;  %s3279_s21 = smov [#allocation5]  }
  0x18   : > { %p3419_p10 = pnand %p2647_p7, %p360_p8  ;;  %s394_s22 = sshll.u32 %s3279_s21, 4  ;;  %s395_s22 = int_to_ptr.vmem [resolvable:$true] %s394_s22 }
  0x19   : > { %s3142_s23 = scalar_lea.vmem %s395_s22, 16  ;;  %s3149_s24 = scalar_lea.vmem %s395_s22, 32 }
  0x1a   : > { %p3018_p11 = pneg %p3419_p10  ;;  %p3143_p0 = scmp.ne.s32.totalorder %s395_s22, %s3142_s23 }
  0x1b   : > { %p3150_p3 = scmp.lt.s32.totalorder %s395_s22, %s395_s22  ;;  %p3151_p4 = scmp.lt.s32.totalorder %s3149_s24, %s3142_s23 }
  0x1c   : > { %p3019_p12 = pnand %p3032_p9, %p3018_p11 }
  0x1d   : > { %p3152_p7 = por %p3151_p4, %p3150_p3 }
  0x1e   : > { %p3133_p13 = pneg %p3019_p12 }
  0x20   : > { %p3145_p1 = pnand %p3143_p0, %p3133_p13 }
  0x22   : > { %p3146_p2 = pneg %p3145_p1 }
  0x24   : > { %p3153_p8 = pnand %p3152_p7, %p3146_p2 }
  0x26   : > { %3156 = shalt.err (!%p3153_p8)
}
  0x27   : > { %s3940_s10 = sld [smem:[#allocation23_spill]] }
  0x29   : > { %430 = sbr.rel (%p3419_p10) target bundleno = 2176 (0x880), region = 64 }
  0x2d   : > { %3021 = dma.hbm_to_vmem [thread:$0]  (!%p3019_p12), %s3940_s10, 16, %s395_s22, [#allocation6]  }
  0x2e   : > { %3252 = dma.done.wait (%p3032_p9), [#allocation6], 16  }
  0x2f   : > { %3254 = vsyncadd (%p3032_p9), [#allocation6], 4294967280  ;;  %p493_p11 = scmp.lt.s32.totalorder %s3389_s29, 1  ;;  %v3280_v0 = vmov 0.0   ;;  %vm3281_vm0 = vmmov 0   ;;  %s3941_s3 = sld [smem:[#allocation22_spill]] }
  0x30   : > { %2826 = vmatprep.subr.mxu1 %v3280_v0  ;;  %2834 = vmatprep.mubr.msk.f32.mxu1 %vm3281_vm0, %v3280_v0  ;;  %v602_v2 = vld [vmem:[%s3912_s4 + $0x18] sm:$0xff]  ;;  %v601_v4 = vld [vmem:[%s3912_s4 + $0x10] sm:$0xff]  ;;  %v600_v6 = vld [vmem:[%s3912_s4 + $0x8] sm:$0xff]  ;;  %s3942_s0 = sld [smem:[#allocation19_spill]]  ;;  %vm513_vm1 = vcmask 261120   ;;  %vm595_vm2 = vcmask 785408  }
  0x31   : > { %s3441_s21 = scalar_select %p493_p11, %s3389_s29, 1  ;;  %2827 = vmatpush3.msra.mxu1 %v602_v2  ;;  %v599_v8 = vld [vmem:[%s3912_s4] sm:$0xff]  ;;  %vm692_vm3 = vcmask 64512   ;;  %vm788_vm4 = vcmask 195584  }
  0x32   : > { %2828 = vmatprep.subr.mxu1 %v3280_v0  ;;  %s3943_s1 = sld [smem:[#allocation20_spill]]  ;;  %s3285_s30 = smov 64  }
  0x33   : > { %s2726_s20 = sshll.u32 %s3441_s21, 4  ;;  %s2657_s10 = sshll.u32 %s3441_s21, 3  ;;  %2829 = vmatpush3.msra.mxu1 %v601_v4  ;;  %v920_v4 = vld [vmem:[%s3913_s5] sm:$0xff] }
  0x34   : > { %2830 = vmatprep.subr.mxu1 %v3280_v0  ;;  %s3286_s16 = smov 56   ;;  %s3287_s27 = smov 80  }
  0x35   : > { %v512_v1 = vld [vmem:[%s3941_s3 + $0x18] sm:$0xff]  ;;  %v511_v3 = vld [vmem:[%s3941_s3 + $0x10] sm:$0xff]  ;;  %v510_v5 = vld [vmem:[%s3941_s3 + $0x8] sm:$0xff]  ;;  %2831 = vmatpush3.msra.mxu1 %v600_v6  ;;  %s3288_s17 = smov 112   ;;  %s3289_s22 = smov 48  }
  0x36   : > { %2815 = vmatprep.subr.mxu0 %v512_v1  ;;  %s497_s14 = scalar_lea.vmem %s3942_s0, %s2726_s20  ;;  %v509_v7 = vld [vmem:[%s3941_s3] sm:$0xff]  ;;  %2832 = vmatprep.subr.mxu1 %v3280_v0  ;;  %s3290_s15 = smov 72  }
  0x37   : > { %2816 = vmatpush3.msra.mxu0 %v512_v1  ;;  %v507_v9 = vld [vmem:[%s497_s14] sm:$0xff]  ;;  %v508_v10 = vld [vmem:[%s497_s14 + $0x8] sm:$0xff]  ;;  %2833 = vmatpush3.msra.mxu1 %v599_v8  ;;  %s3283_s14 = smov 88   ;;  %s3944_s2 = sld [smem:[#allocation21_spill]] }
  0x38   : > { %2817 = vmatprep.subr.mxu0 %v511_v3  ;;  %s501_s19 = scalar_lea.vmem %s3943_s1, %s2657_s10  ;;  %2823 = vmatprep.mubr.msk.f32.mxu0 %vm513_vm1, %v507_v9  ;;  %s3282_s10 = smov 96  }
  0x39   : > { %2818 = vmatpush3.msra.mxu0 %v511_v3  ;;  %v598_v11 = vld [vmem:[%s501_s19] sm:$0xff]  ;;  %2852 = vmatprep.subr.mxu1 %v3280_v0  ;;  %s3284_s19 = smov 120   ;;  %s3927_s23 = sshll.u32 %s3389_s29, 8 }
  0x3a   : > { %2819 = vmatprep.subr.mxu0 %v510_v5  ;;  %2835 = vmatmul.mubr.msk.f32.vlgmr.msra.gmra.mxu1 %vm513_vm1, %v598_v11 }
  0x3b   : > { %2820 = vmatpush3.msra.mxu0 %v510_v5  ;;  %2858 = vmatprep.mubr.msk.f32.mxu1 %vm3281_vm0, %v3280_v0 }
  0x3c   : > { %2821 = vmatprep.subr.mxu0 %v509_v7 }
  0x3d   : > { %2822 = vmatpush3.msra.mxu0 %v509_v7 }
  0x3e   : > { %2824 = vmatmul.mubr.msk.f32.vlgmr.msra.gmra.mxu0 %vm513_vm1, %v508_v10  ;;  %2837 = vmatprep.subr.mxu0 %v3280_v0 }
  0x3f   : > { %2843 = vmatprep.mubr.msk.f32.mxu0 %vm3281_vm0, %v3280_v0 }
  0xfa   : > { %v672_v12 = vpop.f32.mrf.mxu1 }
  0xfb   : > { %676 = vst.msk [vmem:[#allocation2 + $0x10] sm:$0xff] %vm595_vm2, %v672_v12 }
  0xfc   : > { %v2836_v14 = vpop.f32.mrf.mxu1 }
  0xfe   : > { %v2825_v13 = vpop.f32.mrf.mxu0 }
  0xff   : > { %597 = vst.msk [vmem:[#allocation2 + $0x8] sm:$0xff] %vm595_vm2, %v2825_v13 }
 0x100   : > { %v586_v15 = vpop.f32.mrf.mxu0 }
 0x101   : > { %596 = vst.msk [vmem:[#allocation2] sm:$0xff] %vm595_vm2, %v586_v15 }
 0x102   : > { %v3489_v16 = vld [vmem:[#allocation2 + $0x10] sm:$0xff] }
 0x103   : > { %690 = vrot.lane.b32.xlu0 %v3489_v16, %s3282_s10  ;;  %v3509_v21 = vmul.f32 0.35355338, %v3489_v16 }
 0x106   : > { %v3494_v18 = vld [vmem:[#allocation2 + $0x8] sm:$0xff] }
 0x107   : > { %688 = vrot.lane.b32.xlu0 %v3494_v18, %s3282_s10  ;;  %v3505_v20 = vmul.f32 0.35355338, %v3494_v18 }
 0x108   : > { %v3492_v17 = vld [vmem:[#allocation2] sm:$0xff] }
 0x109   : > { %686 = vrot.lane.b32.xlu1 %v3492_v17, %s3282_s10  ;;  %v3501_v19 = vmul.f32 0.35355338, %v3492_v17  ;;  %s3292_s10 = smov 40  }
 0x10b   : > { %1099 = vrot.lane.b32.xlu0 %v3494_v18, %s3283_s14 }
 0x10d   : > { %1101 = vrot.lane.b32.xlu1 %v3489_v16, %s3283_s14 }
 0x10f   : > { %1088 = vrot.lane.b32.xlu0 %v3501_v19, %s3284_s19 }
 0x111   : > { %1097 = vrot.lane.b32.xlu1 %v3492_v17, %s3283_s14 }
 0x113   : > { %1092 = vrot.lane.b32.xlu0 %v3509_v21, %s3284_s19 }
 0x115   : > { %1090 = vrot.lane.b32.xlu1 %v3505_v20, %s3284_s19 }
 0x119   : > { %820 = vrot.lane.b32.xlu1 %v3489_v16, %s3285_s30 }
 0x175   : > { %v691_v22 = vpop.permute.xlu0 %690 }
 0x176   : > { %2838 = vmatpush3.xpose.msk.msra.mxu0 %vm692_vm3, %v691_v22 }
 0x177   : > { %2839 = vmatprep.subr.mxu0 %v3280_v0 }
 0x179   : > { %v689_v24 = vpop.permute.xlu0 %688 }
 0x17a   : > { %2840 = vmatpush3.xpose.msk.msra.mxu0 %vm692_vm3, %v689_v24 }
 0x17b   : > { %v687_v23 = vpop.permute.xlu1 %686  ;;  %2841 = vmatprep.subr.mxu0 %v3280_v0 }
 0x17d   : > { %v1100_v28 = vpop.permute.xlu0 %1099 }
 0x17e   : > { %2842 = vmatpush3.xpose.msk.msra.mxu0 %vm692_vm3, %v687_v23 }
 0x17f   : > { %v1102_v25 = vpop.permute.xlu1 %1101  ;;  %2877 = vmatprep.subr.mxu0 %v3280_v0 }
 0x181   : > { %2844 = vmatmul.mubr.msk.f32.vlgmr.msra.gmra.mxu0 %vm692_vm3, %v3501_v19  ;;  %v1089_v30 = vpop.permute.xlu0 %1088 }
 0x182   : > { %2878 = vmatpush3.xpose.msk.msra.mxu0 %vm692_vm3, %v1102_v25  ;;  %2846 = vmatprep.mubr.msk.f32.mxu0 %vm3281_vm0, %v3280_v0 }
 0x183   : > { %v1098_v26 = vpop.permute.xlu1 %1097  ;;  %2879 = vmatprep.subr.mxu0 %v3280_v0 }
 0x185   : > { %2847 = vmatmul.mubr.msk.f32.gmra.mxu0 %vm692_vm3, %v3505_v20  ;;  %v1093_v31 = vpop.permute.xlu0 %1092 }
 0x186   : > { %2880 = vmatpush3.xpose.msk.msra.mxu0 %vm692_vm3, %v1100_v28  ;;  %2849 = vmatprep.mubr.msk.f32.mxu0 %vm3281_vm0, %v3280_v0 }
 0x187   : > { %v1091_v27 = vpop.permute.xlu1 %1090  ;;  %2881 = vmatprep.subr.mxu0 %v3280_v0 }
 0x189   : > { %2850 = vmatmul.mubr.msk.f32.gmra.mxu0 %vm692_vm3, %v3509_v21 }
 0x18a   : > { %2882 = vmatpush3.xpose.msk.msra.mxu0 %vm692_vm3, %v1098_v26  ;;  %2883 = vmatprep.mubr.msk.f32.mxu0 %vm3281_vm0, %v3280_v0 }
 0x18b   : > { %v821_v29 = vpop.permute.xlu1 %820 }
 0x18c   : > { %2853 = vmatpush3.msra.mxu1 %v821_v29 }
 0x18d   : > { %2854 = vmatprep.subr.mxu1 %v3280_v0  ;;  %2884 = vmatmul.mubr.msk.f32.vlgmr.msra.gmra.mxu0 %vm692_vm3, %v1089_v30 }
 0x18e   : > { %2886 = vmatprep.mubr.msk.f32.mxu0 %vm3281_vm0, %v3280_v0 }
 0x191   : > { %2887 = vmatmul.mubr.msk.f32.gmra.mxu0 %vm692_vm3, %v1091_v27 }
 0x192   : > { %2889 = vmatprep.mubr.msk.f32.mxu0 %vm3281_vm0, %v3280_v0 }
 0x195   : > { %2890 = vmatmul.mubr.msk.f32.gmra.mxu0 %vm692_vm3, %v1093_v31 }
 0x241   : > { %v774_v32 = vpop.f32.mrf.mxu0 }
 0x242   : > { %v789_v33 = vsel %vm788_vm4, %v774_v32, -inf }
 0x243   : > { %790 = vmax.xlane.f32.xlu1 %v789_v33  ;;  %v2845_v34 = vpop.f32.mrf.mxu0 }
 0x245   : > { %v779_v35 = vpop.f32.mrf.mxu0 }
 0x246   : > { %v792_v36 = vsel %vm788_vm4, %v779_v35, -inf }
 0x247   : > { %793 = vmax.xlane.f32.xlu0 %v792_v36  ;;  %v2848_v37 = vpop.f32.mrf.mxu0  ;;  %v1002_v36 = vld [vmem:[%s3915_s7] sm:$0xff] }
 0x249   : > { %v784_v38 = vpop.f32.mrf.mxu0 }
 0x24a   : > { %v795_v39 = vsel %vm788_vm4, %v784_v38, -inf }
 0x24b   : > { %796 = vmax.xlane.f32.xlu0 %v795_v39  ;;  %v2851_v40 = vpop.f32.mrf.mxu0 }
 0x24d   : > { %v3549_v41 = vpop.f32.mrf.mxu0 }
 0x24e   : > { %v1195_v47 = vsel %vm788_vm4, %v3549_v41, -inf }
 0x24f   : > { %v2885_v42 = vpop.f32.mrf.mxu0 }
 0x251   : > { %v3551_v43 = vpop.f32.mrf.mxu0 }
 0x252   : > { %v1198_v49 = vsel %vm788_vm4, %v3551_v43, -inf }
 0x253   : > { %v2888_v44 = vpop.f32.mrf.mxu0 }
 0x254   : > { %816 = vrot.lane.b32.xlu1 %v3492_v17, %s3285_s30 }
 0x255   : > { %v3555_v45 = vpop.f32.mrf.mxu0 }
 0x256   : > { %v1201_v48 = vsel %vm788_vm4, %v3555_v45, -inf }
 0x257   : > { %v2891_v46 = vpop.f32.mrf.mxu0 }
 0x261   : > { %818 = vrot.lane.b32.xlu0 %v3494_v18, %s3285_s30  ;;  %s3761_s30 = sand.u32 1, %s3269_s26  }
 0x278   : > { %1196 = vmax.xlane.f32.xlu1 %v1195_v47 }
 0x27c   : > { %1202 = vmax.xlane.f32.xlu1 %v1201_v48 }
 0x280   : > { %1199 = vmax.xlane.f32.xlu0 %v1198_v49 }
 0x2cc   : > { %v791_v50 = vpop.xlane.xlu1 %790 }
 0x2cd   : > { %v798_v51 = vsub.f32 %v774_v32, %v791_v50 }
 0x2cf   : > { %v801_v52 = vmul.f32 1.442695, %v798_v51  ;;  %v1326_v51 = vld [vmem:[%s3913_s5 + $0x8] sm:$0xff] }
 0x2d0   : > { %v794_v53 = vpop.xlane.xlu0 %793  ;;  %v817_v60 = vpop.permute.xlu1 %816  ;;  %2907 = vmatprep.subr.mxu0 %v1326_v51 }
 0x2d1   : > { %3083 = vpow2.f32 %v801_v52  ;;  %v799_v54 = vsub.f32 %v779_v35, %v794_v53  ;;  %2908 = vmatpush3.msra.mxu0 %v1326_v51 }
 0x2d2   : > { %2912 = vmatprep.subr.mxu0 %v3280_v0 }
 0x2d3   : > { %v803_v55 = vmul.f32 1.442695, %v799_v54 }
 0x2d4   : > { %v797_v56 = vpop.xlane.xlu0 %796 }
 0x2d5   : > { %3085 = vpow2.f32 %v803_v55  ;;  %v800_v57 = vsub.f32 %v784_v38, %v797_v56 }
 0x2d7   : > { %v805_v58 = vmul.f32 1.442695, %v800_v57 }
 0x2d8   : > { %v819_v59 = vpop.permute.xlu0 %818 }
 0x2d9   : > { %3087 = vpow2.f32 %v805_v58  ;;  %2855 = vmatpush3.msra.mxu1 %v819_v59 }
 0x2da   : > { %2856 = vmatprep.subr.mxu1 %v3280_v0 }
 0x2db   : > { %2857 = vmatpush3.msra.mxu1 %v817_v60 }
 0x2dc   : > { %2867 = vmatprep.subr.mxu1 %v920_v4 }
 0x2de   : > { %v3084_v61 = vpop.eup %3083 }
 0x2df   : > { %2859 = vmatmul.mubr.msk.f32.vlgmr.msra.gmra.mxu1 %vm788_vm4, %v3084_v61  ;;  %v807_v62 = vsel %vm788_vm4, %v3084_v61, 0.0 }
 0x2e0   : > { %808 = vadd.xlane.f32.xlu1 %v807_v62  ;;  %2861 = vmatprep.mubr.msk.f32.mxu1 %vm3281_vm0, %v3280_v0 }
 0x2e1   : > { %2868 = vmatpush3.msra.mxu1 %v920_v4 }
 0x2e2   : > { %v3086_v63 = vpop.eup %3085  ;;  %2872 = vmatprep.subr.mxu1 %v3280_v0 }
 0x2e3   : > { %2862 = vmatmul.mubr.msk.f32.gmra.mxu1 %vm788_vm4, %v3086_v63  ;;  %v810_v1 = vsel %vm788_vm4, %v3086_v63, 0.0 }
 0x2e4   : > { %811 = vadd.xlane.f32.xlu0 %v810_v1  ;;  %2864 = vmatprep.mubr.msk.f32.mxu1 %vm3281_vm0, %v3280_v0 }
 0x2e6   : > { %v3088_v2 = vpop.eup %3087 }
 0x2e7   : > { %2865 = vmatmul.mubr.msk.f32.gmra.mxu1 %vm788_vm4, %v3088_v2  ;;  %v813_v3 = vsel %vm788_vm4, %v3088_v2, 0.0 }
 0x2e8   : > { %814 = vadd.xlane.f32.xlu0 %v813_v3 }
 0x2f1   : > { %1224 = vrot.lane.b32.xlu1 %v3494_v18, %s3286_s16 }
 0x2f5   : > { %1222 = vrot.lane.b32.xlu1 %v3492_v17, %s3286_s16 }
 0x2f9   : > { %1511 = vrot.lane.b32.xlu1 %v3494_v18, %s3287_s27 }
 0x2fd   : > { %1500 = vrot.lane.b32.xlu1 %v3501_v19, %s3288_s17 }
 0x2fe   : > { %1226 = vrot.lane.b32.xlu0 %v3489_v16, %s3286_s16  ;;  %s2652_s16 = sshll.u32 %s3761_s30, 4 }
 0x2ff   : > { %s478_s24 = scalar_lea.vmem [#allocation8], %s2652_s16 }
 0x301   : > { %1504 = vrot.lane.b32.xlu1 %v3509_v21, %s3288_s17  ;;  %v1197_v5 = vpop.xlane.xlu1 %1196 }
 0x302   : > { %1513 = vrot.lane.b32.xlu0 %v3489_v16, %s3287_s27  ;;  %v1204_v7 = vsub.f32 %v3549_v41, %v1197_v5 }
 0x304   : > { %v1207_v10 = vmul.f32 1.442695, %v1204_v7 }
 0x305   : > { %1638 = vrot.lane.b32.xlu1 %v3489_v16, %s3289_s22  ;;  %v1203_v9 = vpop.xlane.xlu1 %1202 }
 0x306   : > { %1509 = vrot.lane.b32.xlu0 %v3492_v17, %s3287_s27  ;;  %v1206_v11 = vsub.f32 %v3555_v45, %v1203_v9  ;;  %3089 = vpow2.f32 %v1207_v10  ;;  %s506_s27 = scalar_lea.vmem %s3944_s2, %s2726_s20  ;;  %s3783_s20 = scalar_lea.hbm %s3919_s11, %s3927_s23 }
 0x308   : > { %v1211_v13 = vmul.f32 1.442695, %v1206_v11 }
 0x309   : > { %1634 = vrot.lane.b32.xlu1 %v3492_v17, %s3289_s22  ;;  %v1200_v6 = vpop.xlane.xlu0 %1199 }
 0x30a   : > { %1502 = vrot.lane.b32.xlu0 %v3505_v20, %s3288_s17  ;;  %v1205_v8 = vsub.f32 %v3551_v43, %v1200_v6  ;;  %v1408_v6 = vld [vmem:[%s3915_s7 + $0x8] sm:$0xff]  ;;  %s3291_s17 = smov 104  }
 0x30c   : > { %v1209_v12 = vmul.f32 1.442695, %v1205_v8 }
 0x30e   : > { %1636 = vrot.lane.b32.xlu0 %v3494_v18, %s3289_s22  ;;  %3091 = vpow2.f32 %v1209_v12  ;;  %s3293_s22 = smov [#allocation8]  }
 0x30f   : > { %3093 = vpow2.f32 %v1211_v13  ;;  %s3161_s21 = sshll.u32 %s3293_s22, 4  ;;  %s3162_s21 = int_to_ptr.vmem [resolvable:$false] %s3161_s21 }
 0x310   : > { %s3163_s14 = scalar_lea.vmem %s3162_s21, 512 }
 0x313   : > { %v3090_v14 = vpop.eup %3089 }
 0x314   : > { %v1213_v22 = vsel %vm788_vm4, %v3090_v14, 0.0 }
 0x31b   : > { %v3092_v15 = vpop.eup %3091 }
 0x31c   : > { %v1216_v23 = vsel %vm788_vm4, %v3092_v15, 0.0  ;;  %v3094_v24 = vpop.eup %3093 }
 0x31d   : > { %v1219_v25 = vsel %vm788_vm4, %v3094_v24, 0.0 }
 0x32d   : > { %1214 = vadd.xlane.f32.xlu0 %v1213_v22  ;;  %1217 = vadd.xlane.f32.xlu1 %v1216_v23 }
 0x331   : > { %1220 = vadd.xlane.f32.xlu0 %v1219_v25 }
 0x33e   : > { %1925 = vrot.lane.b32.xlu1 %v3489_v16, %s3290_s15 }
 0x369   : > { %v809_v26 = vpop.xlane.xlu1 %808 }
 0x36a   : > { %3095 = vrcp.f32 %v809_v26 }
 0x36d   : > { %v812_v27 = vpop.xlane.xlu0 %811  ;;  %v1225_v40 = vpop.permute.xlu1 %1224 }
 0x36e   : > { %3097 = vrcp.f32 %v812_v27 }
 0x371   : > { %v815_v28 = vpop.xlane.xlu0 %814  ;;  %v1223_v44 = vpop.permute.xlu1 %1222 }
 0x372   : > { %3099 = vrcp.f32 %v815_v28 }
 0x375   : > { %v1227_v43 = vpop.permute.xlu0 %1226  ;;  %v1512_v46 = vpop.permute.xlu1 %1511 }
 0x377   : > { %v3096_v29 = vpop.eup %3095 }
 0x379   : > { %v1514_v45 = vpop.permute.xlu0 %1513  ;;  %v1501_v48 = vpop.permute.xlu1 %1500 }
 0x37b   : > { %v3098_v33 = vpop.eup %3097 }
 0x37d   : > { %v1510_v47 = vpop.permute.xlu0 %1509  ;;  %v1505_v50 = vpop.permute.xlu1 %1504 }
 0x37f   : > { %v3100_v38 = vpop.eup %3099 }
 0x381   : > { %v1503_v49 = vpop.permute.xlu0 %1502  ;;  %v1639_v52 = vpop.permute.xlu1 %1638 }
 0x385   : > { %v1637_v53 = vpop.permute.xlu0 %1636  ;;  %v1635_v54 = vpop.permute.xlu1 %1634 }
 0x39f   : > { %v900_v30 = vpop.f32.mrf.mxu1 }
 0x3a0   : > { %v917_v31 = vmul.f32 %v3096_v29, %v900_v30 }
 0x3a1   : > { %v2860_v32 = vpop.f32.mrf.mxu1 }
 0x3a2   : > { %2869 = vmatprep.mubr.msk.f32.mxu1 %vm692_vm3, %v917_v31 }
 0x3a3   : > { %v905_v34 = vpop.f32.mrf.mxu1 }
 0x3a4   : > { %v918_v35 = vmul.f32 %v3098_v33, %v905_v34 }
 0x3a5   : > { %v2863_v37 = vpop.f32.mrf.mxu1 }
 0x3a6   : > { %2870 = vmatmul.mubr.msk.f32.vlgmr.msra.gmra.mxu1 %vm692_vm3, %v918_v35 }
 0x3a7   : > { %v910_v39 = vpop.f32.mrf.mxu1  ;;  %2873 = vmatpush3.msra.mxu1 %v1002_v36  ;;  %2874 = vmatprep.mubr.msk.f32.mxu1 %vm3281_vm0, %v3280_v0 }
 0x3a8   : > { %v919_v41 = vmul.f32 %v3100_v38, %v910_v39  ;;  %2892 = vmatprep.subr.mxu1 %v3280_v0 }
 0x3a9   : > { %v2866_v42 = vpop.f32.mrf.mxu1 }
 0x3aa   : > { %2875 = vmatmul.mubr.msk.f32.vlgmr.msra.gmra.mxu1 %vm692_vm3, %v919_v41 }
 0x3ab   : > { %2893 = vmatpush3.msra.mxu1 %v1227_v43  ;;  %2898 = vmatprep.mubr.msk.f32.mxu1 %vm3281_vm0, %v3280_v0 }
 0x3ac   : > { %2894 = vmatprep.subr.mxu1 %v3280_v0 }
 0x3ad   : > { %2895 = vmatpush3.msra.mxu1 %v1225_v40 }
 0x3ae   : > { %2896 = vmatprep.subr.mxu1 %v3280_v0 }
 0x3af   : > { %2897 = vmatpush3.msra.mxu1 %v1223_v44 }
 0x3b0   : > { %2899 = vmatmul.mubr.msk.f32.vlgmr.msra.gmra.mxu1 %vm788_vm4, %v3090_v14  ;;  %2917 = vmatprep.subr.mxu1 %v3280_v0 }
 0x3b1   : > { %2918 = vmatpush3.xpose.msk.msra.mxu1 %vm692_vm3, %v1514_v45  ;;  %2901 = vmatprep.mubr.msk.f32.mxu1 %vm3281_vm0, %v3280_v0 }
 0x3b2   : > { %2919 = vmatprep.subr.mxu1 %v3280_v0 }
 0x3b4   : > { %2902 = vmatmul.mubr.msk.f32.gmra.mxu1 %vm788_vm4, %v3092_v15 }
 0x3b5   : > { %2920 = vmatpush3.xpose.msk.msra.mxu1 %vm692_vm3, %v1512_v46  ;;  %2904 = vmatprep.mubr.msk.f32.mxu1 %vm3281_vm0, %v3280_v0 }
 0x3b6   : > { %2921 = vmatprep.subr.mxu1 %v3280_v0  ;;  %v1215_v55 = vpop.xlane.xlu0 %1214  ;;  %v1218_v56 = vpop.xlane.xlu1 %1217 }
 0x3b7   : > { %3101 = vrcp.f32 %v1215_v55  ;;  %v1738_v55 = vld [vmem:[%s3913_s5 + $0x10] sm:$0xff] }
 0x3b8   : > { %2905 = vmatmul.mubr.msk.f32.gmra.mxu1 %vm788_vm4, %v3094_v24  ;;  %3103 = vrcp.f32 %v1218_v56 }
 0x3b9   : > { %2922 = vmatpush3.xpose.msk.msra.mxu1 %vm692_vm3, %v1510_v47  ;;  %2923 = vmatprep.mubr.msk.f32.mxu1 %vm3281_vm0, %v3280_v0 }
 0x3ba   : > { %v1221_v58 = vpop.xlane.xlu0 %1220  ;;  %v1926_v27 = vpop.permute.xlu1 %1925  ;;  %2947 = vmatprep.subr.mxu1 %v1738_v55 }
 0x3bb   : > { %3105 = vrcp.f32 %v1221_v58 }
 0x3bc   : > { %2924 = vmatmul.mubr.msk.f32.vlgmr.msra.gmra.mxu1 %vm692_vm3, %v1501_v48 }
 0x3bd   : > { %2926 = vmatprep.mubr.msk.f32.mxu1 %vm3281_vm0, %v3280_v0  ;;  %2948 = vmatpush3.msra.mxu1 %v1738_v55 }
 0x3be   : > { %2952 = vmatprep.subr.mxu1 %v3280_v0 }
 0x3c0   : > { %2927 = vmatmul.mubr.msk.f32.gmra.mxu1 %vm692_vm3, %v1503_v49 }
 0x3c1   : > { %2929 = vmatprep.mubr.msk.f32.mxu1 %vm3281_vm0, %v3280_v0 }
 0x3c4   : > { %2930 = vmatmul.mubr.msk.f32.gmra.mxu1 %vm692_vm3, %v1505_v50  ;;  %v3102_v62 = vpop.eup %3101 }
 0x3c5   : > { %v3104_v3 = vpop.eup %3103 }
 0x3c8   : > { %v3106_v8 = vpop.eup %3105 }
 0x466   : > { %v2871_v57 = vpop.f32.mrf.mxu1 }
 0x467   : > { %1077 = vst.msk [vmem:[#allocation3 + $0x8] sm:$0xff] %vm513_vm1, %v2871_v57 }
 0x468   : > { %v993_v59 = vpop.f32.mrf.mxu1 }
 0x469   : > { %1076 = vst.msk [vmem:[#allocation3] sm:$0xff] %vm513_vm1, %v993_v59 }
 0x46a   : > { %v1072_v60 = vpop.f32.mrf.mxu1 }
 0x46b   : > { %1078 = vst.msk [vmem:[#allocation4] sm:$0xff] %vm513_vm1, %v1072_v60 }
 0x46c   : > { %v2876_v61 = vpop.f32.mrf.mxu1 }
 0x46e   : > { %v1483_v46 = vld [vmem:[#allocation3 + $0x8] sm:$0xff] }
 0x470   : > { %v1306_v63 = vpop.f32.mrf.mxu1  ;;  %v1482_v49 = vld [vmem:[#allocation3] sm:$0xff] }
 0x471   : > { %v1323_v1 = vmul.f32 %v3102_v62, %v1306_v63 }
 0x472   : > { %v2900_v2 = vpop.f32.mrf.mxu1 }
 0x473   : > { %2909 = vmatprep.mubr.msk.f32.mxu0 %vm692_vm3, %v1323_v1 }
 0x474   : > { %v1311_v4 = vpop.f32.mrf.mxu1 }
 0x475   : > { %v1324_v5 = vmul.f32 %v3104_v3, %v1311_v4  ;;  %v1820_v3 = vld [vmem:[%s3915_s7 + $0x10] sm:$0xff] }
 0x476   : > { %v2903_v7 = vpop.f32.mrf.mxu1 }
 0x477   : > { %2910 = vmatmul.mubr.msk.f32.vlgmr.msra.gmra.mxu0 %vm692_vm3, %v1324_v5 }
 0x478   : > { %v1316_v9 = vpop.f32.mrf.mxu1  ;;  %2913 = vmatpush3.msra.mxu0 %v1408_v6  ;;  %2914 = vmatprep.mubr.msk.f32.mxu0 %vm3281_vm0, %v3280_v0 }
 0x479   : > { %v1325_v10 = vmul.f32 %v3106_v8, %v1316_v9  ;;  %2932 = vmatprep.subr.mxu0 %v3280_v0 }
 0x47a   : > { %v2906_v11 = vpop.f32.mrf.mxu1 }
 0x47b   : > { %2915 = vmatmul.mubr.msk.f32.vlgmr.msra.gmra.mxu0 %vm692_vm3, %v1325_v10 }
 0x47c   : > { %2933 = vmatpush3.msra.mxu0 %v1639_v52  ;;  %v1593_v12 = vpop.f32.mrf.mxu1  ;;  %2938 = vmatprep.mubr.msk.f32.mxu0 %vm3281_vm0, %v3280_v0  ;;  %v1488_v52 = vld [vmem:[#allocation4] sm:$0xff] }
 0x47d   : > { %2934 = vmatprep.subr.mxu0 %v3280_v0  ;;  %v1607_v13 = vsel %vm788_vm4, %v1593_v12, -inf }
 0x47e   : > { %2935 = vmatpush3.msra.mxu0 %v1637_v53  ;;  %1608 = vmax.xlane.f32.xlu0 %v1607_v13  ;;  %v2925_v14 = vpop.f32.mrf.mxu1 }
 0x47f   : > { %2936 = vmatprep.subr.mxu0 %v3280_v0 }
 0x480   : > { %2937 = vmatpush3.msra.mxu0 %v1635_v54  ;;  %v1598_v15 = vpop.f32.mrf.mxu1 }
 0x481   : > { %v1610_v22 = vsel %vm788_vm4, %v1598_v15, -inf  ;;  %2957 = vmatprep.subr.mxu0 %v3280_v0 }
 0x482   : > { %1611 = vmax.xlane.f32.xlu1 %v1610_v22  ;;  %v2928_v23 = vpop.f32.mrf.mxu1 }
 0x484   : > { %v1603_v24 = vpop.f32.mrf.mxu1 }
 0x485   : > { %v1613_v25 = vsel %vm788_vm4, %v1603_v24, -inf }
 0x486   : > { %1614 = vmax.xlane.f32.xlu0 %v1613_v25  ;;  %v2931_v26 = vpop.f32.mrf.mxu1 }
 0x493   : > { %1921 = vrot.lane.b32.xlu1 %v3492_v17, %s3290_s15 }
 0x497   : > { %1914 = vrot.lane.b32.xlu1 %v3505_v20, %s3291_s17 }
 0x49c   : > { %1923 = vrot.lane.b32.xlu0 %v3494_v18, %s3290_s15  ;;  %s2458_s15 = sshll.u32 %s478_s24, 4  ;;  %s3785_s15 = int_to_ptr.vmem [resolvable:$true] %s2458_s15 }
 0x49d   : > { %p3164_p13 = scmp.lt.s32.totalorder %s3785_s15, %s3162_s21 }
 0x4a0   : > { %1912 = vrot.lane.b32.xlu0 %v3501_v19, %s3291_s17 }
 0x4a4   : > { %1916 = vrot.lane.b32.xlu0 %v3509_v21, %s3291_s17  ;;  %s3157_s17 = scalar_lea.vmem %s3785_s15, 256 }
 0x4a5   : > { %p3158_p9 = scmp.ne.s32.totalorder %s3785_s15, %s3157_s17  ;;  %p3165_p0 = scmp.lt.s32.totalorder %s3163_s14, %s3157_s17 }
 0x4a7   : > { %p3159_p10 = pnand %p3158_p9, %p3408_p5  ;;  %p3166_p1 = por %p3165_p0, %p3164_p13 }
 0x4a9   : > { %p3160_p12 = pneg %p3159_p10 }
 0x4ab   : > { %p3167_p2 = pnand %p3166_p1, %p3160_p12 }
 0x507   : > { %v1609_v28 = vpop.xlane.xlu0 %1608 }
 0x508   : > { %v1616_v29 = vsub.f32 %v1593_v12, %v1609_v28 }
 0x50a   : > { %v1619_v30 = vmul.f32 1.442695, %v1616_v29 }
 0x50b   : > { %v1612_v31 = vpop.xlane.xlu1 %1611 }
 0x50c   : > { %3107 = vpow2.f32 %v1619_v30  ;;  %v1617_v32 = vsub.f32 %v1598_v15, %v1612_v31 }
 0x50e   : > { %v1621_v33 = vmul.f32 1.442695, %v1617_v32 }
 0x50f   : > { %v1615_v34 = vpop.xlane.xlu0 %1614  ;;  %v1922_v40 = vpop.permute.xlu1 %1921 }
 0x510   : > { %3109 = vpow2.f32 %v1621_v33  ;;  %v1618_v35 = vsub.f32 %v1603_v24, %v1615_v34 }
 0x512   : > { %v1623_v36 = vmul.f32 1.442695, %v1618_v35 }
 0x513   : > { %v1924_v37 = vpop.permute.xlu0 %1923  ;;  %v1915_v43 = vpop.permute.xlu1 %1914 }
 0x514   : > { %3111 = vpow2.f32 %v1623_v36 }
 0x517   : > { %v1913_v42 = vpop.permute.xlu0 %1912 }
 0x519   : > { %v3108_v20 = vpop.eup %3107 }
 0x51a   : > { %2939 = vmatmul.mubr.msk.f32.vlgmr.msra.gmra.mxu0 %vm788_vm4, %v3108_v20  ;;  %v1625_v19 = vsel %vm788_vm4, %v3108_v20, 0.0 }
 0x51b   : > { %2958 = vmatpush3.xpose.msk.msra.mxu0 %vm692_vm3, %v1926_v27  ;;  %1626 = vadd.xlane.f32.xlu1 %v1625_v19  ;;  %v1917_v44 = vpop.permute.xlu0 %1916 }
 0x51c   : > { %2941 = vmatprep.mubr.msk.f32.mxu0 %vm3281_vm0, %v3280_v0  ;;  %2959 = vmatprep.subr.mxu0 %v3280_v0 }
 0x51d   : > { %v3110_v21 = vpop.eup %3109 }
 0x51e   : > { %2942 = vmatmul.mubr.msk.f32.gmra.mxu0 %vm788_vm4, %v3110_v21  ;;  %v1628_v38 = vsel %vm788_vm4, %v3110_v21, 0.0 }
 0x51f   : > { %2960 = vmatpush3.xpose.msk.msra.mxu0 %vm692_vm3, %v1924_v37  ;;  %1629 = vadd.xlane.f32.xlu0 %v1628_v38 }
 0x520   : > { %2944 = vmatprep.mubr.msk.f32.mxu0 %vm3281_vm0, %v3280_v0  ;;  %2961 = vmatprep.subr.mxu0 %v3280_v0 }
 0x521   : > { %v3112_v39 = vpop.eup %3111 }
 0x522   : > { %2945 = vmatmul.mubr.msk.f32.gmra.mxu0 %vm788_vm4, %v3112_v39  ;;  %v1631_v41 = vsel %vm788_vm4, %v3112_v39, 0.0 }
 0x523   : > { %2962 = vmatpush3.xpose.msk.msra.mxu0 %vm692_vm3, %v1922_v40  ;;  %1632 = vadd.xlane.f32.xlu0 %v1631_v41 }
 0x524   : > { %2963 = vmatprep.mubr.msk.f32.mxu0 %vm3281_vm0, %v3280_v0 }
 0x526   : > { %2964 = vmatmul.mubr.msk.f32.vlgmr.msra.gmra.mxu0 %vm692_vm3, %v1913_v42 }
 0x527   : > { %2966 = vmatprep.mubr.msk.f32.mxu0 %vm3281_vm0, %v3280_v0 }
 0x52a   : > { %2967 = vmatmul.mubr.msk.f32.gmra.mxu0 %vm692_vm3, %v1915_v43 }
 0x52b   : > { %2969 = vmatprep.mubr.msk.f32.mxu0 %vm3281_vm0, %v3280_v0 }
 0x52e   : > { %2970 = vmatmul.mubr.msk.f32.gmra.mxu0 %vm692_vm3, %v1917_v44 }
 0x537   : > { %v2911_v45 = vpop.f32.mrf.mxu0 }
 0x538   : > { %v1485_v47 = vadd.f32 %v2911_v45, %v1483_v46  ;;  %v2150_v46 = vld [vmem:[%s3913_s5 + $0x18] sm:$0xff] }
 0x539   : > { %v1399_v48 = vpop.f32.mrf.mxu0  ;;  %2987 = vmatprep.subr.mxu0 %v2150_v46 }
 0x53a   : > { %1487 = vst.msk [vmem:[#allocation3 + $0x8] sm:$0xff] %vm513_vm1, %v1485_v47  ;;  %v1484_v50 = vadd.f32 %v1482_v49, %v1399_v48  ;;  %2988 = vmatpush3.msra.mxu0 %v2150_v46  ;;  %v2343_v47 = vld [vmem:[%s3917_s9 + $0x18] sm:$0xff]  ;;  %v2342_v48 = vld [vmem:[%s3917_s9 + $0x10] sm:$0xff]  ;;  %v2341_v49 = vld [vmem:[%s3917_s9 + $0x8] sm:$0xff] }
 0x53b   : > { %v1478_v51 = vpop.f32.mrf.mxu0  ;;  %2992 = vmatprep.subr.mxu0 %v3280_v0 }
 0x53c   : > { %1486 = vst.msk [vmem:[#allocation3] sm:$0xff] %vm513_vm1, %v1484_v50  ;;  %v1489_v53 = vadd.f32 %v1488_v52, %v1478_v51  ;;  %v2338_v50 = vld [vmem:[%s506_s27] sm:$0xff]  ;;  %v2339_v52 = vld [vmem:[%s506_s27 + $0x8] sm:$0xff]  ;;  %s3764_s27 = scalar_lea.vmem [#allocation11], %s2652_s16 }
 0x53d   : > { %v2916_v54 = vpop.f32.mrf.mxu0  ;;  %v2340_v51 = vld [vmem:[%s3917_s9] sm:$0xff] }
 0x53e   : > { %1490 = vst.msk [vmem:[#allocation4] sm:$0xff] %vm513_vm1, %v1489_v53 }
 0x541   : > { %v1895_v34 = vld [vmem:[#allocation3 + $0x8] sm:$0xff] }
 0x543   : > { %v1894_v20 = vld [vmem:[#allocation3] sm:$0xff] }
 0x545   : > { %v1900_v37 = vld [vmem:[#allocation4] sm:$0xff] }
 0x5a4   : > { %v1627_v56 = vpop.xlane.xlu1 %1626 }
 0x5a5   : > { %3113 = vrcp.f32 %v1627_v56 }
 0x5a8   : > { %v1630_v57 = vpop.xlane.xlu0 %1629 }
 0x5a9   : > { %3115 = vrcp.f32 %v1630_v57 }
 0x5ac   : > { %v1633_v58 = vpop.xlane.xlu0 %1632 }
 0x5ad   : > { %3117 = vrcp.f32 %v1633_v58 }
 0x5b2   : > { %v3114_v59 = vpop.eup %3113 }
 0x5b6   : > { %v3116_v63 = vpop.eup %3115 }
 0x5ba   : > { %v3118_v5 = vpop.eup %3117 }
 0x5da   : > { %v1718_v60 = vpop.f32.mrf.mxu0 }
 0x5db   : > { %v1735_v61 = vmul.f32 %v3114_v59, %v1718_v60 }
 0x5dc   : > { %v2940_v62 = vpop.f32.mrf.mxu0 }
 0x5dd   : > { %2949 = vmatprep.mubr.msk.f32.mxu1 %vm692_vm3, %v1735_v61 }
 0x5de   : > { %v1723_v1 = vpop.f32.mrf.mxu0 }
 0x5df   : > { %v1736_v2 = vmul.f32 %v3116_v63, %v1723_v1  ;;  %v2232_v63 = vld [vmem:[%s3915_s7 + $0x18] sm:$0xff] }
 0x5e0   : > { %v2943_v4 = vpop.f32.mrf.mxu0 }
 0x5e1   : > { %2950 = vmatmul.mubr.msk.f32.vlgmr.msra.gmra.mxu1 %vm692_vm3, %v1736_v2 }
 0x5e2   : > { %v1728_v6 = vpop.f32.mrf.mxu0  ;;  %2953 = vmatpush3.msra.mxu1 %v1820_v3  ;;  %2954 = vmatprep.mubr.msk.f32.mxu1 %vm3281_vm0, %v3280_v0 }
 0x5e3   : > { %v1737_v7 = vmul.f32 %v3118_v5, %v1728_v6  ;;  %2972 = vmatprep.subr.mxu1 %v3280_v0  ;;  %v2713_v6 = vld [vmem:[#allocation5] ss:$0 sm:$0xff] }
 0x5e4   : > { %v2946_v8 = vpop.f32.mrf.mxu0 }
 0x5e5   : > { %2955 = vmatmul.mubr.msk.f32.vlgmr.msra.gmra.mxu1 %vm692_vm3, %v1737_v7 }
 0x5e6   : > { %v2005_v9 = vpop.f32.mrf.mxu0  ;;  %2978 = vmatprep.mubr.msk.f32.mxu1 %vm3281_vm0, %v3280_v0 }
 0x5e7   : > { %v2019_v10 = vsel %vm788_vm4, %v2005_v9, -inf }
 0x5e8   : > { %2020 = vmax.xlane.f32.xlu1 %v2019_v10  ;;  %v2965_v11 = vpop.f32.mrf.mxu0 }
 0x5ea   : > { %v2010_v12 = vpop.f32.mrf.mxu0 }
 0x5eb   : > { %v2022_v13 = vsel %vm788_vm4, %v2010_v12, -inf }
 0x5ec   : > { %2023 = vmax.xlane.f32.xlu0 %v2022_v13  ;;  %v2968_v14 = vpop.f32.mrf.mxu0 }
 0x5ee   : > { %v2015_v15 = vpop.f32.mrf.mxu0 }
 0x5ef   : > { %v2025_v23 = vsel %vm788_vm4, %v2015_v15, -inf }
 0x5f0   : > { %v2971_v22 = vpop.f32.mrf.mxu0 }
 0x5f1   : > { %v2711_v22 = vld [vmem:[%s3914_s6] ss:$0 sm:$0xff] }
 0x5f9   : > { %2048 = vrot.lane.b32.xlu1 %v3494_v18, %s3292_s10 }
 0x602   : > { %2050 = vrot.lane.b32.xlu0 %v3489_v16, %s3292_s10 }
 0x61d   : > { %2026 = vmax.xlane.f32.xlu1 %v2025_v23 }
 0x62e   : > { %2046 = vrot.lane.b32.xlu1 %v3492_v17, %s3292_s10 }
 0x671   : > { %v2021_v24 = vpop.xlane.xlu1 %2020 }
 0x672   : > { %v2028_v25 = vsub.f32 %v2005_v9, %v2021_v24 }
 0x674   : > { %v2031_v26 = vmul.f32 1.442695, %v2028_v25 }
 0x675   : > { %v2024_v27 = vpop.xlane.xlu0 %2023  ;;  %v2049_v31 = vpop.permute.xlu1 %2048 }
 0x676   : > { %3119 = vpow2.f32 %v2031_v26  ;;  %v2029_v28 = vsub.f32 %v2010_v12, %v2024_v27 }
 0x678   : > { %v2033_v29 = vmul.f32 1.442695, %v2029_v28 }
 0x679   : > { %v2051_v30 = vpop.permute.xlu0 %2050 }
 0x67a   : > { %3121 = vpow2.f32 %v2033_v29  ;;  %2973 = vmatpush3.msra.mxu1 %v2051_v30 }
 0x67b   : > { %2974 = vmatprep.subr.mxu1 %v3280_v0 }
 0x67c   : > { %2975 = vmatpush3.msra.mxu1 %v2049_v31 }
 0x67d   : > { %2976 = vmatprep.subr.mxu1 %v3280_v0 }
 0x683   : > { %v3120_v16 = vpop.eup %3119 }
 0x684   : > { %v2037_v18 = vsel %vm788_vm4, %v3120_v16, 0.0 }
 0x685   : > { %2038 = vadd.xlane.f32.xlu0 %v2037_v18 }
 0x687   : > { %v3122_v17 = vpop.eup %3121 }
 0x688   : > { %v2040_v32 = vsel %vm788_vm4, %v3122_v17, 0.0 }
 0x689   : > { %2041 = vadd.xlane.f32.xlu1 %v2040_v32 }
 0x6a1   : > { %v2951_v33 = vpop.f32.mrf.mxu1 }
 0x6a2   : > { %v1897_v35 = vadd.f32 %v2951_v33, %v1895_v34 }
 0x6a3   : > { %v1811_v36 = vpop.f32.mrf.mxu1 }
 0x6a4   : > { %1899 = vst.msk [vmem:[#allocation3 + $0x8] sm:$0xff] %vm513_vm1, %v1897_v35  ;;  %v1896_v19 = vadd.f32 %v1894_v20, %v1811_v36 }
 0x6a5   : > { %v1890_v21 = vpop.f32.mrf.mxu1 }
 0x6a6   : > { %1898 = vst.msk [vmem:[#allocation3] sm:$0xff] %vm513_vm1, %v1896_v19  ;;  %v1901_v38 = vadd.f32 %v1900_v37, %v1890_v21  ;;  %v2027_v39 = vpop.xlane.xlu1 %2026 }
 0x6a7   : > { %v2030_v40 = vsub.f32 %v2015_v15, %v2027_v39  ;;  %v2956_v41 = vpop.f32.mrf.mxu1 }
 0x6a8   : > { %1902 = vst.msk [vmem:[#allocation4] sm:$0xff] %vm513_vm1, %v1901_v38 }
 0x6a9   : > { %v2035_v42 = vmul.f32 1.442695, %v2030_v40 }
 0x6aa   : > { %v2047_v43 = vpop.permute.xlu1 %2046 }
 0x6ab   : > { %3123 = vpow2.f32 %v2035_v42  ;;  %2977 = vmatpush3.msra.mxu1 %v2047_v43  ;;  %v2307_v11 = vld [vmem:[#allocation3 + $0x8] sm:$0xff] }
 0x6ac   : > { %2979 = vmatmul.mubr.msk.f32.vlgmr.msra.gmra.mxu1 %vm788_vm4, %v3120_v16  ;;  %2997 = vmatprep.subr.mxu1 %v2343_v47 }
 0x6ad   : > { %2981 = vmatprep.mubr.msk.f32.mxu1 %vm3281_vm0, %v3280_v0  ;;  %2998 = vmatpush3.msra.mxu1 %v2343_v47  ;;  %v2306_v14 = vld [vmem:[#allocation3] sm:$0xff] }
 0x6ae   : > { %2999 = vmatprep.subr.mxu1 %v2342_v48 }
 0x6af   : > { %3000 = vmatpush3.msra.mxu1 %v2342_v48  ;;  %v2312_v24 = vld [vmem:[#allocation4] sm:$0xff] }
 0x6b0   : > { %2982 = vmatmul.mubr.msk.f32.gmra.mxu1 %vm788_vm4, %v3122_v17  ;;  %3001 = vmatprep.subr.mxu1 %v2341_v49 }
 0x6b1   : > { %2984 = vmatprep.mubr.msk.f32.mxu1 %vm3281_vm0, %v3280_v0  ;;  %3002 = vmatpush3.msra.mxu1 %v2341_v49 }
 0x6b2   : > { %3003 = vmatprep.subr.mxu1 %v2340_v51 }
 0x6b3   : > { %3004 = vmatpush3.msra.mxu1 %v2340_v51 }
 0x6b8   : > { %v3124_v44 = vpop.eup %3123 }
 0x6b9   : > { %2985 = vmatmul.mubr.msk.f32.gmra.mxu1 %vm788_vm4, %v3124_v44  ;;  %v2043_v45 = vsel %vm788_vm4, %v3124_v44, 0.0 }
 0x6ba   : > { %2044 = vadd.xlane.f32.xlu0 %v2043_v45  ;;  %3005 = vmatprep.mubr.msk.f32.mxu1 %vm513_vm1, %v2338_v50 }
 0x6bd   : > { %3006 = vmatmul.mubr.msk.f32.vlgmr.msra.gmra.mxu1 %vm513_vm1, %v2339_v52 }
 0x70e   : > { %v2039_v53 = vpop.xlane.xlu0 %2038 }
 0x70f   : > { %3125 = vrcp.f32 %v2039_v53 }
 0x712   : > { %v2042_v54 = vpop.xlane.xlu1 %2041 }
 0x713   : > { %3127 = vrcp.f32 %v2042_v54 }
 0x71c   : > { %v3126_v56 = vpop.eup %3125 }
 0x720   : > { %v3128_v60 = vpop.eup %3127 }
 0x743   : > { %v2045_v55 = vpop.xlane.xlu0 %2044 }
 0x744   : > { %3129 = vrcp.f32 %v2045_v55 }
 0x751   : > { %v3130_v2 = vpop.eup %3129 }
 0x76c   : > { %v2130_v57 = vpop.f32.mrf.mxu1 }
 0x76d   : > { %v2147_v58 = vmul.f32 %v3126_v56, %v2130_v57 }
 0x76e   : > { %v2980_v59 = vpop.f32.mrf.mxu1 }
 0x76f   : > { %2989 = vmatprep.mubr.msk.f32.mxu0 %vm692_vm3, %v2147_v58 }
 0x770   : > { %v2135_v61 = vpop.f32.mrf.mxu1 }
 0x771   : > { %v2148_v62 = vmul.f32 %v3128_v60, %v2135_v61 }
 0x772   : > { %v2983_v1 = vpop.f32.mrf.mxu1 }
 0x773   : > { %2990 = vmatmul.mubr.msk.f32.vlgmr.msra.gmra.mxu0 %vm692_vm3, %v2148_v62 }
 0x774   : > { %2993 = vmatpush3.msra.mxu0 %v2232_v63  ;;  %2994 = vmatprep.mubr.msk.f32.mxu0 %vm3281_vm0, %v3280_v0 }
 0x779   : > { %v2140_v3 = vpop.f32.mrf.mxu1 }
 0x77a   : > { %v2149_v4 = vmul.f32 %v3130_v2, %v2140_v3 }
 0x77b   : > { %v2986_v5 = vpop.f32.mrf.mxu1 }
 0x77c   : > { %2995 = vmatmul.mubr.msk.f32.vlgmr.msra.gmra.mxu0 %vm692_vm3, %v2149_v4 }
 0x77d   : > { %v3007_v7 = vpop.f32.mrf.mxu1 }
 0x77e   : > { %v2429_v8 = vadd.f32 %v3007_v7, %v2713_v6 }
 0x77f   : > { %v2423_v9 = vpop.f32.mrf.mxu1 }
 0x780   : > { %2433 = vst.msk [vmem:[%s3764_s27 + $0x8] sm:$0xff] %vm513_vm1, %v2429_v8  ;;  %v2424_v0 = vadd.f32 %v2713_v6, %v2423_v9 }
 0x782   : > { %2432 = vst.msk [vmem:[%s3764_s27] sm:$0xff] %vm513_vm1, %v2424_v0 }
 0x833   : > { %v2991_v10 = vpop.f32.mrf.mxu0 }
 0x834   : > { %v2309_v12 = vadd.f32 %v2991_v10, %v2307_v11 }
 0x835   : > { %v2223_v13 = vpop.f32.mrf.mxu0 }
 0x836   : > { %2311 = vst.msk [vmem:[#allocation3 + $0x8] sm:$0xff] %vm513_vm1, %v2309_v12  ;;  %v2308_v15 = vadd.f32 %v2306_v14, %v2223_v13 }
 0x838   : > { %2310 = vst.msk [vmem:[#allocation3] sm:$0xff] %vm513_vm1, %v2308_v15 }
 0x83c   : > { %v2302_v23 = vpop.f32.mrf.mxu0 }
 0x83d   : > { %v2313_v25 = vadd.f32 %v2312_v24, %v2302_v23  ;;  %v2316_v26 = vld [vmem:[#allocation3 + $0x8] sm:$0xff] }
 0x83e   : > { %v2996_v27 = vpop.f32.mrf.mxu0  ;;  %v2325_v28 = vadd.f32 %v2711_v22, %v2316_v26 }
 0x83f   : > { %2314 = vst.msk [vmem:[#allocation4] sm:$0xff] %vm513_vm1, %v2313_v25  ;;  %v2315_v29 = vld [vmem:[#allocation3] sm:$0xff] }
 0x840   : > { %v2324_v30 = vadd.f32 %v2711_v22, %v2315_v29  ;;  %2327 = vst.msk [vmem:[%s478_s24 + $0x8] sm:$0xff] %vm513_vm1, %v2325_v28 }
 0x842   : > { %2326 = vst.msk [vmem:[%s478_s24] sm:$0xff] %vm513_vm1, %v2324_v30 }
 0x843   : > { %3170 = shalt.err (!%p3167_p2)
}
 0x844   : > { %s3171_s24 = scalar_lea.hbm %s3783_s20, 256  ;;  %s3175_s22 = scalar_lea.hbm %s3919_s11, 512 }
 0x845   : > { %p3172_p3 = scmp.ne.s32.totalorder %s3783_s20, %s3171_s24  ;;  %p3176_p8 = scmp.lt.s32.totalorder %s3783_s20, %s3919_s11 }
 0x846   : > { %p3177_p11 = scmp.lt.s32.totalorder %s3175_s22, %s3171_s24 }
 0x847   : > { %p3173_p4 = pnand %p3172_p3, %p3408_p5 }
 0x848   : > { %p3178_p9 = por %p3177_p11, %p3176_p8 }
 0x849   : > { %p3174_p7 = pneg %p3173_p4 }
 0x84b   : > { %p3179_p10 = pnand %p3178_p9, %p3174_p7 }
 0x84d   : > { %3182 = shalt.err (!%p3179_p10)
}
 0x84e   : > { %s3294_s17 = smov 128   ;;  %s3295_s23 = smov 8   ;;  %v2712_v31 = vld [vmem:[%s3916_s8] ss:$0 sm:$0xff]  ;;  %v2328_v16 = vld [vmem:[#allocation4] sm:$0xff] }
 0x84f   : > { %s3945_s10 = scalar_lea.sflag [#allocation7], %s3761_s30  ;;  %s2721_s21 = sshll.u32 %s3389_s29, 7  ;;  %v2336_v18 = vadd.f32 %v2712_v31, %v2328_v16 }
 0x850   : > { %3012 = dma.vmem_to_hbm [thread:$0]  (%p3408_p5), %s3785_s15, 256, %s3783_s20, %s3945_s10, %s3294_s17, %s3294_s17, %s3295_s23  }
 0x851   : > { %s3946_s14 = sshll.u32 %s3761_s30, 3  ;;  %s2487_s0 = sshll.u32 %s3764_s27, 4  ;;  %s3830_s0 = int_to_ptr.vmem [resolvable:$true] %s2487_s0 }
 0x852   : > { %s485_s24 = scalar_lea.vmem [#allocation9], %s3946_s14  ;;  %s3826_s3 = scalar_lea.hbm %s3920_s12, %s2721_s21 }
 0x853   : > { %s2474_s22 = sshll.u32 %s485_s24, 4  ;;  %s3947_s15 = sshll.u32 %s3389_s29, 8  ;;  %2337 = vst.msk [vmem:[%s485_s24] sm:$0xff] %vm513_vm1, %v2336_v18  ;;  %s3828_s22 = int_to_ptr.vmem [resolvable:$true] %s2474_s22 }
 0x854   : > { %s3837_s10 = scalar_lea.hbm %s3921_s13, %s3947_s15  ;;  %s3948_s27 = sand.u32 1, %s3389_s29  }
 0x855   : > { %s3842_s19 = scalar_lea.sflag [#allocation10], %s3948_s27  ;;  %s3183_s1 = scalar_lea.vmem %s3828_s22, 128 }
 0x856   : > { %p3184_p12 = scmp.ne.s32.totalorder %s3828_s22, %s3183_s1  ;;  %s3296_s2 = smov [#allocation9]  }
 0x857   : > { %s3187_s16 = sshll.u32 %s3296_s2, 4  ;;  %s3188_s16 = int_to_ptr.vmem [resolvable:$false] %s3187_s16 }
 0x858   : > { %p3185_p13 = pnand %p3184_p12, %p3408_p5  ;;  %s3189_s21 = scalar_lea.vmem %s3188_s16, 256 }
 0x859   : > { %p3190_p1 = scmp.lt.s32.totalorder %s3828_s22, %s3188_s16  ;;  %p3191_p2 = scmp.lt.s32.totalorder %s3189_s21, %s3183_s1 }
 0x85a   : > { %p3186_p0 = pneg %p3185_p13 }
 0x85b   : > { %p3192_p3 = por %p3191_p2, %p3190_p1 }
 0x85d   : > { %p3193_p4 = pnand %p3192_p3, %p3186_p0 }
 0x85f   : > { %3196 = shalt.err (!%p3193_p4)
}
 0x860   : > { %s3197_s29 = scalar_lea.hbm %s3826_s3, 128  ;;  %s3201_s15 = scalar_lea.hbm %s3920_s12, 256 }
 0x861   : > { %p3198_p7 = scmp.ne.s32.totalorder %s3826_s3, %s3197_s29  ;;  %p3202_p9 = scmp.lt.s32.totalorder %s3826_s3, %s3920_s12 }
 0x862   : > { %p3203_p10 = scmp.lt.s32.totalorder %s3201_s15, %s3197_s29 }
 0x863   : > { %p3199_p8 = pnand %p3198_p7, %p3408_p5 }
 0x864   : > { %p3204_p12 = por %p3203_p10, %p3202_p9 }
 0x865   : > { %p3200_p11 = pneg %p3199_p8 }
 0x867   : > { %p3205_p13 = pnand %p3204_p12, %p3200_p11 }
 0x869   : > { %3208 = shalt.err (!%p3205_p13)
}
 0x86a   : > { %3013 = dma.vmem_to_hbm [thread:$0]  (%p3408_p5), %s3828_s22, 128, %s3826_s3, %s3842_s19  }
 0x86b   : > { %s3209_s27 = scalar_lea.vmem %s3830_s0, 256  ;;  %s3297_s1 = smov [#allocation11]  }
 0x86c   : > { %p3210_p0 = scmp.ne.s32.totalorder %s3830_s0, %s3209_s27  ;;  %s3213_s2 = sshll.u32 %s3297_s1, 4  ;;  %s3214_s2 = int_to_ptr.vmem [resolvable:$false] %s3213_s2 }
 0x86d   : > { %s3215_s16 = scalar_lea.vmem %s3214_s2, 512  ;;  %p3216_p3 = scmp.lt.s32.totalorder %s3830_s0, %s3214_s2 }
 0x86e   : > { %p3211_p1 = pnand %p3210_p0, %p3408_p5  ;;  %p3217_p4 = scmp.lt.s32.totalorder %s3215_s16, %s3209_s27 }
 0x870   : > { %p3212_p2 = pneg %p3211_p1  ;;  %p3218_p7 = por %p3217_p4, %p3216_p3 }
 0x872   : > { %p3219_p8 = pnand %p3218_p7, %p3212_p2 }
 0x874   : > { %3222 = shalt.err (!%p3219_p8)
}
 0x875   : > { %s3223_s21 = scalar_lea.hbm %s3837_s10, 256  ;;  %s3227_s29 = scalar_lea.hbm %s3921_s13, 512 }
 0x876   : > { %p3224_p11 = scmp.ne.s32.totalorder %s3837_s10, %s3223_s21  ;;  %p3228_p12 = scmp.lt.s32.totalorder %s3837_s10, %s3921_s13 }
 0x877   : > { %p3229_p13 = scmp.lt.s32.totalorder %s3227_s29, %s3223_s21 }
 0x878   : > { %p3225_p9 = pnand %p3224_p11, %p3408_p5 }
 0x879   : > { %p3230_p0 = por %p3229_p13, %p3228_p12 }
 0x87a   : > { %p3226_p10 = pneg %p3225_p9 }
 0x87c   : > { %p3231_p1 = pnand %p3230_p0, %p3226_p10 }
 0x87e   : > { %3234 = shalt.err (!%p3231_p1)
}
 0x87f   : > { %3014 = dma.vmem_to_hbm [thread:$0]  (%p3408_p5), %s3830_s0, 256, %s3837_s10, %s3842_s19, %s3294_s17, %s3294_s17, %s3295_s23  }
 0x880 PF: > { %p3034_p2 = scmp.ge.s32.totalorder %s3277_s28, 2  ;;  %s2502_s20 = sand.u32 1, %s3265_s25  }
 0x881   : > { %s2503_s30 = scalar_lea.sflag [#allocation7], %s2502_s20 }
 0x882   : > { %p3023_p3 = pnand %p3034_p2, %p3412_p6 }
 0x884   : > { %p3024_p4 = pneg %p3023_p3 }
 0x886   : > { %3256 = dma.done.wait (%p3024_p4), %s2503_s30, 256  }
 0x887   : > { %3258 = vsyncadd (%p3024_p4), %s2503_s30, 4294967040  ;;  %s3950_s18 = sadd.s32 4294967294, %s3277_s28  }
 0x888   : > { %s2511_s27 = sand.u32 1, %s3950_s18  }
 0x889   : > { %s2512_s1 = scalar_lea.sflag [#allocation10], %s2511_s27 }
 0x88a   : > { %3260 = dma.done.wait (%p3024_p4), %s2512_s1, 384  }
 0x88b   : > { %3262 = vsyncadd (%p3024_p4), %s2512_s1, 4294966912  ;;  %s3951_s28 = sld [smem:[#allocation16_spill]]  ;;  %s3954_s25 = smov %s3269_s26 }
 0x88c   : > { %s3952_s0 = sld [smem:[#allocation15_spill]] }
 0x88d   : > { %s3953_s27 = sld [smem:[#allocation17_spill]] }
 0x891   : > { %p28_p5 = scmp.ge.s32.totalorder %s3951_s28, 4  }
 0x892   : > { %s3955_s26 = smov %s3952_s0 }
 0x893   :  { %30 = sbr.rel (!%p28_p5) target bundleno = 12 (0xc), region = 142 }
 0x898   :  { %2526 = vsyncpa [#allocation6], 1 }
 0x899   :  { %2528 = vsyncpa [#allocation6 + $0x1], 1 }
 0x89a   :  { %2529 = vsyncpa [#allocation7], 1 }
 0x89b   :  { %2531 = vsyncpa [#allocation7 + $0x1], 1 }
 0x89c   :  { %2532 = vsyncpa [#allocation10], 1 }
 0x89d   :  { %2534 = vsyncpa [#allocation10 + $0x1], 1 }

</bundles_post_ra>
